<compile_context>
chip_gen: v7x
topology: tpu7x:2x2x1
jax: 0.10.0
libtpu: 0.0.40
codegen_flags: <defaults>
</compile_context>

<pallas_src>
import functools

import jax
import jax.numpy as jnp
from jax.experimental import pallas as pl
from jax.experimental.pallas import tpu as pltpu


def _round_up(x, m):
    return -(-x // m) * m


# ---------------------------------------------------------------------------
# Pallas kernel 1: backbone patchify matmul (bf16 out, fp32 accumulate)
# ---------------------------------------------------------------------------
def _matmul_bias_kernel(x_ref, w_ref, b_ref, o_ref, *, relu):
    acc = jnp.dot(x_ref[...], w_ref[...],
                  preferred_element_type=jnp.float32) + b_ref[...]
    if relu:
        acc = jnp.maximum(acc, 0.0)
    o_ref[...] = acc.astype(o_ref.dtype)


def matmul_bias(x, w, b, *, relu=False, out_dtype=jnp.float32,
                tm_max=512, min_steps=4):
    """(M, K) @ (K, N) + b, optional ReLU.  Output dtype is written directly
    by the kernel (no extra cast pass).  tm is a multiple of 16 and chosen so
    the grid has >= min_steps steps (DMA/compute overlap, megacore sharding).
    """
    M, K = x.shape
    N = w.shape[1]
    tm = max(16, min(tm_max, _round_up(max(1, M // min_steps), 16)))
    Mp = _round_up(M, tm)
    xb = x.astype(jnp.bfloat16)
    if Mp != M:
        xb = jnp.pad(xb, ((0, Mp - M), (0, 0)))
    out = pl.pallas_call(
        functools.partial(_matmul_bias_kernel, relu=relu),
        out_shape=jax.ShapeDtypeStruct((Mp, N), out_dtype),
        grid=(Mp // tm,),
        in_specs=[
            pl.BlockSpec((tm, K), lambda i: (i, 0)),
            pl.BlockSpec((K, N), lambda i: (0, 0)),
            pl.BlockSpec((1, N), lambda i: (0, 0)),
        ],
        out_specs=pl.BlockSpec((tm, N), lambda i: (i, 0)),
        compiler_params=pltpu.CompilerParams(
            dimension_semantics=("parallel",)),
    )(xb, w.astype(jnp.bfloat16), b.reshape(1, N).astype(jnp.float32))
    return out[:M]


# ---------------------------------------------------------------------------
# Pallas kernel 2: fused hm/wh/reg heads with IN-KERNEL im2col
#   input  : flattened, zero-padded feature row-tile  (P, F) bf16
#            (P = (th+3)*(W+2); row-major over (row, col))
#   output : (th*(W+2), 128) bf16 slab; cols [0:W) of each row are valid.
#   The 3x3 conv is 9 shifted slices of the flat tile dotted with the
#   corresponding F-row block of the block-diagonal fused w1.
# ---------------------------------------------------------------------------
def _fused_head_kernel(x_ref, w1_ref, b1_ref, w2_ref, b2_ref, o_ref,
                       *, th, wp, feat):
    mq = th * wp
    x = x_ref[...]                                        # (P, feat) bf16
    acc = jnp.zeros((mq, w1_ref.shape[1]), jnp.float32)
    for dy in range(3):
        for dx in range(3):
            k = dy * 3 + dx
            off = dy * wp + dx                            # static offset
            patch = x[off:off + mq, :]                    # (mq, feat)
            acc = acc + jnp.dot(patch, w1_ref[k * feat:(k + 1) * feat, :],
                                preferred_element_type=jnp.float32)
    h = jnp.maximum(acc + b1_ref[...], 0.0)               # (mq, H1) f32
    out = jnp.dot(h.astype(jnp.bfloat16), w2_ref[...],
                  preferred_element_type=jnp.float32) + b2_ref[...]
    o_ref[...] = out.astype(o_ref.dtype)


def fused_heads(xtiles, w1, b1, w2, b2, *, th, W):
    """xtiles: (G, P, F) bf16 flattened halo row-tiles, G = B * n_h."""
    G, P, F = xtiles.shape
    H1 = w1.shape[1]
    L = w2.shape[1]
    wp = W + 2
    mq = th * wp
    return pl.pallas_call(
        functools.partial(_fused_head_kernel, th=th, wp=wp, feat=F),
        out_shape=jax.ShapeDtypeStruct((G, mq, L), jnp.bfloat16),
        grid=(G,),
        in_specs=[
            pl.BlockSpec((None, P, F), lambda g: (g, 0, 0)),
            pl.BlockSpec((9 * F, H1), lambda g: (0, 0)),
            pl.BlockSpec((1, H1), lambda g: (0, 0)),
            pl.BlockSpec((H1, L), lambda g: (0, 0)),
            pl.BlockSpec((1, L), lambda g: (0, 0)),
        ],
        out_specs=pl.BlockSpec((None, mq, L), lambda g: (g, 0, 0)),
        compiler_params=pltpu.CompilerParams(
            dimension_semantics=("parallel",)),
    )(xtiles, w1, b1, w2, b2)


# ---------------------------------------------------------------------------
# Pallas kernel 3: sigmoid + 3x3 max-pool peak keep (ctdet _nms), tiled
#   input  : (th+2, W+2, 128) bf16 halo tile of the head slab (-30 border)
#   output : (th, W, 128) f32; non-peak -> 0, padded class lanes -> -1
#   f32 math inside (v5e has no bf16 VPU/EUP path).
# ---------------------------------------------------------------------------
def _nms_sigmoid_kernel(x_ref, o_ref, *, num_classes):
    thp, wpp, _ = x_ref.shape
    th, W = thp - 2, wpp - 2
    s = jax.nn.sigmoid(x_ref[...].astype(jnp.float32))    # (th+2, W+2, L)
    cmax = jnp.maximum(jnp.maximum(s[:, 0:W, :], s[:, 1:W + 1, :]),
                       s[:, 2:W + 2, :])                  # (th+2, W, L)
    hmax = jnp.maximum(jnp.maximum(cmax[0:th], cmax[1:th + 1]),
                       cmax[2:th + 2])                    # (th, W, L)
    center = s[1:th + 1, 1:W + 1, :]
    keep = center == hmax
    peaks = jnp.where(keep, center, 0.0)
    lane = jax.lax.broadcasted_iota(jnp.int32, peaks.shape, 2)
    o_ref[...] = jnp.where(lane < num_classes, peaks, -1.0)


def nms_sigmoid(nms_tiles, *, num_classes):
    """nms_tiles: (G, th+2, W+2, L) bf16 halo row-tiles, G = B * n_h."""
    G, thp, wpp, L = nms_tiles.shape
    th, W = thp - 2, wpp - 2
    return pl.pallas_call(
        functools.partial(_nms_sigmoid_kernel, num_classes=num_classes),
        out_shape=jax.ShapeDtypeStruct((G, th, W, L), jnp.float32),
        grid=(G,),
        in_specs=[pl.BlockSpec((None, thp, wpp, L), lambda g: (g, 0, 0, 0))],
        out_specs=pl.BlockSpec((None, th, W, L), lambda g: (g, 0, 0, 0)),
        compiler_params=pltpu.CompilerParams(
            dimension_semantics=("parallel",)),
    )(nms_tiles)


# ---------------------------------------------------------------------------
# JAX glue: halo tile builders, fused head params, decode, init, forward
# ---------------------------------------------------------------------------
def build_head_input_tiles(feat_nhwc, th):
    """feat:(B,H,W,F) bf16 -> flattened halo row-tiles (B*n_h, P, F) bf16.

    Zero-pad 1 top row, 2 bottom rows (the extra slack row keeps the flat 3x3
    window of the 2 trailing garbage columns in bounds), 1 col left/right.
    """
    B, H, W, F = feat_nhwc.shape
    n_h = H // th
    featp = jnp.pad(feat_nhwc, ((0, 0), (1, 2), (1, 1), (0, 0)))
    P = (th + 3) * (W + 2)
    tiles = [featp[:, i * th:i * th + th + 3].reshape(B, P, F)
             for i in range(n_h)]
    return jnp.stack(tiles, axis=1).reshape(B * n_h, P, F)


def build_nms_input_tiles(slab_spatial, W, th):
    """slab:(B,H,W+2,L) bf16 (cols [0:W) valid) -> (B*n_h, th+2, W+2, L)."""
    B, H, _, L = slab_spatial.shape
    n_h = H // th
    hm = slab_spatial[:, :, :W, :]
    hmp = jnp.pad(hm, ((0, 0), (1, 1), (1, 1), (0, 0)),
                  constant_values=-30.0)        # sigmoid(-30) ~ 0 border
    tiles = [hmp[:, i * th:i * th + th + 2] for i in range(n_h)]
    return jnp.stack(tiles, axis=1).reshape(B * n_h, th + 2, W + 2, L)


def _fuse_head_params(p, num_classes, head_conv, hidden_pad=128, out_pad=128):
    """Fuse hm/wh/reg heads into one block-diagonal (w1, b1, w2, b2) set.

    Output lanes: [0:C]=hm logits, [C:C+2]=wh, [C+2:C+4]=reg, rest zero.
    """
    hc = head_conv
    out_dims = (num_classes, 2, 2)
    n_out = sum(out_dims)
    w1 = jnp.concatenate([p["hm_w1"], p["wh_w1"], p["reg_w1"]], axis=1)
    b1 = jnp.concatenate([p["hm_b1"], p["wh_b1"], p["reg_b1"]])
    w2 = jnp.zeros((3 * hc, n_out), jnp.float32)
    col = 0
    for i, (name, oc) in enumerate(zip(("hm", "wh", "reg"), out_dims)):
        w2 = w2.at[i * hc:(i + 1) * hc, col:col + oc].set(p[f"{name}_w2"])
        col += oc
    b2 = jnp.concatenate([p["hm_b2"], p["wh_b2"], p["reg_b2"]])

    h1p = _round_up(3 * hc, hidden_pad)
    npad = _round_up(n_out, out_pad)
    w1 = jnp.pad(w1, ((0, 0), (0, h1p - 3 * hc)))
    b1 = jnp.pad(b1, (0, h1p - 3 * hc))
    w2 = jnp.pad(w2, ((0, h1p - 3 * hc), (0, npad - n_out)))
    b2 = jnp.pad(b2, (0, npad - n_out))
    return (w1.astype(jnp.bfloat16), b1.reshape(1, -1).astype(jnp.float32),
            w2.astype(jnp.bfloat16), b2.reshape(1, -1).astype(jnp.float32))


def ctdet_decode(scores, slab_spatial, num_classes, K):
    """top-K peaks -> (x1,y1,x2,y2,score,cls).  wh/reg gathered from slab."""
    B, H, W, L = scores.shape
    Wp = slab_spatial.shape[2]
    flat = scores.reshape(B, H * W * L)
    # TODO(synk): top-k + data-dependent gather stay in plain JAX (lax.top_k).
    topk_scores, topk_inds = jax.lax.top_k(flat, K)
    spatial = topk_inds // L
    clses = topk_inds % L                       # padded lanes are -1 -> never picked
    ys_i = spatial // W
    xs_i = spatial % W
    slab_flat = slab_spatial.reshape(B, H * Wp, L)
    g = jnp.take_along_axis(slab_flat, (ys_i * Wp + xs_i)[..., None],
                            axis=1).astype(jnp.float32)   # (B, K, L)
    wh = g[..., num_classes:num_classes + 2]
    reg = g[..., num_classes + 2:num_classes + 4]
    xs = xs_i.astype(jnp.float32) + reg[..., 0]
    ys = ys_i.astype(jnp.float32) + reg[..., 1]
    boxes = jnp.stack([xs - wh[..., 0] / 2.0, ys - wh[..., 1] / 2.0,
                       xs + wh[..., 0] / 2.0, ys + wh[..., 1] / 2.0], axis=-1)
    dets = jnp.concatenate(
        [boxes, topk_scores[..., None], clses.astype(jnp.float32)[..., None]],
        axis=-1)                                # (B, K, 6)
    return dets


def init_params(key, cin=3, patch=4, feat=8, head_conv=16, num_classes=8):
    ks = jax.random.split(key, 10)
    sc = 0.1
    p = {
        "patch_w": sc * jax.random.normal(ks[0], (cin * patch * patch, feat),
                                          jnp.float32),
        "patch_b": jnp.zeros((feat,), jnp.float32),
    }
    head_dims = {"hm": num_classes, "wh": 2, "reg": 2}
    for i, (name, out_c) in enumerate(head_dims.items()):
        p[f"{name}_w1"] = sc * jax.random.normal(
            ks[1 + 3 * i], (feat * 9, head_conv), jnp.float32)
        p[f"{name}_b1"] = jnp.zeros((head_conv,), jnp.float32)
        p[f"{name}_w2"] = sc * jax.random.normal(
            ks[2 + 3 * i], (head_conv, out_c), jnp.float32)
        # CenterNet initializes the hm head bias to -2.19 (focal-loss prior).
        p[f"{name}_b2"] = (jnp.full((out_c,), -2.19, jnp.float32)
                           if name == "hm"
                           else jnp.zeros((out_c,), jnp.float32))
    return p


def centernet_detect_forward(params, images, *, max_per_image=8, down_ratio=4,
                             image_mean=(0.485, 0.456, 0.406),
                             image_std=(0.229, 0.224, 0.225), th=8):
    """Inference forward of CenterNetDetect.  images: NCHW float32 in [0,1]."""
    B, Cin, Hin, Win = images.shape
    H, W = Hin // down_ratio, Win // down_ratio
    num_classes = params["hm_w2"].shape[1]
    head_conv = params["hm_w1"].shape[1]
    feat_c = params["patch_w"].shape[1]
    if H % th != 0:
        th = H          # TODO(synk): handle ragged heatmap heights
    n_h = H // th

    # --- GeneralizedRCNNTransform.normalize (resize omitted, see TODO) -----
    mean = jnp.asarray(image_mean, jnp.float32).reshape(1, Cin, 1, 1)
    std = jnp.asarray(image_std, jnp.float32).reshape(1, Cin, 1, 1)
    x = (images - mean) / std

    # --- synthetic backbone: stride-4 patchify conv, bf16 output ------------
    # TODO(synk): fold this matmul into the head kernel so the narrow (M, F)
    #   feature tensor never hits HBM (lane-sparse store).
    x = x.transpose(0, 2, 3, 1)                                  # NCHW -> NHWC
    x = x.reshape(B, H, down_ratio, W, down_ratio, Cin)
    x = x.transpose(0, 1, 3, 2, 4, 5).reshape(
        B * H * W, down_ratio * down_ratio * Cin)
    feat = matmul_bias(x, params["patch_w"], params["patch_b"], relu=True,
                       out_dtype=jnp.bfloat16)                   # (M, F) bf16
    feat = feat.reshape(B, H, W, feat_c)

    # --- fused heads: in-kernel im2col over halo row-tiles, bf16 slab out ---
    w1f, b1f, w2f, b2f = _fuse_head_params(params, num_classes, head_conv)
    xtiles = build_head_input_tiles(feat, th)                    # (G, P, F)
    slab = fused_heads(xtiles, w1f, b1f, w2f, b2f, th=th, W=W)   # (G, mq, 128)
    L = slab.shape[-1]
    slab_spatial = slab.reshape(B, n_h, th, W + 2, L).reshape(B, H, W + 2, L)

    # --- NMS: sigmoid + 3x3 max-pool peak keep, tiled over (B x H-tiles) ----
    nms_tiles = build_nms_input_tiles(slab_spatial, W, th)
    scores = nms_sigmoid(nms_tiles, num_classes=num_classes)     # (G, th, W, L)
    scores = scores.reshape(B, n_h, th, W, L).reshape(B, H, W, L)

    # --- decode: top-K + gather (plain JAX) ---------------------------------
    dets = ctdet_decode(scores, slab_spatial, num_classes, max_per_image)

    valid_ids = jnp.asarray(
        [1, 2, 3, 4, 5, 6, 7, 8, 9, 10, 11, 13, 14, 15, 16, 17, 18, 19, 20,
         21, 22, 23, 24, 25, 27, 28, 31, 32, 33, 34, 35, 36, 37, 38, 39, 40,
         41, 42, 43, 44, 46, 47, 48, 49, 50, 51, 52, 53, 54, 55, 56, 57, 58,
         59, 60, 61, 62, 63, 64, 65, 67, 70, 72, 73, 74, 75, 76, 77, 78, 79,
         80, 81, 82, 84, 85, 86, 87, 88, 89, 90], jnp.int32)

    detections = []
    for i in range(B):
        labels = valid_ids[dets[i, :, 5].astype(jnp.int32)]
        detections.append({
            "boxes": dets[i, :, :4] * down_ratio,    # scale back by down_ratio
            "scores": dets[i, :, 4],
            "labels": labels,
        })
    return detections


# ---------------------------------------------------------------------------
if __name__ == "__main__":
    key = jax.random.PRNGKey(0)
    k_param, k_img = jax.random.split(key)

    B, Cin, Hin, Win = 2, 3, 64, 64            # down_ratio=4 -> 16x16 heatmap
    num_classes = 8
    params = init_params(k_param, cin=Cin, patch=4, feat=8, head_conv=16,
                         num_classes=num_classes)
    images = jax.random.uniform(k_img, (B, Cin, Hin, Win), jnp.float32)

    fwd = jax.jit(functools.partial(centernet_detect_forward,
                                    max_per_image=8, down_ratio=4))
    dets = fwd(params, images)
    for d in dets:
        jax.block_until_ready(d["boxes"])
        jax.block_until_ready(d["scores"])
        jax.block_until_ready(d["labels"])

    assert dets[0]["boxes"].shape == (8, 4)
    assert dets[0]["scores"].shape == (8,)
    assert dets[0]["labels"].shape == (8,)
    print("KERNEL_OK")
</pallas_src>

<mosaic_0001>
module attributes {stable_mosaic.version = 11 : i64} {
  func.func @_matmul_bias_kernel(%arg0: i32, %arg1: memref<128x48xbf16, #tpu.memory_space<vmem>>, %arg2: memref<48x8xbf16, #tpu.memory_space<vmem>>, %arg3: memref<1x8xf32, #tpu.memory_space<vmem>>, %arg4: memref<128x8xbf16, #tpu.memory_space<vmem>>) attributes {dimension_semantics = [#tpu.dimension_semantics<parallel>], iteration_bounds = array<i64: 4>, scalar_prefetch = 0 : i64, scratch_operands = 0 : i64, tpu.core_type = #tpu.core_type<tc>, window_params = [{transform_indices = @transform_0, window_bounds = array<i64: 128, 48>}, {pipeline_mode = #tpu.pipeline_mode<synchronous>, transform_indices = @transform_1, window_bounds = array<i64: 48, 8>}, {pipeline_mode = #tpu.pipeline_mode<synchronous>, transform_indices = @transform_2, window_bounds = array<i64: 1, 8>}, {transform_indices = @transform_3, window_bounds = array<i64: 128, 8>}]} {
    %c0 = arith.constant 0 : index
    %c0_0 = arith.constant 0 : index
    %0 = vector.load %arg1[%c0, %c0_0] : memref<128x48xbf16, #tpu.memory_space<vmem>>, vector<128x48xbf16>
    %c0_1 = arith.constant 0 : index
    %c0_2 = arith.constant 0 : index
    %1 = vector.load %arg2[%c0_1, %c0_2] : memref<48x8xbf16, #tpu.memory_space<vmem>>, vector<48x8xbf16>
    %cst = arith.constant dense<0.000000e+00> : vector<128x8xf32>
    %2 = tpu.matmul %0, %1, %cst {dimension_numbers = #tpu.dot_dimension_numbers<[1], [0], [0], [1], [0, 0, 1, 1], [], []>} : vector<128x48xbf16>, vector<48x8xbf16>, vector<128x8xf32> -> vector<128x8xf32>
    %c0_3 = arith.constant 0 : index
    %c0_4 = arith.constant 0 : index
    %3 = vector.load %arg3[%c0_3, %c0_4] : memref<1x8xf32, #tpu.memory_space<vmem>>, vector<1x8xf32>
    %4 = vector.broadcast %3 : vector<1x8xf32> to vector<128x8xf32>
    %5 = arith.addf %2, %4 : vector<128x8xf32>
    %cst_5 = arith.constant 0.000000e+00 : f32
    %6 = vector.broadcast %cst_5 : f32 to vector<128x8xf32>
    %7 = arith.maximumf %5, %6 : vector<128x8xf32>
    %8 = arith.truncf %7 : vector<128x8xf32> to vector<128x8xbf16>
    %c0_6 = arith.constant 0 : index
    %c0_7 = arith.constant 0 : index
    %9 = vector.load %arg4[%c0_6, %c0_7] : memref<128x8xbf16, #tpu.memory_space<vmem>>, vector<128x8xbf16>
    tpu.vector_store %arg4[%c0_6, %c0_7], %8 {strides = array<i32>} : memref<128x8xbf16, #tpu.memory_space<vmem>>, vector<128x8xbf16>,
    return
  }
  func.func @transform_0(%arg0: i32) -> (i32, i32) {
    %c0_i32 = arith.constant 0 : i32
    %c0_i32_0 = arith.constant 0 : i32
    return %arg0, %c0_i32 : i32, i32
  }
  func.func @transform_1(%arg0: i32) -> (i32, i32) {
    %c0_i32 = arith.constant 0 : i32
    %c0_i32_0 = arith.constant 0 : i32
    %c0_i32_1 = arith.constant 0 : i32
    return %c0_i32, %c0_i32_0 : i32, i32
  }
  func.func @transform_2(%arg0: i32) -> (i32, i32) {
    %c0_i32 = arith.constant 0 : i32
    %c0_i32_0 = arith.constant 0 : i32
    %c0_i32_1 = arith.constant 0 : i32
    return %c0_i32, %c0_i32_0 : i32, i32
  }
  func.func @transform_3(%arg0: i32) -> (i32, i32) {
    %c0_i32 = arith.constant 0 : i32
    %c0_i32_0 = arith.constant 0 : i32
    return %arg0, %c0_i32 : i32, i32
  }
}

module attributes {stable_mosaic.version = 11 : i64} {
  func.func @_fused_head_kernel(%arg0: i32, %arg1: memref<1x198x8xbf16, #tpu.memory_space<vmem>>, %arg2: memref<72x128xbf16, #tpu.memory_space<vmem>>, %arg3: memref<1x128xf32, #tpu.memory_space<vmem>>, %arg4: memref<128x128xbf16, #tpu.memory_space<vmem>>, %arg5: memref<1x128xf32, #tpu.memory_space<vmem>>, %arg6: memref<1x144x128xbf16, #tpu.memory_space<vmem>>) attributes {dimension_semantics = [#tpu.dimension_semantics<parallel>], iteration_bounds = array<i64: 4>, scalar_prefetch = 0 : i64, scratch_operands = 0 : i64, tpu.core_type = #tpu.core_type<tc>, window_params = [{transform_indices = @transform_0, window_bounds = array<i64: 1, 198, 8>}, {pipeline_mode = #tpu.pipeline_mode<synchronous>, transform_indices = @transform_1, window_bounds = array<i64: 72, 128>}, {pipeline_mode = #tpu.pipeline_mode<synchronous>, transform_indices = @transform_2, window_bounds = array<i64: 1, 128>}, {pipeline_mode = #tpu.pipeline_mode<synchronous>, transform_indices = @transform_3, window_bounds = array<i64: 128, 128>}, {pipeline_mode = #tpu.pipeline_mode<synchronous>, transform_indices = @transform_4, window_bounds = array<i64: 1, 128>}, {transform_indices = @transform_5, window_bounds = array<i64: 1, 144, 128>}]} {
    %c0 = arith.constant 0 : index
    %c0_0 = arith.constant 0 : index
    %c0_1 = arith.constant 0 : index
    %0 = vector.load %arg1[%c0, %c0_0, %c0_1] : memref<1x198x8xbf16, #tpu.memory_space<vmem>>, vector<1x198x8xbf16>
    %1 = vector.shape_cast %0 : vector<1x198x8xbf16> to vector<198x8xbf16>
    %cst = arith.constant 0.000000e+00 : f32
    %2 = vector.broadcast %cst : f32 to vector<144x128xf32>
    %3 = vector.extract_strided_slice %1 {offsets = [0, 0], sizes = [144, 8], strides = [1, 1]} : vector<198x8xbf16> to vector<144x8xbf16>
    %c0_2 = arith.constant 0 : index
    %c0_3 = arith.constant 0 : index
    %4 = vector.load %arg2[%c0_2, %c0_3] : memref<72x128xbf16, #tpu.memory_space<vmem>>, vector<8x128xbf16>
    %cst_4 = arith.constant dense<0.000000e+00> : vector<144x128xf32>
    %5 = tpu.matmul %3, %4, %cst_4 {dimension_numbers = #tpu.dot_dimension_numbers<[1], [0], [0], [1], [0, 0, 1, 1], [], []>} : vector<144x8xbf16>, vector<8x128xbf16>, vector<144x128xf32> -> vector<144x128xf32>
    %6 = arith.addf %2, %5 : vector<144x128xf32>
    %7 = vector.extract_strided_slice %1 {offsets = [1, 0], sizes = [144, 8], strides = [1, 1]} : vector<198x8xbf16> to vector<144x8xbf16>
    %c8 = arith.constant 8 : index
    %c0_5 = arith.constant 0 : index
    %8 = vector.load %arg2[%c8, %c0_5] : memref<72x128xbf16, #tpu.memory_space<vmem>>, vector<8x128xbf16>
    %cst_6 = arith.constant dense<0.000000e+00> : vector<144x128xf32>
    %9 = tpu.matmul %7, %8, %cst_6 {dimension_numbers = #tpu.dot_dimension_numbers<[1], [0], [0], [1], [0, 0, 1, 1], [], []>} : vector<144x8xbf16>, vector<8x128xbf16>, vector<144x128xf32> -> vector<144x128xf32>
    %10 = arith.addf %6, %9 : vector<144x128xf32>
    %11 = vector.extract_strided_slice %1 {offsets = [2, 0], sizes = [144, 8], strides = [1, 1]} : vector<198x8xbf16> to vector<144x8xbf16>
    %c16 = arith.constant 16 : index
    %c0_7 = arith.constant 0 : index
    %12 = vector.load %arg2[%c16, %c0_7] : memref<72x128xbf16, #tpu.memory_space<vmem>>, vector<8x128xbf16>
    %cst_8 = arith.constant dense<0.000000e+00> : vector<144x128xf32>
    %13 = tpu.matmul %11, %12, %cst_8 {dimension_numbers = #tpu.dot_dimension_numbers<[1], [0], [0], [1], [0, 0, 1, 1], [], []>} : vector<144x8xbf16>, vector<8x128xbf16>, vector<144x128xf32> -> vector<144x128xf32>
    %14 = arith.addf %10, %13 : vector<144x128xf32>
    %15 = vector.extract_strided_slice %1 {offsets = [18, 0], sizes = [144, 8], strides = [1, 1]} : vector<198x8xbf16> to vector<144x8xbf16>
    %c24 = arith.constant 24 : index
    %c0_9 = arith.constant 0 : index
    %16 = vector.load %arg2[%c24, %c0_9] : memref<72x128xbf16, #tpu.memory_space<vmem>>, vector<8x128xbf16>
    %cst_10 = arith.constant dense<0.000000e+00> : vector<144x128xf32>
    %17 = tpu.matmul %15, %16, %cst_10 {dimension_numbers = #tpu.dot_dimension_numbers<[1], [0], [0], [1], [0, 0, 1, 1], [], []>} : vector<144x8xbf16>, vector<8x128xbf16>, vector<144x128xf32> -> vector<144x128xf32>
    %18 = arith.addf %14, %17 : vector<144x128xf32>
    %19 = vector.extract_strided_slice %1 {offsets = [19, 0], sizes = [144, 8], strides = [1, 1]} : vector<198x8xbf16> to vector<144x8xbf16>
    %c32 = arith.constant 32 : index
    %c0_11 = arith.constant 0 : index
    %20 = vector.load %arg2[%c32, %c0_11] : memref<72x128xbf16, #tpu.memory_space<vmem>>, vector<8x128xbf16>
    %cst_12 = arith.constant dense<0.000000e+00> : vector<144x128xf32>
    %21 = tpu.matmul %19, %20, %cst_12 {dimension_numbers = #tpu.dot_dimension_numbers<[1], [0], [0], [1], [0, 0, 1, 1], [], []>} : vector<144x8xbf16>, vector<8x128xbf16>, vector<144x128xf32> -> vector<144x128xf32>
    %22 = arith.addf %18, %21 : vector<144x128xf32>
    %23 = vector.extract_strided_slice %1 {offsets = [20, 0], sizes = [144, 8], strides = [1, 1]} : vector<198x8xbf16> to vector<144x8xbf16>
    %c40 = arith.constant 40 : index
    %c0_13 = arith.constant 0 : index
    %24 = vector.load %arg2[%c40, %c0_13] : memref<72x128xbf16, #tpu.memory_space<vmem>>, vector<8x128xbf16>
    %cst_14 = arith.constant dense<0.000000e+00> : vector<144x128xf32>
    %25 = tpu.matmul %23, %24, %cst_14 {dimension_numbers = #tpu.dot_dimension_numbers<[1], [0], [0], [1], [0, 0, 1, 1], [], []>} : vector<144x8xbf16>, vector<8x128xbf16>, vector<144x128xf32> -> vector<144x128xf32>
    %26 = arith.addf %22, %25 : vector<144x128xf32>
    %27 = vector.extract_strided_slice %1 {offsets = [36, 0], sizes = [144, 8], strides = [1, 1]} : vector<198x8xbf16> to vector<144x8xbf16>
    %c48 = arith.constant 48 : index
    %c0_15 = arith.constant 0 : index
    %28 = vector.load %arg2[%c48, %c0_15] : memref<72x128xbf16, #tpu.memory_space<vmem>>, vector<8x128xbf16>
    %cst_16 = arith.constant dense<0.000000e+00> : vector<144x128xf32>
    %29 = tpu.matmul %27, %28, %cst_16 {dimension_numbers = #tpu.dot_dimension_numbers<[1], [0], [0], [1], [0, 0, 1, 1], [], []>} : vector<144x8xbf16>, vector<8x128xbf16>, vector<144x128xf32> -> vector<144x128xf32>
    %30 = arith.addf %26, %29 : vector<144x128xf32>
    %31 = vector.extract_strided_slice %1 {offsets = [37, 0], sizes = [144, 8], strides = [1, 1]} : vector<198x8xbf16> to vector<144x8xbf16>
    %c56 = arith.constant 56 : index
    %c0_17 = arith.constant 0 : index
    %32 = vector.load %arg2[%c56, %c0_17] : memref<72x128xbf16, #tpu.memory_space<vmem>>, vector<8x128xbf16>
    %cst_18 = arith.constant dense<0.000000e+00> : vector<144x128xf32>
    %33 = tpu.matmul %31, %32, %cst_18 {dimension_numbers = #tpu.dot_dimension_numbers<[1], [0], [0], [1], [0, 0, 1, 1], [], []>} : vector<144x8xbf16>, vector<8x128xbf16>, vector<144x128xf32> -> vector<144x128xf32>
    %34 = arith.addf %30, %33 : vector<144x128xf32>
    %35 = vector.extract_strided_slice %1 {offsets = [38, 0], sizes = [144, 8], strides = [1, 1]} : vector<198x8xbf16> to vector<144x8xbf16>
    %c64 = arith.constant 64 : index
    %c0_19 = arith.constant 0 : index
    %36 = vector.load %arg2[%c64, %c0_19] : memref<72x128xbf16, #tpu.memory_space<vmem>>, vector<8x128xbf16>
    %cst_20 = arith.constant dense<0.000000e+00> : vector<144x128xf32>
    %37 = tpu.matmul %35, %36, %cst_20 {dimension_numbers = #tpu.dot_dimension_numbers<[1], [0], [0], [1], [0, 0, 1, 1], [], []>} : vector<144x8xbf16>, vector<8x128xbf16>, vector<144x128xf32> -> vector<144x128xf32>
    %38 = arith.addf %34, %37 : vector<144x128xf32>
    %c0_21 = arith.constant 0 : index
    %c0_22 = arith.constant 0 : index
    %39 = vector.load %arg3[%c0_21, %c0_22] : memref<1x128xf32, #tpu.memory_space<vmem>>, vector<1x128xf32>
    %40 = vector.broadcast %39 : vector<1x128xf32> to vector<144x128xf32>
    %41 = arith.addf %38, %40 : vector<144x128xf32>
    %cst_23 = arith.constant 0.000000e+00 : f32
    %42 = vector.broadcast %cst_23 : f32 to vector<144x128xf32>
    %43 = arith.maximumf %41, %42 : vector<144x128xf32>
    %44 = arith.truncf %43 : vector<144x128xf32> to vector<144x128xbf16>
    %c0_24 = arith.constant 0 : index
    %c0_25 = arith.constant 0 : index
    %45 = vector.load %arg4[%c0_24, %c0_25] : memref<128x128xbf16, #tpu.memory_space<vmem>>, vector<128x128xbf16>
    %cst_26 = arith.constant dense<0.000000e+00> : vector<144x128xf32>
    %46 = tpu.matmul %44, %45, %cst_26 {dimension_numbers = #tpu.dot_dimension_numbers<[1], [0], [0], [1], [0, 0, 1, 1], [], []>} : vector<144x128xbf16>, vector<128x128xbf16>, vector<144x128xf32> -> vector<144x128xf32>
    %c0_27 = arith.constant 0 : index
    %c0_28 = arith.constant 0 : index
    %47 = vector.load %arg5[%c0_27, %c0_28] : memref<1x128xf32, #tpu.memory_space<vmem>>, vector<1x128xf32>
    %48 = vector.broadcast %47 : vector<1x128xf32> to vector<144x128xf32>
    %49 = arith.addf %46, %48 : vector<144x128xf32>
    %50 = arith.truncf %49 : vector<144x128xf32> to vector<144x128xbf16>
    %c0_29 = arith.constant 0 : index
    %c0_30 = arith.constant 0 : index
    %c0_31 = arith.constant 0 : index
    %51 = vector.load %arg6[%c0_29, %c0_30, %c0_31] : memref<1x144x128xbf16, #tpu.memory_space<vmem>>, vector<1x144x128xbf16>
    %52 = vector.shape_cast %51 : vector<1x144x128xbf16> to vector<144x128xbf16>
    %53 = vector.shape_cast %50 : vector<144x128xbf16> to vector<1x144x128xbf16>
    tpu.vector_store %arg6[%c0_29, %c0_30, %c0_31], %53 {strides = array<i32>} : memref<1x144x128xbf16, #tpu.memory_space<vmem>>, vector<1x144x128xbf16>,
    return
  }
  func.func @transform_0(%arg0: i32) -> (i32, i32, i32) {
    %c0_i32 = arith.constant 0 : i32
    %c0_i32_0 = arith.constant 0 : i32
    %c0_i32_1 = arith.constant 0 : i32
    return %arg0, %c0_i32, %c0_i32_0 : i32, i32, i32
  }
  func.func @transform_1(%arg0: i32) -> (i32, i32) {
    %c0_i32 = arith.constant 0 : i32
    %c0_i32_0 = arith.constant 0 : i32
    %c0_i32_1 = arith.constant 0 : i32
    return %c0_i32, %c0_i32_0 : i32, i32
  }
  func.func @transform_2(%arg0: i32) -> (i32, i32) {
    %c0_i32 = arith.constant 0 : i32
    %c0_i32_0 = arith.constant 0 : i32
    %c0_i32_1 = arith.constant 0 : i32
    return %c0_i32, %c0_i32_0 : i32, i32
  }
  func.func @transform_3(%arg0: i32) -> (i32, i32) {
    %c0_i32 = arith.constant 0 : i32
    %c0_i32_0 = arith.constant 0 : i32
    %c0_i32_1 = arith.constant 0 : i32
    return %c0_i32, %c0_i32_0 : i32, i32
  }
  func.func @transform_4(%arg0: i32) -> (i32, i32) {
    %c0_i32 = arith.constant 0 : i32
    %c0_i32_0 = arith.constant 0 : i32
    %c0_i32_1 = arith.constant 0 : i32
    return %c0_i32, %c0_i32_0 : i32, i32
  }
  func.func @transform_5(%arg0: i32) -> (i32, i32, i32) {
    %c0_i32 = arith.constant 0 : i32
    %c0_i32_0 = arith.constant 0 : i32
    %c0_i32_1 = arith.constant 0 : i32
    return %arg0, %c0_i32, %c0_i32_0 : i32, i32, i32
  }
}

module attributes {stable_mosaic.version = 11 : i64} {
  func.func @_nms_sigmoid_kernel(%arg0: i32, %arg1: memref<1x10x18x128xbf16, #tpu.memory_space<vmem>>, %arg2: memref<1x8x16x128xf32, #tpu.memory_space<vmem>>) attributes {dimension_semantics = [#tpu.dimension_semantics<parallel>], iteration_bounds = array<i64: 4>, scalar_prefetch = 0 : i64, scratch_operands = 0 : i64, tpu.core_type = #tpu.core_type<tc>, window_params = [{transform_indices = @transform_0, window_bounds = array<i64: 1, 10, 18, 128>}, {transform_indices = @transform_1, window_bounds = array<i64: 1, 8, 16, 128>}]} {
    %c0 = arith.constant 0 : index
    %c0_0 = arith.constant 0 : index
    %c0_1 = arith.constant 0 : index
    %c0_2 = arith.constant 0 : index
    %0 = vector.load %arg1[%c0, %c0_0, %c0_1, %c0_2] : memref<1x10x18x128xbf16, #tpu.memory_space<vmem>>, vector<1x10x18x128xbf16>
    %1 = vector.shape_cast %0 : vector<1x10x18x128xbf16> to vector<10x18x128xbf16>
    %2 = arith.extf %1 : vector<10x18x128xbf16> to vector<10x18x128xf32>
    %3 = arith.negf %2 : vector<10x18x128xf32>
    %4 = math.exp %3 : vector<10x18x128xf32>
    %cst = arith.constant 1.000000e+00 : f32
    %5 = vector.broadcast %cst : f32 to vector<10x18x128xf32>
    %6 = arith.addf %5, %4 : vector<10x18x128xf32>
    %7 = arith.divf %5, %6 : vector<10x18x128xf32>
    %8 = vector.extract_strided_slice %7 {offsets = [0, 0, 0], sizes = [10, 16, 128], strides = [1, 1, 1]} : vector<10x18x128xf32> to vector<10x16x128xf32>
    %9 = vector.extract_strided_slice %7 {offsets = [0, 1, 0], sizes = [10, 16, 128], strides = [1, 1, 1]} : vector<10x18x128xf32> to vector<10x16x128xf32>
    %10 = arith.maximumf %8, %9 : vector<10x16x128xf32>
    %11 = vector.extract_strided_slice %7 {offsets = [0, 2, 0], sizes = [10, 16, 128], strides = [1, 1, 1]} : vector<10x18x128xf32> to vector<10x16x128xf32>
    %12 = arith.maximumf %10, %11 : vector<10x16x128xf32>
    %13 = vector.extract_strided_slice %12 {offsets = [0, 0, 0], sizes = [8, 16, 128], strides = [1, 1, 1]} : vector<10x16x128xf32> to vector<8x16x128xf32>
    %14 = vector.extract_strided_slice %12 {offsets = [1, 0, 0], sizes = [8, 16, 128], strides = [1, 1, 1]} : vector<10x16x128xf32> to vector<8x16x128xf32>
    %15 = arith.maximumf %13, %14 : vector<8x16x128xf32>
    %16 = vector.extract_strided_slice %12 {offsets = [2, 0, 0], sizes = [8, 16, 128], strides = [1, 1, 1]} : vector<10x16x128xf32> to vector<8x16x128xf32>
    %17 = arith.maximumf %15, %16 : vector<8x16x128xf32>
    %18 = vector.extract_strided_slice %7 {offsets = [1, 1, 0], sizes = [8, 16, 128], strides = [1, 1, 1]} : vector<10x18x128xf32> to vector<8x16x128xf32>
    %19 = arith.cmpf oeq, %18, %17 : vector<8x16x128xf32>
    %cst_3 = arith.constant 0.000000e+00 : f32
    %20 = vector.broadcast %cst_3 : f32 to vector<8x16x128xf32>
    %21 = arith.select %19, %18, %20 : vector<8x16x128xi1>, vector<8x16x128xf32>
    %22 = tpu.iota {dimensions = array<i32: 2>} : vector<8x16x128xi32>
    %c8_i32 = arith.constant 8 : i32
    %23 = vector.broadcast %c8_i32 : i32 to vector<8x16x128xi32>
    %24 = arith.cmpi slt, %22, %23 : vector<8x16x128xi32>
    %cst_4 = arith.constant -1.000000e+00 : f32
    %25 = vector.broadcast %cst_4 : f32 to vector<8x16x128xf32>
    %26 = arith.select %24, %21, %25 : vector<8x16x128xi1>, vector<8x16x128xf32>
    %c0_5 = arith.constant 0 : index
    %c0_6 = arith.constant 0 : index
    %c0_7 = arith.constant 0 : index
    %c0_8 = arith.constant 0 : index
    %27 = vector.load %arg2[%c0_5, %c0_6, %c0_7, %c0_8] : memref<1x8x16x128xf32, #tpu.memory_space<vmem>>, vector<1x8x16x128xf32>
    %28 = vector.shape_cast %27 : vector<1x8x16x128xf32> to vector<8x16x128xf32>
    %29 = vector.shape_cast %26 : vector<8x16x128xf32> to vector<1x8x16x128xf32>
    tpu.vector_store %arg2[%c0_5, %c0_6, %c0_7, %c0_8], %29 {strides = array<i32>} : memref<1x8x16x128xf32, #tpu.memory_space<vmem>>, vector<1x8x16x128xf32>,
    return
  }
  func.func @transform_0(%arg0: i32) -> (i32, i32, i32, i32) {
    %c0_i32 = arith.constant 0 : i32
    %c0_i32_0 = arith.constant 0 : i32
    %c0_i32_1 = arith.constant 0 : i32
    %c0_i32_2 = arith.constant 0 : i32
    return %arg0, %c0_i32, %c0_i32_0, %c0_i32_1 : i32, i32, i32, i32
  }
  func.func @transform_1(%arg0: i32) -> (i32, i32, i32, i32) {
    %c0_i32 = arith.constant 0 : i32
    %c0_i32_0 = arith.constant 0 : i32
    %c0_i32_1 = arith.constant 0 : i32
    %c0_i32_2 = arith.constant 0 : i32
    return %arg0, %c0_i32, %c0_i32_0, %c0_i32_1 : i32, i32, i32, i32
  }
}

</mosaic_0001>

<bundles_post_ra>
// kernel: centernet_detect_forward.3
= control target key start
LH: loop header
LB: loop body
LE: loop exit
PB: predicated region body
PF: predicated region fallthrough
CT: control target
= control target key end

     0   :  { %s686_s12 = smov 0   ;;  %s764_s0 = inlined_call_operand.vmem [shape: bf16[512,48], index: 0, kind: input, shape index: {}]   ;;  %s765_s1 = inlined_call_operand.vmem [shape: bf16[48,8], index: 1, kind: input, shape index: {}]   ;;  %s766_s2 = inlined_call_operand.vmem [shape: f32[1,8], index: 2, kind: input, shape index: {}]   ;;  %s767_s3 = inlined_call_operand.vmem [shape: bf16[512,8], index: 3, kind: output, shape index: {}]  }
   0x1 LB: > { %s537_s13 = sadd.s32 4294967295, %s664_s12   ;;  %p541_p0 = scmp.ge.s32.totalorder %s664_s12, 1  ;;  %s664_s12 = sphi %s686_s12, %s13_s12  }
   0x2   : > { %p138_p1 = scmp.lt.s32.totalorder %s664_s12, 5 }
   0x4   : > { %p139_p2 = pnand %p541_p0, %p138_p1 }
   0x5   : > { %v647_v0 = vld [vmem:[%s765_s1] sm:$0xff] (!%p139_p2)   ;;  %s542_s16 = sshll.u32 (!%p139_p2), %s537_s13, 4  ;;  %v648_v1 = vld [vmem:[%s765_s1 + $0x8] sm:$0xff] (!%p139_p2)   ;;  %v649_v2 = vld [vmem:[%s765_s1 + $0x10] sm:$0xff] (!%p139_p2)   ;;  %vm262_vm0 = vcmask (!%p139_p2), 392192   ;;  %vm464_vm1 = vcmask (!%p139_p2), 60416  }
   0x6   : > { %142 = sbr.rel (%p139_p2) target bundleno = 249 (0xf9), region = 32  ;;  %p163_p3 = scmp.lt.s32.totalorder (!%p139_p2), %s542_s16, 63  ;;  %611 = vmatprep.subr.bf16.mxu0 (!%p139_p2), %v647_v0  ;;  %633 = vmatprep.subr.bf16.mxu1 (!%p139_p2), %v647_v0  ;;  %v546_v11 = vld [vmem:[%s766_s2] ss:$0 sm:$0xff] (!%p139_p2) }
   0x7   : > { %612 = vmatpush3.bf16.msra.mxu0 (!%p139_p2), %v647_v0  ;;  %636 = vmatpush3.bf16.msra.mxu1 (!%p139_p2), %v647_v0 }
   0x8   : > { %613 = vmatprep.subr.bf16.mxu0 (!%p139_p2), %v648_v1  ;;  %634 = vmatprep.subr.bf16.mxu1 (!%p139_p2), %v648_v1 }
   0xb   : > { %614 = vmatpush3.bf16.msra.mxu0 (!%p139_p2), %v648_v1  ;;  %637 = vmatpush3.bf16.msra.mxu1 (!%p139_p2), %v648_v1 }
   0xc   : > { %615 = vmatprep.subr.bf16.mxu0 (!%p139_p2), %v649_v2  ;;  %635 = vmatprep.subr.bf16.mxu1 (!%p139_p2), %v649_v2 }
   0xd   : > { %s769_s16 = smov (!%p163_p3, %s542_s16), 63 }
   0xe   : > { %s543_s21 = sshll.u32 %s769_s16, 2 }
   0xf   : > { %s166_s24 = scalar_lea.vmem %s764_s0, %s543_s21  ;;  %616 = vmatpush3.bf16.msra.mxu0 %v649_v2  ;;  %638 = vmatpush3.bf16.msra.mxu1 %v649_v2  ;;  %s727_s29 = scalar_lea.vmem %s767_s3, %s543_s21 }
  0x10   : > { %v650_v3 = vld [vmem:[%s166_s24] sm:$0xff]   ;;  %v652_v5 = vld [vmem:[%s166_s24 + $0x8] sm:$0xff]   ;;  %v654_v7 = vld [vmem:[%s166_s24 + $0x10] sm:$0xff]  }
  0x11   : > { %v651_v4 = vld [vmem:[%s166_s24 + $0x20] sm:$0xff]   ;;  %617 = vmatprep.mubr.msk.bf16.mxu0 %vm262_vm0, %v650_v3  ;;  %v653_v6 = vld [vmem:[%s166_s24 + $0x28] sm:$0xff]   ;;  %v655_v8 = vld [vmem:[%s166_s24 + $0x30] sm:$0xff]  }
  0x12   : > { %625 = vmatprep.mubr.msk.bf16.mxu1 %vm262_vm0, %v651_v4  ;;  %618 = vmatmul.mubr.msk.bf16.vlgmr.msra.gmra.mrb[0].mxu0 %vm262_vm0, %v652_v5  ;;  %v656_v9 = vld [vmem:[%s166_s24 + $0x18] sm:$0xff]  }
  0x13   : > { %626 = vmatmul.mubr.msk.bf16.vlgmr.msra.gmra.mrb[0].mxu1 %vm262_vm0, %v653_v6  ;;  %621 = vmatprep.mubr.msk.bf16.mxu0 %vm262_vm0, %v654_v7  ;;  %v657_v10 = vld [vmem:[%s166_s24 + $0x38] sm:$0xff]  }
  0x14   : > { %629 = vmatprep.mubr.msk.bf16.mxu1 %vm262_vm0, %v655_v8 }
  0x1a   : > { %622 = vmatmul.mubr.msk.bf16.gmra.mrb[4].mxu0 %vm262_vm0, %v656_v9 }
  0x1b   : > { %630 = vmatmul.mubr.msk.bf16.gmra.mrb[4].mxu1 %vm262_vm0, %v657_v10 }
  0xe5   : > { %v619_v12 = vpop.f32.mrb[0].mxu0 }
  0xe6   : > { %v627_v13 = vpop.f32.mrb[0].mxu1  ;;  %v330_v14 = vadd.f32 %v619_v12, %v546_v11  ;;  %v321_v16 = vpop.f32.mrb[1].mxu0 }
  0xe7   : > { %v362_v15 = vadd.f32 %v627_v13, %v546_v11  ;;  %v353_v17 = vpop.f32.mrb[1].mxu1  ;;  %v322_v18 = vadd.f32 %v546_v11, %v321_v16  ;;  %v620_v20 = vpop.f32.mrb[2].mxu0 }
  0xe8   : > { %v354_v19 = vadd.f32 %v546_v11, %v353_v17  ;;  %v628_v21 = vpop.f32.mrb[2].mxu1  ;;  %v386_v22 = vmax.f32 %v330_v14, 0.0  ;;  %v333_v24 = vadd.f32 %v620_v20, %v546_v11  ;;  %v324_v26 = vpop.f32.mrb[3].mxu0 }
  0xe9   : > { %v394_v23 = vmax.f32 %v362_v15, 0.0  ;;  %v365_v25 = vadd.f32 %v628_v21, %v546_v11  ;;  %v356_v27 = vpop.f32.mrb[3].mxu1  ;;  %v384_v28 = vmax.f32 %v322_v18, 0.0  ;;  %v325_v30 = vadd.f32 %v546_v11, %v324_v26 }
  0xea   : > { %v392_v29 = vmax.f32 %v354_v19, 0.0  ;;  %v357_v31 = vadd.f32 %v546_v11, %v356_v27  ;;  %v586_v32 = vpack.c.bf16 %v386_v22, %v386_v22  ;;  %v387_v34 = vmax.f32 %v333_v24, 0.0 }
  0xeb   : > { %v594_v33 = vpack.c.bf16 %v394_v23, %v394_v23  ;;  %v395_v35 = vmax.f32 %v365_v25, 0.0  ;;  %v584_v36 = vpack.c.bf16 %v384_v28, %v384_v28  ;;  %v385_v38 = vmax.f32 %v325_v30, 0.0 }
  0xec   : > { %v592_v37 = vpack.c.bf16 %v392_v29, %v392_v29  ;;  %v393_v39 = vmax.f32 %v357_v31, 0.0  ;;  %467 = vst.msk [vmem:[%s727_s29 + $0x8] sm:$0xf] %vm464_vm1, %v586_v32  ;;  %v587_v40 = vpack.c.bf16 %v387_v34, %v387_v34 }
  0xed   : > { %475 = vst.msk [vmem:[%s727_s29 + $0x28] sm:$0xf] %vm464_vm1, %v594_v33  ;;  %v595_v41 = vpack.c.bf16 %v395_v35, %v395_v35  ;;  %465 = vst.msk [vmem:[%s727_s29] sm:$0xf] %vm464_vm1, %v584_v36  ;;  %v585_v42 = vpack.c.bf16 %v385_v38, %v385_v38  ;;  %v623_v44 = vpop.f32.mrb[4].mxu0 }
  0xee   : > { %473 = vst.msk [vmem:[%s727_s29 + $0x20] sm:$0xf] %vm464_vm1, %v592_v37  ;;  %v593_v43 = vpack.c.bf16 %v393_v39, %v393_v39  ;;  %v631_v45 = vpop.f32.mrb[4].mxu1  ;;  %468 = vst.msk [vmem:[%s727_s29 + $0xc] sm:$0xf] %vm464_vm1, %v587_v40  ;;  %v346_v46 = vadd.f32 %v623_v44, %v546_v11  ;;  %v337_v48 = vpop.f32.mrb[5].mxu0 }
  0xef   : > { %476 = vst.msk [vmem:[%s727_s29 + $0x2c] sm:$0xf] %vm464_vm1, %v595_v41  ;;  %v378_v47 = vadd.f32 %v631_v45, %v546_v11  ;;  %v369_v49 = vpop.f32.mrb[5].mxu1  ;;  %466 = vst.msk [vmem:[%s727_s29 + $0x4] sm:$0xf] %vm464_vm1, %v585_v42  ;;  %v338_v50 = vadd.f32 %v546_v11, %v337_v48  ;;  %v624_v52 = vpop.f32.mrb[6].mxu0 }
  0xf0   : > { %474 = vst.msk [vmem:[%s727_s29 + $0x24] sm:$0xf] %vm464_vm1, %v593_v43  ;;  %v370_v51 = vadd.f32 %v546_v11, %v369_v49  ;;  %v632_v53 = vpop.f32.mrb[6].mxu1  ;;  %v390_v54 = vmax.f32 %v346_v46, 0.0  ;;  %v349_v56 = vadd.f32 %v624_v52, %v546_v11  ;;  %v340_v58 = vpop.f32.mrb[7].mxu0 }
  0xf1   : > { %v398_v55 = vmax.f32 %v378_v47, 0.0  ;;  %v381_v57 = vadd.f32 %v632_v53, %v546_v11  ;;  %v372_v59 = vpop.f32.mrb[7].mxu1  ;;  %v388_v60 = vmax.f32 %v338_v50, 0.0  ;;  %v341_v62 = vadd.f32 %v546_v11, %v340_v58 }
  0xf2   : > { %v396_v61 = vmax.f32 %v370_v51, 0.0  ;;  %v373_v63 = vadd.f32 %v546_v11, %v372_v59  ;;  %v590_v0 = vpack.c.bf16 %v390_v54, %v390_v54  ;;  %v391_v2 = vmax.f32 %v349_v56, 0.0 }
  0xf3   : > { %v598_v1 = vpack.c.bf16 %v398_v55, %v398_v55  ;;  %v399_v3 = vmax.f32 %v381_v57, 0.0  ;;  %v588_v4 = vpack.c.bf16 %v388_v60, %v388_v60  ;;  %v389_v6 = vmax.f32 %v341_v62, 0.0 }
  0xf4   : > { %v596_v5 = vpack.c.bf16 %v396_v61, %v396_v61  ;;  %v397_v7 = vmax.f32 %v373_v63, 0.0  ;;  %471 = vst.msk [vmem:[%s727_s29 + $0x18] sm:$0xf] %vm464_vm1, %v590_v0  ;;  %v591_v8 = vpack.c.bf16 %v391_v2, %v391_v2 }
  0xf5   : > { %479 = vst.msk [vmem:[%s727_s29 + $0x38] sm:$0xf] %vm464_vm1, %v598_v1  ;;  %v599_v9 = vpack.c.bf16 %v399_v3, %v399_v3  ;;  %469 = vst.msk [vmem:[%s727_s29 + $0x10] sm:$0xf] %vm464_vm1, %v588_v4  ;;  %v589_v10 = vpack.c.bf16 %v389_v6, %v389_v6 }
  0xf6   : > { %477 = vst.msk [vmem:[%s727_s29 + $0x30] sm:$0xf] %vm464_vm1, %v596_v5  ;;  %v597_v11 = vpack.c.bf16 %v397_v7, %v397_v7  ;;  %472 = vst.msk [vmem:[%s727_s29 + $0x1c] sm:$0xf] %vm464_vm1, %v591_v8 }
  0xf7   : > { %480 = vst.msk [vmem:[%s727_s29 + $0x3c] sm:$0xf] %vm464_vm1, %v599_v9  ;;  %470 = vst.msk [vmem:[%s727_s29 + $0x14] sm:$0xf] %vm464_vm1, %v589_v10 }
  0xf8   : > { %478 = vst.msk [vmem:[%s727_s29 + $0x34] sm:$0xf] %vm464_vm1, %v597_v11 }
  0xf9 PF: > { %s13_s12 = sadd.s32 1, %s664_s12  }
  0xfa   : > { %p10_p4 = scmp.ge.s32.totalorder %s13_s12, 6  }
  0xfc   :  { %12 = sbr.rel (!%p10_p4) target bundleno = 1 (0x1), region = 62 }

// kernel: centernet_detect_forward.4
= control target key start
LH: loop header
LB: loop body
LE: loop exit
PB: predicated region body
PF: predicated region fallthrough
CT: control target
= control target key end

     0   :  { %s3006_s18 = smov 0   ;;  %s3945_s0 = inlined_call_operand.vmem [shape: bf16[4,198,8], index: 0, kind: input, shape index: {}]   ;;  %s3946_s1 = inlined_call_operand.vmem [shape: bf16[72,128], index: 1, kind: input, shape index: {}]   ;;  %s3947_s2 = inlined_call_operand.vmem [shape: f32[1,128], index: 2, kind: input, shape index: {}]   ;;  %s3948_s3 = inlined_call_operand.vmem [shape: bf16[128,128], index: 3, kind: input, shape index: {}]   ;;  %s3949_s4 = inlined_call_operand.vmem [shape: f32[1,128], index: 4, kind: input, shape index: {}]   ;;  %s3950_s5 = inlined_call_operand.vmem [shape: bf16[4,144,128], index: 5, kind: output, shape index: {}]  }
   0x1 LB: > { %s2228_s19 = sadd.s32 4294967295, %s2972_s18   ;;  %p2232_p0 = scmp.ge.s32.totalorder %s2972_s18, 1  ;;  %s2972_s18 = sphi %s3006_s18, %s15_s18  }
   0x2   : > { %p187_p1 = scmp.lt.s32.totalorder %s2972_s18, 5 }
   0x4   : > { %p188_p2 = pnand %p2232_p0, %p187_p1 }
   0x5   : > { %v250_v0 = vld [vmem:[%s3946_s1 + $0x4] sm:$0xf] (!%p188_p2)  ;;  %vm404_vm0 = vcmask (!%p188_p2), 1043456   ;;  %v249_v1 = vld [vmem:[%s3946_s1] sm:$0xf] (!%p188_p2)  ;;  %v2974_v2 = vmov (!%p188_p2), 0.0  }
   0x6   : > { %191 = sbr.rel (%p188_p2) target bundleno = 818 (0x332), region = 40  ;;  %2538 = vmatprep.subr.bf16.mxu0 (!%p188_p2), %v2974_v2  ;;  %v406_v3 = vsel (!%p188_p2), %vm404_vm0, %v250_v0, 0  ;;  %2576 = vmatprep.subr.bf16.mxu1 (!%p188_p2), %v2974_v2  ;;  %v532_v4 = vsel (!%p188_p2), %vm404_vm0, %v249_v1, 0  ;;  %p215_p3 = scmp.lt.s32.totalorder (!%p188_p2), %s2228_s19, 3  ;;  %vm2975_vm1 = vmmov (!%p188_p2), 0   ;;  %vm376_vm2 = vcmask (!%p188_p2), 64512  }
   0x7   : > { %2539 = vmatpush3.bf16.msra.mxu0 (!%p188_p2), %v406_v3  ;;  %2577 = vmatpush3.bf16.msra.mxu1 (!%p188_p2), %v532_v4  ;;  %v813_v5 = vld [vmem:[%s3946_s1 + $0xc] sm:$0xf] (!%p188_p2)  ;;  %v639_v15 = vld [vmem:[%s3946_s1 + $0x8] sm:$0xf] (!%p188_p2)  ;;  %vm299_vm3 = vsmask.f32 (!%p188_p2), 7424 }
   0x8   : > { %2540 = vmatprep.mubr.msk.bf16.mxu0 (!%p188_p2), %vm2975_vm1, %v2974_v2  ;;  %2578 = vmatprep.mubr.msk.bf16.mxu1 (!%p188_p2), %vm2975_vm1, %v2974_v2  ;;  %v831_v8 = vsel (!%p188_p2), %vm404_vm0, %v813_v5, 0  ;;  %v688_v19 = vsel (!%p188_p2), %vm404_vm0, %v639_v15, 0  ;;  %vm640_vm4 = vcmask (!%p188_p2), 1046528   ;;  %vm1161_vm5 = vcmask (!%p188_p2), 1045504  }
   0x9   : > { %2614 = vmatprep.subr.bf16.mxu0 (!%p188_p2), %v2974_v2  ;;  %2652 = vmatprep.subr.bf16.mxu1 (!%p188_p2), %v2974_v2  ;;  %vm957_vm6 = vsmask.f32 (!%p188_p2), 6400  ;;  %vm1478_vm7 = vsmask.f32 (!%p188_p2), 5376  ;;  %vm1682_vm8 = vcmask (!%p188_p2), 1044480  }
   0xd   : > { %s3952_s19 = smov (!%p215_p3, %s2228_s19), 3 }
   0xe   : > { %s2932_s26 = smul.u32 100, %s3952_s19 }
   0xf   : > { %s2933_s14 = smul.u32 72, %s3952_s19 }
  0x10   : > { %s3039_s29 = scalar_lea.vmem %s3945_s0, %s2932_s26 }
  0x11   : > { %v2944_v6 = vld [vmem:[%s3039_s29] sm:$0xff]   ;;  %v3043_v7 = vld [vmem:[%s3039_s29 + $0x8] sm:$0xff]   ;;  %v3049_v12 = vld [vmem:[%s3039_s29 + $0x10] sm:$0xff]   ;;  %s3915_s17 = scalar_lea.vmem %s3950_s5, %s2933_s14 }
  0x12   : > { %v301_v9 = vshrl.u32 %v2944_v6, 16  ;;  %v303_v10 = vshll.u32 %v2944_v6, 16  ;;  %v308_v11 = vshll.u32 %v3043_v7, 16  ;;  %2579 = vmatmul.mubr.msk.bf16.vlgmr.msra.gmra.mrb[0].mxu1 %vm376_vm2, %v2944_v6  ;;  %v312_v17 = vshrl.u32 %v3043_v7, 16  ;;  %v3068_v23 = vld [vmem:[%s3039_s29 + $0x18] sm:$0xff]   ;;  %v3101_v35 = vld [vmem:[%s3039_s29 + $0x20] sm:$0xff]  }
  0x13   : > { %2582 = vmatprep.mubr.msk.bf16.mxu1 %vm2975_vm1, %v2974_v2  ;;  %2653 = vmatpush3.bf16.msra.mxu1 %v831_v8  ;;  %v3059_v18 = vshll.u32 %v3049_v12, 16  ;;  %v641_v24 = vrot.slane %v2944_v6, 1  ;;  %v3076_v25 = vshrl.u32 %v3049_v12, 16  ;;  %v3080_v27 = vshll.u32 %v3068_v23, 16  ;;  %v3084_v29 = vld [vmem:[%s3039_s29 + $0x48] sm:$0xf] }
  0x14   : > { %v305_v13 = vrot.slane %v303_v10, 1  ;;  %v310_v14 = vrot.slane %v308_v11, 1  ;;  %2728 = vmatprep.subr.bf16.mxu1 %v2974_v2  ;;  %v642_v28 = vrot.slane %v3043_v7, 1  ;;  %v3091_v31 = vrot.slane %v308_v11, 2  ;;  %v3104_v36 = vld [vmem:[%s3039_s29 + $0x40] sm:$0xff]   ;;  %v3134_v47 = vld [vmem:[%s3039_s29 + $0x28] sm:$0xff]  }
  0x15   : > { %v318_v22 = vrot.slane %v3059_v18, 1  ;;  %v3094_v32 = vrot.slane %v312_v17, 1  ;;  %v326_v34 = vrot.slane %v3080_v27, 1  ;;  %v2244_v37 = vcombine.low %v3084_v29, %v3084_v29  ;;  %v3153_v53 = vld [vmem:[%s3039_s29 + $0x30] sm:$0xff]   ;;  %v3172_v59 = vld [vmem:[%s3039_s29 + $0x38] sm:$0xff]  }
  0x16   : > { %v306_v16 = vor.u32 %v305_v13, %v301_v9  ;;  %v314_v21 = vor.u32 %v312_v17, %v310_v14  ;;  %v3089_v30 = vsel %vm640_vm4, %v641_v24, %v642_v28  ;;  %v3113_v38 = vrot.slane %v3104_v36, 1 }
  0x17   : > { %v322_v33 = vor.u32 %v3076_v25, %v318_v22  ;;  %v658_v39 = vrot.slane %v2244_v37, 1  ;;  %v3116_v40 = vshrl.u32 %v3068_v23, 16  ;;  %v3120_v42 = vshll.u32 %v3101_v35, 16 }
  0x18   : > { %v311_v20 = vsel %vm299_vm3, %v306_v16, %v310_v14  ;;  %v319_v26 = vsel %vm299_vm3, %v314_v21, %v318_v22  ;;  %v960_v44 = vor.u32 %v3091_v31, %v3094_v32  ;;  %v3142_v49 = vshrl.u32 %v3101_v35, 16  ;;  %v1160_v16 = vld [vmem:[%s3946_s1 + $0x14] sm:$0xf] }
  0x19   : > { %2541 = vmatmul.mubr.msk.bf16.vlgmr.msra.gmra.mrb[0].mxu0 %vm376_vm2, %v311_v20  ;;  %v327_v41 = vsel %vm299_vm3, %v322_v33, %v326_v34  ;;  %v3124_v43 = vsel %vm640_vm4, %v3113_v38, %v658_v39  ;;  %v330_v45 = vor.u32 %v3116_v40, %v326_v34  ;;  %v334_v46 = vrot.slane %v3120_v42, 1  ;;  %v956_v20 = vld [vmem:[%s3946_s1 + $0x10] sm:$0xf] }
  0x1a   : > { %2615 = vmatpush3.bf16.msra.mxu0 %v688_v19  ;;  %2544 = vmatprep.mubr.msk.bf16.mxu0 %vm2975_vm1, %v2974_v2  ;;  %v3145_v50 = vshll.u32 %v3134_v47, 16  ;;  %v3161_v55 = vshrl.u32 %v3134_v47, 16  ;;  %v3164_v56 = vshll.u32 %v3153_v53, 16  ;;  %v3180_v61 = vshrl.u32 %v3153_v53, 16 }
  0x1b   : > { %2583 = vmatmul.mubr.msk.bf16.gmra.mrb[4].mxu1 %vm376_vm2, %v3043_v7  ;;  %2690 = vmatprep.subr.bf16.mxu0 %v2974_v2  ;;  %v335_v48 = vsel %vm299_vm3, %v330_v45, %v334_v46  ;;  %v338_v51 = vor.u32 %v3142_v49, %v334_v46  ;;  %v3183_v62 = vshll.u32 %v3172_v59, 16  ;;  %v3196_v3 = vshrl.u32 %v3172_v59, 16  ;;  %v245_v45 = vld [vmem:[%s3039_s29 + $0x4c] sm:$0xf] }
  0x1c   : > { %2586 = vmatprep.mubr.msk.bf16.mxu1 %vm2975_vm1, %v2974_v2  ;;  %v342_v52 = vrot.slane %v3145_v50, 1  ;;  %v350_v58 = vrot.slane %v3164_v56, 1  ;;  %v3199_v4 = vshll.u32 %v3104_v36, 16  ;;  %v3212_v9 = vshrl.u32 %v3104_v36, 16 }
  0x1d   : > { %v358_v0 = vrot.slane %v3183_v62, 1  ;;  %v372_v10 = vshll.u32 %v2244_v37, 16  ;;  %v644_v14 = vrot.slane %v3049_v12, 1  ;;  %v1209_v19 = vsel %vm404_vm0, %v1160_v16, 0 }
  0x1e   : > { %v343_v54 = vsel %vm299_vm3, %v338_v51, %v342_v52  ;;  %v346_v57 = vor.u32 %v3161_v55, %v342_v52  ;;  %v354_v63 = vor.u32 %v3180_v61, %v350_v58  ;;  %v366_v6 = vrot.slane %v3199_v4, 1  ;;  %v3298_v52 = vld [vmem:[%s3039_s29 + $0x50] sm:$0xf] }
  0x1f   : > { %v362_v5 = vor.u32 %v3196_v3, %v358_v0  ;;  %v374_v13 = vrot.slane %v372_v10, 1  ;;  %v645_v17 = vsel %vm640_vm4, %v642_v28, %v644_v14  ;;  %v646_v21 = vrot.slane %v3068_v23, 1 }
  0x20   : > { %v351_v60 = vsel %vm299_vm3, %v346_v57, %v350_v58  ;;  %v359_v1 = vsel %vm299_vm3, %v354_v63, %v358_v0  ;;  %v370_v11 = vor.u32 %v3212_v9, %v366_v6  ;;  %v1035_v22 = vsel %vm404_vm0, %v956_v20, 0 }
  0x21   : > { %2545 = vmatmul.mubr.msk.bf16.gmra.mrb[4].mxu0 %vm376_vm2, %v319_v26  ;;  %v367_v8 = vsel %vm299_vm3, %v362_v5, %v366_v6  ;;  %v647_v24 = vsel %vm640_vm4, %v644_v14, %v646_v21  ;;  %v648_v26 = vrot.slane %v3101_v35, 1  ;;  %v652_v34 = vrot.slane %v3153_v53, 1 }
  0x22   : > { %2548 = vmatprep.mubr.msk.bf16.mxu0 %vm2975_vm1, %v2974_v2  ;;  %v375_v15 = vsel %vm299_vm3, %v370_v11, %v374_v13  ;;  %v654_v39 = vrot.slane %v3172_v59, 1  ;;  %v3286_v46 = vcombine.low %v3084_v29, %v245_v45  ;;  %v961_v63 = vrot.slane %v3076_v25, 1 }
  0x23   : > { %2587 = vmatmul.mubr.msk.bf16.gmra.mrb[8].mxu1 %vm376_vm2, %v3049_v12  ;;  %v649_v28 = vsel %vm640_vm4, %v646_v21, %v648_v26  ;;  %v962_v0 = vrot.slane %v3059_v18, 2  ;;  %v1165_v10 = vrot.slane %v3068_v23, 2  ;;  %v965_v11 = vrot.slane %v3116_v40, 1 }
  0x24   : > { %2590 = vmatprep.mubr.msk.bf16.mxu1 %vm2975_vm1, %v2974_v2  ;;  %v820_v51 = vrot.slane %v3286_v46, 1  ;;  %v966_v13 = vrot.slane %v3080_v27, 2  ;;  %v1167_v31 = vrot.slane %v3101_v35, 2  ;;  %v1169_v21 = vrot.slane %v3134_v47, 2 }
  0x26   : > { %v821_v29 = vsel %vm640_vm4, %v3113_v38, %v820_v51  ;;  %v967_v16 = vor.u32 %v966_v13, %v965_v11 }
  0x29   : > { %2549 = vmatmul.mubr.msk.bf16.gmra.mrb[8].mxu0 %vm376_vm2, %v327_v41  ;;  %v655_v41 = vsel %vm640_vm4, %v652_v34, %v654_v39 }
  0x2a   : > { %2552 = vmatprep.mubr.msk.bf16.mxu0 %vm2975_vm1, %v2974_v2 }
  0x2b   : > { %2591 = vmatmul.mubr.msk.bf16.gmra.mrb[12].mxu1 %vm376_vm2, %v3068_v23 }
  0x2c   : > { %2594 = vmatprep.mubr.msk.bf16.mxu1 %vm2975_vm1, %v2974_v2 }
  0x31   : > { %2553 = vmatmul.mubr.msk.bf16.gmra.mrb[12].mxu0 %vm376_vm2, %v335_v48  ;;  %v657_v48 = vsel %vm640_vm4, %v654_v39, %v3113_v38  ;;  %v1162_v38 = vrot.slane %v3043_v7, 2  ;;  %v963_v7 = vor.u32 %v962_v0, %v961_v63  ;;  %v978_v39 = vrot.slane %v3164_v56, 2 }
  0x32   : > { %2556 = vmatprep.mubr.msk.bf16.mxu0 %vm2975_vm1, %v2974_v2  ;;  %v985_v0 = vrot.slane %v3212_v9, 1 }
  0x33   : > { %2595 = vmatmul.mubr.msk.bf16.gmra.mrb[16].mxu1 %vm376_vm2, %v3101_v35  ;;  %v968_v32 = vsel %vm957_vm6, %v963_v7, %v967_v16 }
  0x34   : > { %2598 = vmatprep.mubr.msk.bf16.mxu1 %vm2975_vm1, %v2974_v2 }
  0x39   : > { %2557 = vmatmul.mubr.msk.bf16.gmra.mrb[16].mxu0 %vm376_vm2, %v343_v54  ;;  %v3304_v54 = vcombine.low %v3298_v52, %v3298_v52 }
  0x3a   : > { %2560 = vmatprep.mubr.msk.bf16.mxu0 %vm2975_vm1, %v2974_v2 }
  0x3b   : > { %2599 = vmatmul.mubr.msk.bf16.gmra.mrb[20].mxu1 %vm376_vm2, %v3134_v47  ;;  %v822_v57 = vrot.slane %v3304_v54, 1 }
  0x3c   : > { %2602 = vmatprep.mubr.msk.bf16.mxu1 %vm2975_vm1, %v2974_v2 }
  0x3d   : > { %v823_v58 = vsel %vm640_vm4, %v820_v51, %v822_v57  ;;  %v982_v57 = vrot.slane %v3183_v62, 2 }
  0x41   : > { %2561 = vmatmul.mubr.msk.bf16.gmra.mrb[20].mxu0 %vm376_vm2, %v351_v60  ;;  %v1163_v60 = vrot.slane %v3049_v12, 2 }
  0x42   : > { %2564 = vmatprep.mubr.msk.bf16.mxu0 %vm2975_vm1, %v2974_v2 }
  0x43   : > { %2603 = vmatmul.mubr.msk.bf16.gmra.mrb[24].mxu1 %vm376_vm2, %v3153_v53  ;;  %v1164_v5 = vsel %vm1161_vm5, %v1162_v38, %v1163_v60 }
  0x44   : > { %2606 = vmatprep.mubr.msk.bf16.mxu1 %vm2975_vm1, %v2974_v2 }
  0x49   : > { %2565 = vmatmul.mubr.msk.bf16.gmra.mrb[24].mxu0 %vm376_vm2, %v359_v1  ;;  %v1477_v1 = vld [vmem:[%s3946_s1 + $0x1c] sm:$0xf] }
  0x4a   : > { %2568 = vmatprep.mubr.msk.bf16.mxu0 %vm2975_vm1, %v2974_v2  ;;  %v1556_v6 = vsel %vm404_vm0, %v1477_v1, 0  ;;  %v986_v1 = vrot.slane %v3199_v4, 2 }
  0x4b   : > { %2607 = vmatmul.mubr.msk.bf16.gmra.mrb[28].mxu1 %vm376_vm2, %v3172_v59 }
  0x4c   : > { %2610 = vmatprep.mubr.msk.bf16.mxu1 %vm2975_vm1, %v2974_v2 }
  0x51   : > { %2569 = vmatmul.mubr.msk.bf16.gmra.mrb[28].mxu0 %vm376_vm2, %v367_v8  ;;  %v1334_v8 = vld [vmem:[%s3946_s1 + $0x18] sm:$0xf] }
  0x52   : > { %2572 = vmatprep.mubr.msk.bf16.mxu0 %vm2975_vm1, %v2974_v2  ;;  %v1352_v14 = vsel %vm404_vm0, %v1334_v8, 0  ;;  %v993_v8 = vshll.u32 %v3286_v46, 16 }
  0x53   : > { %2611 = vmatmul.mubr.msk.bf16.gmra.mrb[32].mxu1 %vm376_vm2, %v3104_v36 }
  0x54   : > { %2654 = vmatprep.mubr.msk.bf16.mxu1 %vm2975_vm1, %v2974_v2  ;;  %v995_v13 = vrot.slane %v993_v8, 2 }
  0x59   : > { %2573 = vmatmul.mubr.msk.bf16.gmra.mrb[32].mxu0 %vm376_vm2, %v375_v15  ;;  %v3349_v15 = vsel %vm1161_vm5, %v1163_v60, %v1165_v10  ;;  %v1175_v60 = vrot.slane %v3104_v36, 2 }
  0x5a   : > { %2616 = vmatprep.mubr.msk.bf16.mxu0 %vm2975_vm1, %v2974_v2 }
  0x5b   : > { %2655 = vmatmul.mubr.msk.bf16.vlgmr.msra.gmra.mrb[36].mxu1 %vm376_vm2, %v645_v17 }
  0x5c   : > { %2658 = vmatprep.mubr.msk.bf16.mxu1 %vm2975_vm1, %v2974_v2  ;;  %2729 = vmatpush3.bf16.msra.mxu1 %v1209_v19  ;;  %v3364_v19 = vsel %vm1161_vm5, %v1165_v10, %v1167_v31  ;;  %v3432_v10 = vrot.slane %v3286_v46, 2 }
  0x5d   : > { %2804 = vmatprep.subr.bf16.mxu1 %v2974_v2 }
  0x61   : > { %2617 = vmatmul.mubr.msk.bf16.vlgmr.msra.gmra.mrb[36].mxu0 %vm376_vm2, %v3089_v30  ;;  %v650_v30 = vrot.slane %v3134_v47, 1 }
  0x62   : > { %2691 = vmatpush3.bf16.msra.mxu0 %v1035_v22  ;;  %2620 = vmatprep.mubr.msk.bf16.mxu0 %vm2975_vm1, %v2974_v2 }
  0x63   : > { %2659 = vmatmul.mubr.msk.bf16.gmra.mrb[40].mxu1 %vm376_vm2, %v647_v24  ;;  %2766 = vmatprep.subr.bf16.mxu0 %v2974_v2  ;;  %v651_v33 = vsel %vm640_vm4, %v648_v26, %v650_v30  ;;  %v653_v37 = vsel %vm640_vm4, %v650_v30, %v652_v34  ;;  %v974_v26 = vrot.slane %v3145_v50, 2 }
  0x64   : > { %2662 = vmatprep.mubr.msk.bf16.mxu1 %vm2975_vm1, %v2974_v2 }
  0x69   : > { %2621 = vmatmul.mubr.msk.bf16.gmra.mrb[40].mxu0 %vm376_vm2, %v645_v17  ;;  %v970_v17 = vrot.slane %v3120_v42, 2 }
  0x6a   : > { %2624 = vmatprep.mubr.msk.bf16.mxu0 %vm2975_vm1, %v2974_v2 }
  0x6b   : > { %2663 = vmatmul.mubr.msk.bf16.gmra.mrb[44].mxu1 %vm376_vm2, %v649_v28 }
  0x6c   : > { %2666 = vmatprep.mubr.msk.bf16.mxu1 %vm2975_vm1, %v2974_v2 }
  0x71   : > { %2625 = vmatmul.mubr.msk.bf16.gmra.mrb[44].mxu0 %vm376_vm2, %v647_v24  ;;  %v973_v24 = vrot.slane %v3161_v55, 1 }
  0x72   : > { %2628 = vmatprep.mubr.msk.bf16.mxu0 %vm2975_vm1, %v2974_v2 }
  0x73   : > { %2667 = vmatmul.mubr.msk.bf16.gmra.mrb[48].mxu1 %vm376_vm2, %v651_v33  ;;  %v975_v30 = vor.u32 %v974_v26, %v973_v24  ;;  %v1479_v24 = vrot.slane %v3076_v25, 2  ;;  %v1480_v26 = vrot.slane %v3059_v18, 3 }
  0x74   : > { %2670 = vmatprep.mubr.msk.bf16.mxu1 %vm2975_vm1, %v2974_v2 }
  0x79   : > { %2629 = vmatmul.mubr.msk.bf16.gmra.mrb[48].mxu0 %vm376_vm2, %v649_v28  ;;  %v3378_v28 = vsel %vm1161_vm5, %v1167_v31, %v1169_v21  ;;  %v999_v31 = vshrl.u32 %v3304_v54, 16 }
  0x7a   : > { %2632 = vmatprep.mubr.msk.bf16.mxu0 %vm2975_vm1, %v2974_v2 }
  0x7b   : > { %2671 = vmatmul.mubr.msk.bf16.gmra.mrb[52].mxu1 %vm376_vm2, %v653_v37 }
  0x7c   : > { %2674 = vmatprep.mubr.msk.bf16.mxu1 %vm2975_vm1, %v2974_v2 }
  0x81   : > { %2633 = vmatmul.mubr.msk.bf16.gmra.mrb[52].mxu0 %vm376_vm2, %v651_v33  ;;  %v1171_v33 = vrot.slane %v3153_v53, 2 }
  0x82   : > { %2636 = vmatprep.mubr.msk.bf16.mxu0 %vm2975_vm1, %v2974_v2 }
  0x83   : > { %2675 = vmatmul.mubr.msk.bf16.gmra.mrb[56].mxu1 %vm376_vm2, %v655_v41 }
  0x84   : > { %2678 = vmatprep.mubr.msk.bf16.mxu1 %vm2975_vm1, %v2974_v2 }
  0x89   : > { %2637 = vmatmul.mubr.msk.bf16.gmra.mrb[56].mxu0 %vm376_vm2, %v653_v37  ;;  %v977_v37 = vrot.slane %v3180_v61, 1 }
  0x8a   : > { %2640 = vmatprep.mubr.msk.bf16.mxu0 %vm2975_vm1, %v2974_v2 }
  0x8b   : > { %2679 = vmatmul.mubr.msk.bf16.gmra.mrb[60].mxu1 %vm376_vm2, %v657_v48  ;;  %v979_v45 = vor.u32 %v978_v39, %v977_v37 }
  0x8c   : > { %2682 = vmatprep.mubr.msk.bf16.mxu1 %vm2975_vm1, %v2974_v2 }
  0x8d   : > { %v980_v51 = vsel %vm957_vm6, %v975_v30, %v979_v45 }
  0x91   : > { %2641 = vmatmul.mubr.msk.bf16.gmra.mrb[60].mxu0 %vm376_vm2, %v655_v41  ;;  %v3392_v41 = vsel %vm1161_vm5, %v1169_v21, %v1171_v33 }
  0x92   : > { %2644 = vmatprep.mubr.msk.bf16.mxu0 %vm2975_vm1, %v2974_v2 }
  0x93   : > { %2683 = vmatmul.mubr.msk.bf16.gmra.mrb[64].mxu1 %vm376_vm2, %v821_v29  ;;  %v981_v29 = vrot.slane %v3196_v3, 1 }
  0x94   : > { %2686 = vmatprep.mubr.msk.bf16.mxu1 %vm2975_vm1, %v2974_v2 }
  0x95   : > { %v983_v38 = vor.u32 %v982_v57, %v981_v29  ;;  %v1681_v57 = vld [vmem:[%s3946_s1 + $0x20] sm:$0xf] }
  0x97   : > { %v984_v63 = vsel %vm957_vm6, %v979_v45, %v983_v38 }
  0x99   : > { %2645 = vmatmul.mubr.msk.bf16.gmra.mrb[64].mxu0 %vm376_vm2, %v657_v48  ;;  %v1173_v48 = vrot.slane %v3172_v59, 2 }
  0x9a   : > { %2648 = vmatprep.mubr.msk.bf16.mxu0 %vm2975_vm1, %v2974_v2 }
  0x9b   : > { %2687 = vmatmul.mubr.msk.bf16.gmra.mrb[68].mxu1 %vm376_vm2, %v823_v58  ;;  %v3406_v58 = vsel %vm1161_vm5, %v1171_v33, %v1173_v48  ;;  %v1483_v33 = vrot.slane %v3080_v27, 3 }
  0x9c   : > { %2730 = vmatprep.mubr.msk.bf16.mxu1 %vm2975_vm1, %v2974_v2 }
  0xa1   : > { %2649 = vmatmul.mubr.msk.bf16.gmra.mrb[68].mxu0 %vm376_vm2, %v3124_v43  ;;  %v964_v43 = vsel %vm957_vm6, %v960_v44, %v963_v7  ;;  %v969_v44 = vrot.slane %v3142_v49, 1  ;;  %v990_v7 = vshrl.u32 %v3286_v46, 16 }
  0xa2   : > { %2692 = vmatprep.mubr.msk.bf16.mxu0 %vm2975_vm1, %v2974_v2 }
  0xa3   : > { %2731 = vmatmul.mubr.msk.bf16.vlgmr.msra.gmra.mrb[72].mxu1 %vm376_vm2, %v1164_v5  ;;  %v971_v20 = vor.u32 %v970_v17, %v969_v44  ;;  %v3420_v5 = vsel %vm1161_vm5, %v1173_v48, %v1175_v60  ;;  %v992_v11 = vrot.slane %v990_v7, 1  ;;  %v1179_v44 = vrot.slane %v3304_v54, 2 }
  0xa4   : > { %2734 = vmatprep.mubr.msk.bf16.mxu1 %vm2975_vm1, %v2974_v2  ;;  %2805 = vmatpush3.bf16.msra.mxu1 %v1556_v6  ;;  %v987_v6 = vor.u32 %v986_v1, %v985_v0  ;;  %v1486_v48 = vrot.slane %v3142_v49, 2 }
  0xa5   : > { %2880 = vmatprep.subr.bf16.mxu1 %v2974_v2  ;;  %v972_v22 = vsel %vm957_vm6, %v967_v16, %v971_v20  ;;  %v976_v34 = vsel %vm957_vm6, %v971_v20, %v975_v30  ;;  %v996_v16 = vor.u32 %v995_v13, %v992_v11  ;;  %v1001_v20 = vrot.slane %v999_v31, 1 }
  0xa6   : > { %v1482_v30 = vrot.slane %v3116_v40, 2  ;;  %v1491_v31 = vrot.slane %v3145_v50, 3 }
  0xa7   : > { %v997_v17 = vsel %vm957_vm6, %v987_v6, %v996_v16 }
  0xa8   : > { %v1484_v37 = vor.u32 %v1483_v33, %v1482_v30  ;;  %v1494_v33 = vrot.slane %v3180_v61, 2 }
  0xa9   : > { %2693 = vmatmul.mubr.msk.bf16.vlgmr.msra.gmra.mrb[72].mxu0 %vm376_vm2, %v964_v43  ;;  %v988_v43 = vsel %vm957_vm6, %v983_v38, %v987_v6  ;;  %v1730_v6 = vsel %vm404_vm0, %v1681_v57, 0 }
  0xaa   : > { %2767 = vmatpush3.bf16.msra.mxu0 %v1352_v14  ;;  %2696 = vmatprep.mubr.msk.bf16.mxu0 %vm2975_vm1, %v2974_v2  ;;  %v3441_v14 = vsel %vm1161_vm5, %v1175_v60, %v3432_v10 }
  0xab   : > { %2735 = vmatmul.mubr.msk.bf16.gmra.mrb[76].mxu1 %vm376_vm2, %v3349_v15  ;;  %2842 = vmatprep.subr.bf16.mxu0 %v2974_v2 }
  0xac   : > { %2738 = vmatprep.mubr.msk.bf16.mxu1 %vm2975_vm1, %v2974_v2 }
  0xb1   : > { %2697 = vmatmul.mubr.msk.bf16.gmra.mrb[76].mxu0 %vm376_vm2, %v968_v32  ;;  %v1002_v32 = vshll.u32 %v3304_v54, 16 }
  0xb2   : > { %2700 = vmatprep.mubr.msk.bf16.mxu0 %vm2975_vm1, %v2974_v2 }
  0xb3   : > { %2739 = vmatmul.mubr.msk.bf16.gmra.mrb[80].mxu1 %vm376_vm2, %v3364_v19  ;;  %v1004_v21 = vrot.slane %v1002_v32, 2 }
  0xb4   : > { %2742 = vmatprep.mubr.msk.bf16.mxu1 %vm2975_vm1, %v2974_v2 }
  0xb5   : > { %v1005_v54 = vor.u32 %v1004_v21, %v1001_v20 }
  0xb7   : > { %v1006_v18 = vsel %vm957_vm6, %v996_v16, %v1005_v54  ;;  %v1490_v16 = vrot.slane %v3161_v55, 2  ;;  %v1495_v54 = vrot.slane %v3164_v56, 3 }
  0xb9   : > { %2701 = vmatmul.mubr.msk.bf16.gmra.mrb[80].mxu0 %vm376_vm2, %v972_v22  ;;  %v1180_v22 = vsel %vm1161_vm5, %v3432_v10, %v1179_v44 }
  0xba   : > { %2704 = vmatprep.mubr.msk.bf16.mxu0 %vm2975_vm1, %v2974_v2 }
  0xbb   : > { %2743 = vmatmul.mubr.msk.bf16.gmra.mrb[84].mxu1 %vm376_vm2, %v3378_v28 }
  0xbc   : > { %2746 = vmatprep.mubr.msk.bf16.mxu1 %vm2975_vm1, %v2974_v2 }
  0xc1   : > { %2705 = vmatmul.mubr.msk.bf16.gmra.mrb[84].mxu0 %vm376_vm2, %v976_v34  ;;  %v1481_v34 = vor.u32 %v1480_v26, %v1479_v24 }
  0xc2   : > { %2708 = vmatprep.mubr.msk.bf16.mxu0 %vm2975_vm1, %v2974_v2 }
  0xc3   : > { %2747 = vmatmul.mubr.msk.bf16.gmra.mrb[88].mxu1 %vm376_vm2, %v3392_v41  ;;  %v1485_v45 = vsel %vm1478_vm7, %v1481_v34, %v1484_v37 }
  0xc4   : > { %2750 = vmatprep.mubr.msk.bf16.mxu1 %vm2975_vm1, %v2974_v2 }
  0xc9   : > { %2709 = vmatmul.mubr.msk.bf16.gmra.mrb[88].mxu0 %vm376_vm2, %v980_v51  ;;  %v1487_v51 = vrot.slane %v3120_v42, 3 }
  0xca   : > { %2712 = vmatprep.mubr.msk.bf16.mxu0 %vm2975_vm1, %v2974_v2 }
  0xcb   : > { %2751 = vmatmul.mubr.msk.bf16.gmra.mrb[92].mxu1 %vm376_vm2, %v3406_v58  ;;  %v1488_v38 = vor.u32 %v1487_v51, %v1486_v48  ;;  %v1498_v51 = vrot.slane %v3196_v3, 2 }
  0xcc   : > { %2754 = vmatprep.mubr.msk.bf16.mxu1 %vm2975_vm1, %v2974_v2 }
  0xcd   : > { %v1489_v13 = vsel %vm1478_vm7, %v1484_v37, %v1488_v38 }
  0xd1   : > { %2713 = vmatmul.mubr.msk.bf16.gmra.mrb[92].mxu0 %vm376_vm2, %v984_v63 }
  0xd2   : > { %2716 = vmatprep.mubr.msk.bf16.mxu0 %vm2975_vm1, %v2974_v2 }
  0xd3   : > { %2755 = vmatmul.mubr.msk.bf16.gmra.mrb[96].mxu1 %vm376_vm2, %v3420_v5 }
  0xd4   : > { %2758 = vmatprep.mubr.msk.bf16.mxu1 %vm2975_vm1, %v2974_v2 }
  0xd9   : > { %2717 = vmatmul.mubr.msk.bf16.gmra.mrb[96].mxu0 %vm376_vm2, %v988_v43 }
  0xda   : > { %2720 = vmatprep.mubr.msk.bf16.mxu0 %vm2975_vm1, %v2974_v2 }
  0xdb   : > { %2759 = vmatmul.mubr.msk.bf16.gmra.mrb[100].mxu1 %vm376_vm2, %v3441_v14 }
  0xdc   : > { %2762 = vmatprep.mubr.msk.bf16.mxu1 %vm2975_vm1, %v2974_v2 }
  0xe1   : > { %2721 = vmatmul.mubr.msk.bf16.gmra.mrb[100].mxu0 %vm376_vm2, %v997_v17  ;;  %v1492_v17 = vor.u32 %v1491_v31, %v1490_v16  ;;  %v1503_v16 = vrot.slane %v3199_v4, 3 }
  0xe2   : > { %2724 = vmatprep.mubr.msk.bf16.mxu0 %vm2975_vm1, %v2974_v2 }
  0xe3   : > { %2763 = vmatmul.mubr.msk.bf16.gmra.mrb[104].mxu1 %vm376_vm2, %v1180_v22  ;;  %v1493_v30 = vsel %vm1478_vm7, %v1488_v38, %v1492_v17 }
  0xe4   : > { %2806 = vmatprep.mubr.msk.bf16.mxu1 %vm2975_vm1, %v2974_v2 }
  0xe5   : > { %v568_v25 = vpop.f32.mrb[0].mxu1 }
  0xe6   : > { %v2580_v40 = vpop.f32.mrb[1].mxu1 }
  0xe7   : > { %v571_v39 = vpop.f32.mrb[2].mxu1 }
  0xe8   : > { %v2581_v27 = vpop.f32.mrb[3].mxu1 }
  0xe9   : > { %2725 = vmatmul.mubr.msk.bf16.gmra.mrb[104].mxu0 %vm376_vm2, %v1006_v18 }
  0xea   : > { %2768 = vmatprep.mubr.msk.bf16.mxu0 %vm2975_vm1, %v2974_v2 }
  0xeb   : > { %2807 = vmatmul.mubr.msk.bf16.vlgmr.msra.gmra.mrb[108].mxu1 %vm376_vm2, %v1485_v45 }
  0xec   : > { %v442_v29 = vpop.f32.mrb[0].mxu0  ;;  %2810 = vmatprep.mubr.msk.bf16.mxu1 %vm2975_vm1, %v2974_v2 }
  0xed   : > { %v3479_v60 = vadd.f32 %v568_v25, %v442_v29  ;;  %v2542_v49 = vpop.f32.mrb[1].mxu0  ;;  %v1496_v25 = vor.u32 %v1495_v54, %v1494_v33  ;;  %v1499_v29 = vrot.slane %v3183_v62, 3  ;;  %v1507_v33 = vrot.slane %v993_v8, 3 }
  0xee   : > { %v445_v42 = vpop.f32.mrb[2].mxu0  ;;  %v576_v63 = vpop.f32.mrb[4].mxu1 }
  0xef   : > { %v3481_v0 = vadd.f32 %v571_v39, %v445_v42  ;;  %v2543_v1 = vpop.f32.mrb[3].mxu0  ;;  %v2584_v43 = vpop.f32.mrb[5].mxu1  ;;  %v1497_v48 = vsel %vm1478_vm7, %v1492_v17, %v1496_v25  ;;  %v1500_v49 = vor.u32 %v1499_v29, %v1498_v51 }
  0xf0   : > { %v579_v11 = vpop.f32.mrb[6].mxu1 }
  0xf1   : > { %2769 = vmatmul.mubr.msk.bf16.vlgmr.msra.gmra.mrb[108].mxu0 %vm376_vm2, %v3349_v15  ;;  %v2585_v32 = vpop.f32.mrb[7].mxu1 }
  0xf2   : > { %2843 = vmatpush3.bf16.msra.mxu0 %v1730_v6  ;;  %2772 = vmatprep.mubr.msk.bf16.mxu0 %vm2975_vm1, %v2974_v2 }
  0xf3   : > { %2811 = vmatmul.mubr.msk.bf16.gmra.mrb[112].mxu1 %vm376_vm2, %v1489_v13  ;;  %v1502_v13 = vrot.slane %v3212_v9, 2  ;;  %v247_v9 = vld [vmem:[%s3039_s29 + $0x54] sm:$0xf] }
  0xf4   : > { %v450_v44 = vpop.f32.mrb[4].mxu0  ;;  %2814 = vmatprep.mubr.msk.bf16.mxu1 %vm2975_vm1, %v2974_v2  ;;  %v3547_v54 = vcombine.low %v3298_v52, %v247_v9 }
  0xf5   : > { %v3494_v20 = vadd.f32 %v576_v63, %v450_v44  ;;  %v2546_v55 = vpop.f32.mrb[5].mxu0  ;;  %v1504_v44 = vor.u32 %v1503_v16, %v1502_v13 }
  0xf6   : > { %v453_v21 = vpop.f32.mrb[6].mxu0  ;;  %v584_v50 = vpop.f32.mrb[8].mxu1  ;;  %v1511_v8 = vshrl.u32 %v3547_v54, 16  ;;  %v1514_v52 = vshll.u32 %v3547_v54, 16 }
  0xf7   : > { %v3496_v22 = vadd.f32 %v579_v11, %v453_v21  ;;  %v2547_v15 = vpop.f32.mrb[7].mxu0  ;;  %v2588_v24 = vpop.f32.mrb[9].mxu1  ;;  %v1501_v11 = vsel %vm1478_vm7, %v1496_v25, %v1500_v49 }
  0xf8   : > { %v587_v26 = vpop.f32.mrb[10].mxu1  ;;  %v1513_v51 = vrot.slane %v1511_v8, 2  ;;  %v1516_v29 = vrot.slane %v1514_v52, 3 }
  0xf9   : > { %2773 = vmatmul.mubr.msk.bf16.gmra.mrb[112].mxu0 %vm376_vm2, %v3364_v19  ;;  %v2589_v34 = vpop.f32.mrb[11].mxu1 }
  0xfa   : > { %2776 = vmatprep.mubr.msk.bf16.mxu0 %vm2975_vm1, %v2974_v2 }
  0xfb   : > { %2815 = vmatmul.mubr.msk.bf16.gmra.mrb[116].mxu1 %vm376_vm2, %v1493_v30  ;;  %v1506_v30 = vrot.slane %v990_v7, 2 }
  0xfc   : > { %v458_v37 = vpop.f32.mrb[8].mxu0  ;;  %2818 = vmatprep.mubr.msk.bf16.mxu1 %vm2975_vm1, %v2974_v2 }
  0xfd   : > { %v3508_v18 = vadd.f32 %v584_v50, %v458_v37  ;;  %v2550_v40 = vpop.f32.mrb[9].mxu0  ;;  %v1508_v7 = vor.u32 %v1507_v33, %v1506_v30 }
  0xfe   : > { %v461_v61 = vpop.f32.mrb[10].mxu0  ;;  %v592_v39 = vpop.f32.mrb[12].mxu1 }
  0xff   : > { %v3510_v56 = vadd.f32 %v587_v26, %v461_v61  ;;  %v2551_v27 = vpop.f32.mrb[11].mxu0  ;;  %v2592_v19 = vpop.f32.mrb[13].mxu1  ;;  %v1505_v26 = vsel %vm1478_vm7, %v1500_v49, %v1504_v44 }
 0x100   : > { %v595_v45 = vpop.f32.mrb[14].mxu1 }
 0x101   : > { %2777 = vmatmul.mubr.msk.bf16.gmra.mrb[116].mxu0 %vm376_vm2, %v3378_v28  ;;  %v2593_v57 = vpop.f32.mrb[15].mxu1 }
 0x102   : > { %2780 = vmatprep.mubr.msk.bf16.mxu0 %vm2975_vm1, %v2974_v2  ;;  %v3564_v57 = vld [vmem:[%s3039_s29 + $0x58] ss:$0 sps:$4 sm:$0xff]  }
 0x103   : > { %2819 = vmatmul.mubr.msk.bf16.gmra.mrb[120].mxu1 %vm376_vm2, %v1497_v48  ;;  %v1509_v48 = vsel %vm1478_vm7, %v1504_v44, %v1508_v7 }
 0x104   : > { %v466_v38 = vpop.f32.mrb[12].mxu0  ;;  %2822 = vmatprep.mubr.msk.bf16.mxu1 %vm2975_vm1, %v2974_v2 }
 0x105   : > { %v3522_v42 = vadd.f32 %v592_v39, %v466_v38  ;;  %v2554_v63 = vpop.f32.mrb[13].mxu0 }
 0x106   : > { %v469_v3 = vpop.f32.mrb[14].mxu0  ;;  %v600_v1 = vpop.f32.mrb[16].mxu1  ;;  %v1517_v63 = vor.u32 %v1516_v29, %v1513_v51 }
 0x107   : > { %v3524_v62 = vadd.f32 %v595_v45, %v469_v3  ;;  %v2555_v28 = vpop.f32.mrb[15].mxu0  ;;  %v2596_v6 = vpop.f32.mrb[17].mxu1  ;;  %v1520_v3 = vshrl.u32 %v3564_v57, 16 }
 0x108   : > { %v603_v43 = vpop.f32.mrb[18].mxu1 }
 0x109   : > { %2781 = vmatmul.mubr.msk.bf16.gmra.mrb[120].mxu0 %vm376_vm2, %v3392_v41  ;;  %v2597_v31 = vpop.f32.mrb[19].mxu1  ;;  %v1522_v44 = vrot.slane %v1520_v3, 2  ;;  %v1684_v3 = vrot.slane %v3068_v23, 3  ;;  %v1686_v23 = vrot.slane %v3101_v35, 3 }
 0x10a   : > { %2784 = vmatprep.mubr.msk.bf16.mxu0 %vm2975_vm1, %v2974_v2 }
 0x10b   : > { %2823 = vmatmul.mubr.msk.bf16.gmra.mrb[124].mxu1 %vm376_vm2, %v1501_v11 }
 0x10c   : > { %v474_v32 = vpop.f32.mrb[16].mxu0  ;;  %2826 = vmatprep.mubr.msk.bf16.mxu1 %vm2975_vm1, %v2974_v2 }
 0x10d   : > { %v3536_v17 = vadd.f32 %v600_v1, %v474_v32  ;;  %v2558_v55 = vpop.f32.mrb[17].mxu0  ;;  %v1523_v1 = vshll.u32 %v3564_v57, 16  ;;  %v1518_v32 = vsel %vm1478_vm7, %v1508_v7, %v1517_v63 }
 0x10e   : > { %v477_v21 = vpop.f32.mrb[18].mxu0  ;;  %v608_v4 = vpop.f32.mrb[20].mxu1 }
 0x10f   : > { %v3539_v50 = vadd.f32 %v603_v43, %v477_v21  ;;  %v2559_v41 = vpop.f32.mrb[19].mxu0  ;;  %v2600_v15 = vpop.f32.mrb[21].mxu1  ;;  %v1525_v55 = vrot.slane %v1523_v1, 3  ;;  %v1341_v21 = vrot.slane %v3547_v54, 2 }
 0x110   : > { %v611_v24 = vpop.f32.mrb[22].mxu1 }
 0x111   : > { %2785 = vmatmul.mubr.msk.bf16.gmra.mrb[124].mxu0 %vm376_vm2, %v3406_v58  ;;  %v2601_v34 = vpop.f32.mrb[23].mxu1  ;;  %v1526_v41 = vor.u32 %v1525_v55, %v1522_v44 }
 0x112   : > { %2788 = vmatprep.mubr.msk.bf16.mxu0 %vm2975_vm1, %v2974_v2 }
 0x113   : > { %2827 = vmatmul.mubr.msk.bf16.gmra.mrb[128].mxu1 %vm376_vm2, %v1505_v26  ;;  %v1527_v8 = vsel %vm1478_vm7, %v1517_v63, %v1526_v41  ;;  %v1683_v63 = vrot.slane %v3049_v12, 3 }
 0x114   : > { %v482_v37 = vpop.f32.mrb[20].mxu0  ;;  %2830 = vmatprep.mubr.msk.bf16.mxu1 %vm2975_vm1, %v2974_v2 }
 0x115   : > { %v3558_v25 = vadd.f32 %v608_v4, %v482_v37  ;;  %v2562_v40 = vpop.f32.mrb[21].mxu0 }
 0x116   : > { %v485_v58 = vpop.f32.mrb[22].mxu0  ;;  %v616_v61 = vpop.f32.mrb[24].mxu1  ;;  %v1343_v40 = vrot.slane %v3564_v57, 2 }
 0x117   : > { %v3560_v39 = vadd.f32 %v611_v24, %v485_v58  ;;  %v2563_v27 = vpop.f32.mrb[23].mxu0  ;;  %v2604_v19 = vpop.f32.mrb[25].mxu1 }
 0x118   : > { %v619_v45 = vpop.f32.mrb[26].mxu1  ;;  %v1344_v19 = vsel %vm1161_vm5, %v1341_v21, %v1343_v40 }
 0x119   : > { %2789 = vmatmul.mubr.msk.bf16.gmra.mrb[128].mxu0 %vm376_vm2, %v3420_v5  ;;  %v2605_v38 = vpop.f32.mrb[27].mxu1 }
 0x11a   : > { %2792 = vmatprep.mubr.msk.bf16.mxu0 %vm2975_vm1, %v2974_v2 }
 0x11b   : > { %2831 = vmatmul.mubr.msk.bf16.gmra.mrb[132].mxu1 %vm376_vm2, %v1509_v48 }
 0x11c   : > { %v490_v49 = vpop.f32.mrb[24].mxu0  ;;  %2834 = vmatprep.mubr.msk.bf16.mxu1 %vm2975_vm1, %v2974_v2 }
 0x11d   : > { %v3575_v28 = vadd.f32 %v616_v61, %v490_v49  ;;  %v2566_v6 = vpop.f32.mrb[25].mxu0 }
 0x11e   : > { %v493_v43 = vpop.f32.mrb[26].mxu0  ;;  %v624_v5 = vpop.f32.mrb[28].mxu1 }
 0x11f   : > { %v3577_v11 = vadd.f32 %v619_v45, %v493_v43  ;;  %v2567_v13 = vpop.f32.mrb[27].mxu0  ;;  %v2608_v16 = vpop.f32.mrb[29].mxu1 }
 0x120   : > { %v627_v31 = vpop.f32.mrb[30].mxu1  ;;  %v1685_v13 = vsel %vm1682_vm8, %v1683_v63, %v1684_v3 }
 0x121   : > { %2793 = vmatmul.mubr.msk.bf16.gmra.mrb[132].mxu0 %vm376_vm2, %v3441_v14  ;;  %v2609_v9 = vpop.f32.mrb[31].mxu1  ;;  %v1342_v14 = vsel %vm1161_vm5, %v3432_v10, %v1341_v21 }
 0x122   : > { %2796 = vmatprep.mubr.msk.bf16.mxu0 %vm2975_vm1, %v2974_v2 }
 0x123   : > { %2835 = vmatmul.mubr.msk.bf16.gmra.mrb[136].mxu1 %vm376_vm2, %v1518_v32 }
 0x124   : > { %v498_v4 = vpop.f32.mrb[28].mxu0  ;;  %2838 = vmatprep.mubr.msk.bf16.mxu1 %vm2975_vm1, %v2974_v2 }
 0x125   : > { %v3588_v15 = vadd.f32 %v624_v5, %v498_v4  ;;  %v2570_v24 = vpop.f32.mrb[29].mxu0 }
 0x126   : > { %v501_v26 = vpop.f32.mrb[30].mxu0  ;;  %v632_v30 = vpop.f32.mrb[32].mxu1  ;;  %v1687_v24 = vsel %vm1682_vm8, %v1684_v3, %v1686_v23 }
 0x127   : > { %v3592_v33 = vadd.f32 %v627_v31, %v501_v26  ;;  %v2571_v34 = vpop.f32.mrb[31].mxu0  ;;  %v2612_v37 = vpop.f32.mrb[33].mxu1 }
 0x128   : > { %v635_v7 = vpop.f32.mrb[34].mxu1 }
 0x129   : > { %2797 = vmatmul.mubr.msk.bf16.gmra.mrb[136].mxu0 %vm376_vm2, %v1342_v14  ;;  %v2613_v52 = vpop.f32.mrb[35].mxu1 }
 0x12a   : > { %2800 = vmatprep.mubr.msk.bf16.mxu0 %vm2975_vm1, %v2974_v2 }
 0x12b   : > { %2839 = vmatmul.mubr.msk.bf16.gmra.mrb[140].mxu1 %vm376_vm2, %v1527_v8 }
 0x12c   : > { %v506_v58 = vpop.f32.mrb[32].mxu0  ;;  %2896 = vmatprep.mubr.msk.bf16.mxu1 %vm2975_vm1, %v2974_v2 }
 0x12d   : > { %v3602_v10 = vadd.f32 %v632_v30, %v506_v58  ;;  %v2574_v61 = vpop.f32.mrb[33].mxu0 }
 0x12e   : > { %v509_v27 = vpop.f32.mrb[34].mxu0  ;;  %v867_v45 = vpop.f32.mrb[36].mxu1 }
 0x12f   : > { %v3605_v48 = vadd.f32 %v635_v7, %v509_v27  ;;  %v2575_v51 = vpop.f32.mrb[35].mxu0  ;;  %v2656_v29 = vpop.f32.mrb[37].mxu1 }
 0x130   : > { %v870_v38 = vpop.f32.mrb[38].mxu1 }
 0x131   : > { %2801 = vmatmul.mubr.msk.bf16.gmra.mrb[140].mxu0 %vm376_vm2, %v1344_v19  ;;  %v2657_v49 = vpop.f32.mrb[39].mxu1 }
 0x132   : > { %2844 = vmatprep.mubr.msk.bf16.mxu0 %vm2975_vm1, %v2974_v2 }
 0x134   : > { %v724_v1 = vpop.f32.mrb[36].mxu0 }
 0x135   : > { %v795_v6 = vadd.f32 %v724_v1, %v3479_v60  ;;  %v2618_v43 = vpop.f32.mrb[37].mxu0 }
 0x136   : > { %v727_v5 = vpop.f32.mrb[38].mxu0  ;;  %v875_v16 = vpop.f32.mrb[40].mxu1 }
 0x137   : > { %v796_v31 = vadd.f32 %v727_v5, %v3481_v0  ;;  %v3615_v32 = vadd.f32 %v867_v45, %v795_v6  ;;  %v2619_v44 = vpop.f32.mrb[39].mxu0  ;;  %v2660_v55 = vpop.f32.mrb[41].mxu1 }
 0x138   : > { %v878_v9 = vpop.f32.mrb[42].mxu1  ;;  %v2958_v44 = vld [vmem:[%s3948_s3] sm:$0xff]  }
 0x139   : > { %v3617_v21 = vadd.f32 %v870_v38, %v796_v31  ;;  %2845 = vmatmul.mubr.msk.bf16.vlgmr.msra.gmra.mrb[144].mxu0 %vm376_vm2, %v1685_v13  ;;  %v2661_v12 = vpop.f32.mrb[43].mxu1  ;;  %2881 = vmatpush3.bf16.msra.mxu1 %v2958_v44  ;;  %v1698_v44 = vrot.slane %v3547_v54, 3 }
 0x13a   : > { %2848 = vmatprep.mubr.msk.bf16.mxu0 %vm2975_vm1, %v2974_v2  ;;  %2882 = vmatprep.subr.bf16.mxu1 %v2974_v2 }
 0x13c   : > { %v732_v60 = vpop.f32.mrb[40].mxu0 }
 0x13d   : > { %v797_v4 = vadd.f32 %v732_v60, %v3494_v20  ;;  %v2622_v41 = vpop.f32.mrb[41].mxu0  ;;  %v1688_v20 = vrot.slane %v3134_v47, 3 }
 0x13e   : > { %v735_v0 = vpop.f32.mrb[42].mxu0  ;;  %v883_v26 = vpop.f32.mrb[44].mxu1 }
 0x13f   : > { %v798_v14 = vadd.f32 %v735_v0, %v3496_v22  ;;  %v3626_v30 = vadd.f32 %v875_v16, %v797_v4  ;;  %v2623_v34 = vpop.f32.mrb[43].mxu0  ;;  %v2664_v37 = vpop.f32.mrb[45].mxu1  ;;  %v1689_v61 = vsel %vm1682_vm8, %v1686_v23, %v1688_v20 }
 0x140   : > { %v886_v7 = vpop.f32.mrb[46].mxu1 }
 0x141   : > { %v3628_v8 = vadd.f32 %v878_v9, %v798_v14  ;;  %2849 = vmatmul.mubr.msk.bf16.gmra.mrb[148].mxu0 %vm376_vm2, %v1687_v24  ;;  %v2665_v35 = vpop.f32.mrb[47].mxu1 }
 0x142   : > { %2852 = vmatprep.mubr.msk.bf16.mxu0 %vm2975_vm1, %v2974_v2 }
 0x144   : > { %v740_v52 = vpop.f32.mrb[44].mxu0 }
 0x145   : > { %v799_v40 = vadd.f32 %v740_v52, %v3508_v18  ;;  %v2626_v58 = vpop.f32.mrb[45].mxu0  ;;  %v1690_v18 = vrot.slane %v3153_v53, 3 }
 0x146   : > { %v743_v22 = vpop.f32.mrb[46].mxu0  ;;  %v891_v27 = vpop.f32.mrb[48].mxu1 }
 0x147   : > { %v800_v19 = vadd.f32 %v743_v22, %v3510_v56  ;;  %v3637_v45 = vadd.f32 %v883_v26, %v799_v40  ;;  %v2627_v51 = vpop.f32.mrb[47].mxu0  ;;  %v2668_v29 = vpop.f32.mrb[49].mxu1  ;;  %v1691_v6 = vsel %vm1682_vm8, %v1688_v20, %v1690_v18 }
 0x148   : > { %v894_v38 = vpop.f32.mrb[50].mxu1 }
 0x149   : > { %v3639_v49 = vadd.f32 %v886_v7, %v800_v19  ;;  %2853 = vmatmul.mubr.msk.bf16.gmra.mrb[152].mxu0 %vm376_vm2, %v1689_v61  ;;  %v2669_v47 = vpop.f32.mrb[51].mxu1  ;;  %v1694_v7 = vrot.slane %v3104_v36, 3 }
 0x14a   : > { %2856 = vmatprep.mubr.msk.bf16.mxu0 %vm2975_vm1, %v2974_v2 }
 0x14c   : > { %v748_v63 = vpop.f32.mrb[48].mxu0 }
 0x14d   : > { %v801_v3 = vadd.f32 %v748_v63, %v3522_v42  ;;  %v2630_v1 = vpop.f32.mrb[49].mxu0 }
 0x14e   : > { %v751_v56 = vpop.f32.mrb[50].mxu0  ;;  %v899_v43 = vpop.f32.mrb[52].mxu1 }
 0x14f   : > { %v802_v5 = vadd.f32 %v751_v56, %v3524_v62  ;;  %v3648_v13 = vadd.f32 %v891_v27, %v801_v3  ;;  %v2631_v16 = vpop.f32.mrb[51].mxu0  ;;  %v2672_v31 = vpop.f32.mrb[53].mxu1  ;;  %v1692_v62 = vrot.slane %v3172_v59, 3 }
 0x150   : > { %v902_v55 = vpop.f32.mrb[54].mxu1 }
 0x151   : > { %v3653_v53 = vadd.f32 %v894_v38, %v802_v5  ;;  %2857 = vmatmul.mubr.msk.bf16.gmra.mrb[156].mxu0 %vm376_vm2, %v1691_v6  ;;  %v2673_v42 = vpop.f32.mrb[55].mxu1  ;;  %v1693_v4 = vsel %vm1682_vm8, %v1690_v18, %v1692_v62  ;;  %v1695_v40 = vsel %vm1682_vm8, %v1692_v62, %v1694_v7  ;;  %v1696_v38 = vrot.slane %v3286_v46, 3 }
 0x152   : > { %2860 = vmatprep.mubr.msk.bf16.mxu0 %vm2975_vm1, %v2974_v2 }
 0x153   : > { %v1697_v3 = vsel %vm1682_vm8, %v1694_v7, %v1696_v38 }
 0x154   : > { %v756_v9 = vpop.f32.mrb[52].mxu0 }
 0x155   : > { %v803_v12 = vadd.f32 %v756_v9, %v3536_v17  ;;  %v2634_v23 = vpop.f32.mrb[53].mxu0  ;;  %v2959_v17 = vld [vmem:[%s3948_s3 + $0x8] sm:$0xff]   ;;  %v1699_v9 = vsel %vm1682_vm8, %v1696_v38, %v1698_v44 }
 0x156   : > { %v759_v60 = vpop.f32.mrb[54].mxu0  ;;  %v907_v41 = vpop.f32.mrb[56].mxu1  ;;  %2883 = vmatpush3.bf16.msra.mxu1 %v2959_v17 }
 0x157   : > { %v804_v0 = vadd.f32 %v759_v60, %v3539_v50  ;;  %v3663_v24 = vadd.f32 %v899_v43, %v803_v12  ;;  %v2635_v26 = vpop.f32.mrb[55].mxu0  ;;  %v2676_v14 = vpop.f32.mrb[57].mxu1  ;;  %2884 = vmatprep.subr.bf16.mxu1 %v2974_v2 }
 0x158   : > { %v910_v34 = vpop.f32.mrb[58].mxu1  ;;  %v1700_v14 = vrot.slane %v3564_v57, 3 }
 0x159   : > { %v3665_v37 = vadd.f32 %v902_v55, %v804_v0  ;;  %2861 = vmatmul.mubr.msk.bf16.gmra.mrb[160].mxu0 %vm376_vm2, %v1693_v4  ;;  %v2677_v59 = vpop.f32.mrb[59].mxu1 }
 0x15a   : > { %2864 = vmatprep.mubr.msk.bf16.mxu0 %vm2975_vm1, %v2974_v2  ;;  %v1701_v7 = vsel %vm1682_vm8, %v1698_v44, %v1700_v14 }
 0x15c   : > { %v764_v50 = vpop.f32.mrb[56].mxu0 }
 0x15d   : > { %v805_v35 = vadd.f32 %v764_v50, %v3558_v25  ;;  %v2638_v20 = vpop.f32.mrb[57].mxu0  ;;  %v2960_v25 = vld [vmem:[%s3948_s3 + $0x10] sm:$0xff]  }
 0x15e   : > { %v767_v52 = vpop.f32.mrb[58].mxu0  ;;  %v915_v58 = vpop.f32.mrb[60].mxu1  ;;  %2885 = vmatpush3.bf16.msra.mxu1 %v2960_v25 }
 0x15f   : > { %v806_v22 = vadd.f32 %v767_v52, %v3560_v39  ;;  %v3678_v61 = vadd.f32 %v907_v41, %v805_v35  ;;  %v2639_v27 = vpop.f32.mrb[59].mxu0  ;;  %v2680_v19 = vpop.f32.mrb[61].mxu1  ;;  %2886 = vmatprep.subr.bf16.mxu1 %v2974_v2 }
 0x160   : > { %v918_v51 = vpop.f32.mrb[62].mxu1 }
 0x161   : > { %v3680_v29 = vadd.f32 %v910_v34, %v806_v22  ;;  %2865 = vmatmul.mubr.msk.bf16.gmra.mrb[164].mxu0 %vm376_vm2, %v1695_v40  ;;  %v2681_v36 = vpop.f32.mrb[63].mxu1 }
 0x162   : > { %2868 = vmatprep.mubr.msk.bf16.mxu0 %vm2975_vm1, %v2974_v2 }
 0x164   : > { %v772_v39 = vpop.f32.mrb[60].mxu0 }
 0x165   : > { %v807_v47 = vadd.f32 %v772_v39, %v3575_v28  ;;  %v2642_v18 = vpop.f32.mrb[61].mxu0  ;;  %v2961_v28 = vld [vmem:[%s3948_s3 + $0x18] sm:$0xff]  }
 0x166   : > { %v775_v63 = vpop.f32.mrb[62].mxu0  ;;  %v923_v1 = vpop.f32.mrb[64].mxu1  ;;  %2887 = vmatpush3.bf16.msra.mxu1 %v2961_v28 }
 0x167   : > { %v808_v56 = vadd.f32 %v775_v63, %v3577_v11  ;;  %v3693_v6 = vadd.f32 %v915_v58, %v807_v47  ;;  %v2643_v43 = vpop.f32.mrb[63].mxu0  ;;  %v2684_v5 = vpop.f32.mrb[65].mxu1  ;;  %2888 = vmatprep.subr.bf16.mxu1 %v2974_v2 }
 0x168   : > { %v926_v16 = vpop.f32.mrb[66].mxu1  ;;  %v2964_v43 = vld [vmem:[%s3948_s3 + $0x30] sm:$0xff]  }
 0x169   : > { %v3695_v31 = vadd.f32 %v918_v51, %v808_v56  ;;  %2869 = vmatmul.mubr.msk.bf16.gmra.mrb[168].mxu0 %vm376_vm2, %v1697_v3  ;;  %v2685_v46 = vpop.f32.mrb[67].mxu1  ;;  %v2963_v51 = vld [vmem:[%s3948_s3 + $0x28] sm:$0xff]  }
 0x16a   : > { %2872 = vmatprep.mubr.msk.bf16.mxu0 %vm2975_vm1, %v2974_v2 }
 0x16c   : > { %v780_v11 = vpop.f32.mrb[64].mxu0 }
 0x16d   : > { %v809_v55 = vadd.f32 %v780_v11, %v3588_v15  ;;  %v2646_v42 = vpop.f32.mrb[65].mxu0  ;;  %v2962_v15 = vld [vmem:[%s3948_s3 + $0x20] sm:$0xff]  }
 0x16e   : > { %v783_v62 = vpop.f32.mrb[66].mxu0  ;;  %v931_v12 = vpop.f32.mrb[68].mxu1  ;;  %2889 = vmatpush3.bf16.msra.mxu1 %v2962_v15 }
 0x16f   : > { %v810_v23 = vadd.f32 %v783_v62, %v3592_v33  ;;  %v3708_v60 = vadd.f32 %v923_v1, %v809_v55  ;;  %v2647_v4 = vpop.f32.mrb[67].mxu0  ;;  %v2688_v41 = vpop.f32.mrb[69].mxu1  ;;  %2890 = vmatprep.subr.bf16.mxu1 %v2974_v2 }
 0x170   : > { %v934_v0 = vpop.f32.mrb[70].mxu1 }
 0x171   : > { %v3710_v26 = vadd.f32 %v926_v16, %v810_v23  ;;  %2873 = vmatmul.mubr.msk.bf16.gmra.mrb[172].mxu0 %vm376_vm2, %v1699_v9  ;;  %v2689_v54 = vpop.f32.mrb[71].mxu1 }
 0x172   : > { %2876 = vmatprep.mubr.msk.bf16.mxu0 %vm2975_vm1, %v2974_v2  ;;  %2891 = vmatpush3.bf16.msra.mxu1 %v2963_v51 }
 0x173   : > { %2892 = vmatprep.subr.bf16.mxu1 %v2974_v2 }
 0x174   : > { %v788_v33 = vpop.f32.mrb[68].mxu0 }
 0x175   : > { %v811_v34 = vadd.f32 %v788_v33, %v3602_v10  ;;  %v2650_v59 = vpop.f32.mrb[69].mxu0  ;;  %v2965_v33 = vld [vmem:[%s3948_s3 + $0x38] sm:$0xff]  }
 0x176   : > { %v791_v17 = vpop.f32.mrb[70].mxu0  ;;  %v1245_v50 = vpop.f32.mrb[72].mxu1  ;;  %2893 = vmatpush3.bf16.msra.mxu1 %v2964_v43 }
 0x177   : > { %v812_v35 = vadd.f32 %v791_v17, %v3605_v48  ;;  %v3723_v20 = vadd.f32 %v931_v12, %v811_v34  ;;  %v2651_v52 = vpop.f32.mrb[71].mxu0  ;;  %v2732_v40 = vpop.f32.mrb[73].mxu1  ;;  %2894 = vmatprep.subr.bf16.mxu1 %v2974_v2 }
 0x178   : > { %v1248_v58 = vpop.f32.mrb[74].mxu1 }
 0x179   : > { %v3725_v22 = vadd.f32 %v934_v0, %v812_v35  ;;  %2877 = vmatmul.mubr.msk.bf16.gmra.mrb[176].mxu0 %vm376_vm2, %v1701_v7  ;;  %v2733_v57 = vpop.f32.mrb[75].mxu1 }
 0x17a   : > { %2895 = vmatpush3.bf16.msra.mxu1 %v2965_v33 }
 0x17c   : > { %v1071_v27 = vpop.f32.mrb[72].mxu0 }
 0x17d   : > { %v1142_v10 = vadd.f32 %v1071_v27, %v3615_v32  ;;  %v2694_v19 = vpop.f32.mrb[73].mxu0 }
 0x17e   : > { %v1074_v36 = vpop.f32.mrb[74].mxu0  ;;  %v1253_v48 = vpop.f32.mrb[76].mxu1 }
 0x17f   : > { %v1143_v25 = vadd.f32 %v1074_v36, %v3617_v21  ;;  %v3733_v38 = vadd.f32 %v1245_v50, %v1142_v10  ;;  %v2695_v39 = vpop.f32.mrb[75].mxu0  ;;  %v2736_v47 = vpop.f32.mrb[77].mxu1 }
 0x180   : > { %v1256_v18 = vpop.f32.mrb[78].mxu1 }
 0x181   : > { %v3736_v63 = vadd.f32 %v1248_v58, %v1143_v25  ;;  %v2737_v32 = vpop.f32.mrb[79].mxu1 }
 0x184   : > { %v1079_v3 = vpop.f32.mrb[76].mxu0 }
 0x185   : > { %v1144_v1 = vadd.f32 %v1079_v3, %v3626_v30  ;;  %v2698_v56 = vpop.f32.mrb[77].mxu0 }
 0x186   : > { %v1082_v21 = vpop.f32.mrb[78].mxu0  ;;  %v1261_v5 = vpop.f32.mrb[80].mxu1 }
 0x187   : > { %v1145_v16 = vadd.f32 %v1082_v21, %v3628_v8  ;;  %v3743_v46 = vadd.f32 %v1253_v48, %v1144_v1  ;;  %v2699_v28 = vpop.f32.mrb[79].mxu0  ;;  %v2740_v44 = vpop.f32.mrb[81].mxu1 }
 0x188   : > { %v1264_v11 = vpop.f32.mrb[82].mxu1 }
 0x189   : > { %v3746_v55 = vadd.f32 %v1256_v18, %v1145_v16  ;;  %v2741_v30 = vpop.f32.mrb[83].mxu1 }
 0x18c   : > { %v1087_v42 = vpop.f32.mrb[80].mxu0 }
 0x18d   : > { %v1146_v62 = vadd.f32 %v1087_v42, %v3637_v45  ;;  %v2702_v9 = vpop.f32.mrb[81].mxu0 }
 0x18e   : > { %v1090_v12 = vpop.f32.mrb[82].mxu0  ;;  %v1269_v23 = vpop.f32.mrb[84].mxu1 }
 0x18f   : > { %v1147_v4 = vadd.f32 %v1090_v12, %v3639_v49  ;;  %v3750_v8 = vadd.f32 %v1261_v5, %v1146_v62  ;;  %v2703_v41 = vpop.f32.mrb[83].mxu0  ;;  %v2744_v0 = vpop.f32.mrb[85].mxu1 }
 0x190   : > { %v1272_v54 = vpop.f32.mrb[86].mxu1 }
 0x191   : > { %v3752_v15 = vadd.f32 %v1264_v11, %v1147_v4  ;;  %v2745_v14 = vpop.f32.mrb[87].mxu1 }
 0x194   : > { %v1095_v34 = vpop.f32.mrb[84].mxu0 }
 0x195   : > { %v1148_v45 = vadd.f32 %v1095_v34, %v3648_v13  ;;  %v2706_v59 = vpop.f32.mrb[85].mxu0 }
 0x196   : > { %v1098_v17 = vpop.f32.mrb[86].mxu0  ;;  %v1277_v7 = vpop.f32.mrb[88].mxu1 }
 0x197   : > { %v1149_v49 = vadd.f32 %v1098_v17, %v3653_v53  ;;  %v3759_v50 = vadd.f32 %v1269_v23, %v1148_v45  ;;  %v2707_v35 = vpop.f32.mrb[87].mxu0  ;;  %v2748_v52 = vpop.f32.mrb[89].mxu1 }
 0x198   : > { %v1280_v40 = vpop.f32.mrb[90].mxu1 }
 0x199   : > { %v3761_v58 = vadd.f32 %v1272_v54, %v1149_v49  ;;  %v2749_v57 = vpop.f32.mrb[91].mxu1 }
 0x19c   : > { %v1103_v27 = vpop.f32.mrb[88].mxu0 }
 0x19d   : > { %v1150_v10 = vadd.f32 %v1103_v27, %v3663_v24  ;;  %v2710_v19 = vpop.f32.mrb[89].mxu0 }
 0x19e   : > { %v1106_v51 = vpop.f32.mrb[90].mxu0  ;;  %v1285_v36 = vpop.f32.mrb[92].mxu1 }
 0x19f   : > { %v1151_v13 = vadd.f32 %v1106_v51, %v3665_v37  ;;  %v3765_v48 = vadd.f32 %v1277_v7, %v1150_v10  ;;  %v2711_v25 = vpop.f32.mrb[91].mxu0  ;;  %v2752_v53 = vpop.f32.mrb[93].mxu1 }
 0x1a0   : > { %v1288_v39 = vpop.f32.mrb[94].mxu1 }
 0x1a1   : > { %v3767_v47 = vadd.f32 %v1280_v40, %v1151_v13  ;;  %v2753_v18 = vpop.f32.mrb[95].mxu1 }
 0x1a4   : > { %v1111_v32 = vpop.f32.mrb[92].mxu0 }
 0x1a5   : > { %v1152_v3 = vadd.f32 %v1111_v32, %v3678_v61  ;;  %v2714_v1 = vpop.f32.mrb[93].mxu0 }
 0x1a6   : > { %v1114_v56 = vpop.f32.mrb[94].mxu0  ;;  %v1293_v43 = vpop.f32.mrb[96].mxu1 }
 0x1a7   : > { %v1153_v24 = vadd.f32 %v1114_v56, %v3680_v29  ;;  %v3771_v21 = vadd.f32 %v1285_v36, %v1152_v3  ;;  %v2715_v5 = vpop.f32.mrb[95].mxu0  ;;  %v2756_v37 = vpop.f32.mrb[97].mxu1 }
 0x1a8   : > { %v1296_v16 = vpop.f32.mrb[98].mxu1 }
 0x1a9   : > { %v3773_v28 = vadd.f32 %v1288_v39, %v1153_v24  ;;  %v2757_v44 = vpop.f32.mrb[99].mxu1 }
 0x1ac   : > { %v1119_v11 = vpop.f32.mrb[96].mxu0 }
 0x1ad   : > { %v1154_v30 = vadd.f32 %v1119_v11, %v3693_v6  ;;  %v2718_v42 = vpop.f32.mrb[97].mxu0 }
 0x1ae   : > { %v1122_v62 = vpop.f32.mrb[98].mxu0  ;;  %v1301_v9 = vpop.f32.mrb[100].mxu1 }
 0x1af   : > { %v1155_v61 = vadd.f32 %v1122_v62, %v3695_v31  ;;  %v3777_v12 = vadd.f32 %v1293_v43, %v1154_v30  ;;  %v2719_v23 = vpop.f32.mrb[99].mxu0  ;;  %v2760_v29 = vpop.f32.mrb[101].mxu1 }
 0x1b0   : > { %v1304_v4 = vpop.f32.mrb[102].mxu1 }
 0x1b1   : > { %v3779_v41 = vadd.f32 %v1296_v16, %v1155_v61  ;;  %v2761_v0 = vpop.f32.mrb[103].mxu1 }
 0x1b4   : > { %v1127_v54 = vpop.f32.mrb[100].mxu0 }
 0x1b5   : > { %v1156_v14 = vadd.f32 %v1127_v54, %v3708_v60  ;;  %v2722_v33 = vpop.f32.mrb[101].mxu0 }
 0x1b6   : > { %v1130_v34 = vpop.f32.mrb[102].mxu0  ;;  %v1309_v45 = vpop.f32.mrb[104].mxu1 }
 0x1b7   : > { %v1157_v6 = vadd.f32 %v1130_v34, %v3710_v26  ;;  %v3783_v59 = vadd.f32 %v1301_v9, %v1156_v14  ;;  %v2723_v17 = vpop.f32.mrb[103].mxu0  ;;  %v2764_v31 = vpop.f32.mrb[105].mxu1 }
 0x1b8   : > { %v1312_v7 = vpop.f32.mrb[106].mxu1 }
 0x1b9   : > { %v3785_v49 = vadd.f32 %v1304_v4, %v1157_v6  ;;  %v2765_v35 = vpop.f32.mrb[107].mxu1 }
 0x1bc   : > { %v1135_v52 = vpop.f32.mrb[104].mxu0 }
 0x1bd   : > { %v1158_v40 = vadd.f32 %v1135_v52, %v3723_v20  ;;  %v2726_v57 = vpop.f32.mrb[105].mxu0 }
 0x1be   : > { %v1138_v27 = vpop.f32.mrb[106].mxu0  ;;  %v1592_v10 = vpop.f32.mrb[108].mxu1 }
 0x1bf   : > { %v1159_v60 = vadd.f32 %v1138_v27, %v3725_v22  ;;  %v3789_v19 = vadd.f32 %v1309_v45, %v1158_v40  ;;  %v2727_v51 = vpop.f32.mrb[107].mxu0  ;;  %v2808_v26 = vpop.f32.mrb[109].mxu1 }
 0x1c0   : > { %v1595_v36 = vpop.f32.mrb[110].mxu1 }
 0x1c1   : > { %v3791_v13 = vadd.f32 %v1312_v7, %v1159_v60  ;;  %v2809_v25 = vpop.f32.mrb[111].mxu1 }
 0x1c4   : > { %v1388_v53 = vpop.f32.mrb[108].mxu0 }
 0x1c5   : > { %v1459_v39 = vadd.f32 %v1388_v53, %v3733_v38  ;;  %v2770_v18 = vpop.f32.mrb[109].mxu0 }
 0x1c6   : > { %v1391_v32 = vpop.f32.mrb[110].mxu0  ;;  %v1600_v3 = vpop.f32.mrb[112].mxu1 }
 0x1c7   : > { %v1460_v20 = vadd.f32 %v1391_v32, %v3736_v63  ;;  %v3795_v1 = vadd.f32 %v1592_v10, %v1459_v39  ;;  %v2771_v56 = vpop.f32.mrb[111].mxu0  ;;  %v2812_v22 = vpop.f32.mrb[113].mxu1 }
 0x1c8   : > { %v1603_v43 = vpop.f32.mrb[114].mxu1 }
 0x1c9   : > { %v3797_v24 = vadd.f32 %v1595_v36, %v1460_v20  ;;  %v2813_v5 = vpop.f32.mrb[115].mxu1 }
 0x1cc   : > { %v1396_v37 = vpop.f32.mrb[112].mxu0 }
 0x1cd   : > { %v1461_v16 = vadd.f32 %v1396_v37, %v3743_v46  ;;  %v2774_v44 = vpop.f32.mrb[113].mxu0 }
 0x1ce   : > { %v1399_v11 = vpop.f32.mrb[114].mxu0  ;;  %v1608_v30 = vpop.f32.mrb[116].mxu1 }
 0x1cf   : > { %v1462_v38 = vadd.f32 %v1399_v11, %v3746_v55  ;;  %v3801_v42 = vadd.f32 %v1600_v3, %v1461_v16  ;;  %v2775_v62 = vpop.f32.mrb[115].mxu0  ;;  %v2816_v63 = vpop.f32.mrb[117].mxu1 }
 0x1d0   : > { %v1611_v9 = vpop.f32.mrb[118].mxu1 }
 0x1d1   : > { %v3803_v61 = vadd.f32 %v1603_v43, %v1462_v38  ;;  %v2817_v23 = vpop.f32.mrb[119].mxu1 }
 0x1d4   : > { %v1404_v29 = vpop.f32.mrb[116].mxu0 }
 0x1d5   : > { %v1463_v4 = vadd.f32 %v1404_v29, %v3750_v8  ;;  %v2778_v0 = vpop.f32.mrb[117].mxu0 }
 0x1d6   : > { %v1407_v54 = vpop.f32.mrb[118].mxu0  ;;  %v1616_v14 = vpop.f32.mrb[120].mxu1 }
 0x1d7   : > { %v1464_v46 = vadd.f32 %v1407_v54, %v3752_v15  ;;  %v3807_v33 = vadd.f32 %v1608_v30, %v1463_v4  ;;  %v2779_v34 = vpop.f32.mrb[119].mxu0  ;;  %v2820_v55 = vpop.f32.mrb[121].mxu1 }
 0x1d8   : > { %v1619_v45 = vpop.f32.mrb[122].mxu1 }
 0x1d9   : > { %v3809_v6 = vadd.f32 %v1611_v9, %v1464_v46  ;;  %v2821_v17 = vpop.f32.mrb[123].mxu1 }
 0x1dc   : > { %v1412_v31 = vpop.f32.mrb[120].mxu0 }
 0x1dd   : > { %v1465_v7 = vadd.f32 %v1412_v31, %v3759_v50  ;;  %v2782_v35 = vpop.f32.mrb[121].mxu0 }
 0x1de   : > { %v1415_v52 = vpop.f32.mrb[122].mxu0  ;;  %v1624_v40 = vpop.f32.mrb[124].mxu1 }
 0x1df   : > { %v1466_v8 = vadd.f32 %v1415_v52, %v3761_v58  ;;  %v3813_v57 = vadd.f32 %v1616_v14, %v1465_v7  ;;  %v2783_v27 = vpop.f32.mrb[123].mxu0  ;;  %v2824_v15 = vpop.f32.mrb[125].mxu1 }
 0x1e0   : > { %v1627_v10 = vpop.f32.mrb[126].mxu1 }
 0x1e1   : > { %v3815_v60 = vadd.f32 %v1619_v45, %v1466_v8  ;;  %v2825_v51 = vpop.f32.mrb[127].mxu1 }
 0x1e4   : > { %v1420_v26 = vpop.f32.mrb[124].mxu0 }
 0x1e5   : > { %v1467_v36 = vadd.f32 %v1420_v26, %v3765_v48  ;;  %v2786_v25 = vpop.f32.mrb[125].mxu0 }
 0x1e6   : > { %v1423_v53 = vpop.f32.mrb[126].mxu0  ;;  %v1632_v39 = vpop.f32.mrb[128].mxu1 }
 0x1e7   : > { %v1468_v50 = vadd.f32 %v1423_v53, %v3767_v47  ;;  %v3819_v18 = vadd.f32 %v1624_v40, %v1467_v36  ;;  %v2787_v32 = vpop.f32.mrb[127].mxu0  ;;  %v2828_v58 = vpop.f32.mrb[129].mxu1 }
 0x1e8   : > { %v1635_v3 = vpop.f32.mrb[130].mxu1 }
 0x1e9   : > { %v3821_v20 = vadd.f32 %v1627_v10, %v1468_v50  ;;  %v2829_v56 = vpop.f32.mrb[131].mxu1 }
 0x1ec   : > { %v1428_v22 = vpop.f32.mrb[128].mxu0 }
 0x1ed   : > { %v1469_v43 = vadd.f32 %v1428_v22, %v3771_v21  ;;  %v2790_v5 = vpop.f32.mrb[129].mxu0 }
 0x1ee   : > { %v1431_v37 = vpop.f32.mrb[130].mxu0  ;;  %v1640_v16 = vpop.f32.mrb[132].mxu1 }
 0x1ef   : > { %v1470_v48 = vadd.f32 %v1431_v37, %v3773_v28  ;;  %v3825_v44 = vadd.f32 %v1632_v39, %v1469_v43  ;;  %v2791_v11 = vpop.f32.mrb[131].mxu0  ;;  %v2832_v47 = vpop.f32.mrb[133].mxu1  ;;  %v3850_v39 = vld [vmem:[%s3947_s2] ss:$0 sm:$0xff] }
 0x1f0   : > { %v1643_v30 = vpop.f32.mrb[134].mxu1 }
 0x1f1   : > { %v3827_v38 = vadd.f32 %v1635_v3, %v1470_v48  ;;  %v2833_v62 = vpop.f32.mrb[135].mxu1 }
 0x1f4   : > { %v1436_v63 = vpop.f32.mrb[132].mxu0 }
 0x1f5   : > { %v1471_v9 = vadd.f32 %v1436_v63, %v3777_v12  ;;  %v2794_v23 = vpop.f32.mrb[133].mxu0 }
 0x1f6   : > { %v1439_v29 = vpop.f32.mrb[134].mxu0  ;;  %v1648_v4 = vpop.f32.mrb[136].mxu1 }
 0x1f7   : > { %v1472_v21 = vadd.f32 %v1439_v29, %v3779_v41  ;;  %v3831_v0 = vadd.f32 %v1640_v16, %v1471_v9  ;;  %v2795_v54 = vpop.f32.mrb[135].mxu0  ;;  %v2836_v28 = vpop.f32.mrb[137].mxu1 }
 0x1f8   : > { %v1651_v14 = vpop.f32.mrb[138].mxu1 }
 0x1f9   : > { %v3833_v46 = vadd.f32 %v1643_v30, %v1472_v21  ;;  %v2837_v34 = vpop.f32.mrb[139].mxu1 }
 0x1fc   : > { %v1444_v55 = vpop.f32.mrb[136].mxu0 }
 0x1fd   : > { %v1473_v45 = vadd.f32 %v1444_v55, %v3783_v59  ;;  %v2798_v17 = vpop.f32.mrb[137].mxu0 }
 0x1fe   : > { %v1447_v31 = vpop.f32.mrb[138].mxu0  ;;  %v1656_v7 = vpop.f32.mrb[140].mxu1 }
 0x1ff   : > { %v1474_v12 = vadd.f32 %v1447_v31, %v3785_v49  ;;  %v3837_v35 = vadd.f32 %v1648_v4, %v1473_v45  ;;  %v2799_v52 = vpop.f32.mrb[139].mxu0  ;;  %v2840_v41 = vpop.f32.mrb[141].mxu1 }
 0x200   : > { %v1659_v40 = vpop.f32.mrb[142].mxu1 }
 0x201   : > { %v3839_v8 = vadd.f32 %v1651_v14, %v1474_v12  ;;  %v2841_v27 = vpop.f32.mrb[143].mxu1 }
 0x204   : > { %v1452_v15 = vpop.f32.mrb[140].mxu0 }
 0x205   : > { %v1475_v10 = vadd.f32 %v1452_v15, %v3789_v19  ;;  %v2802_v51 = vpop.f32.mrb[141].mxu0 }
 0x206   : > { %v1455_v26 = vpop.f32.mrb[142].mxu0 }
 0x207   : > { %v1476_v59 = vadd.f32 %v1455_v26, %v3791_v13  ;;  %v3843_v36 = vadd.f32 %v1656_v7, %v1475_v10  ;;  %v2803_v25 = vpop.f32.mrb[143].mxu0 }
 0x209   : > { %v3845_v53 = vadd.f32 %v1659_v40, %v1476_v59 }
 0x20c   : > { %v1766_v49 = vpop.f32.mrb[144].mxu0 }
 0x20d   : > { %v1837_v50 = vadd.f32 %v1766_v49, %v3795_v1  ;;  %v2846_v32 = vpop.f32.mrb[145].mxu0 }
 0x20e   : > { %v1769_v58 = vpop.f32.mrb[146].mxu0 }
 0x20f   : > { %v1862_v19 = vadd.f32 %v3850_v39, %v1837_v50  ;;  %v1838_v3 = vadd.f32 %v1769_v58, %v3797_v24  ;;  %v2847_v13 = vpop.f32.mrb[147].mxu0 }
 0x211   : > { %v1863_v56 = vadd.f32 %v3850_v39, %v1838_v3  ;;  %v1880_v22 = vmax.f32 %v1862_v19, 0.0 }
 0x213   : > { %v1881_v43 = vmax.f32 %v1863_v56, 0.0 }
 0x214   : > { %v1774_v5 = vpop.f32.mrb[148].mxu0 }
 0x215   : > { %v1898_v37 = vpack.c.bf16 %v1881_v43, %v1880_v22  ;;  %v1839_v16 = vadd.f32 %v1774_v5, %v3801_v42  ;;  %v2850_v48 = vpop.f32.mrb[149].mxu0 }
 0x216   : > { %v1777_v11 = vpop.f32.mrb[150].mxu0 }
 0x217   : > { %v1864_v47 = vadd.f32 %v3850_v39, %v1839_v16  ;;  %v1840_v1 = vadd.f32 %v1777_v11, %v3803_v61  ;;  %v2851_v30 = vpop.f32.mrb[151].mxu0  ;;  %2897 = vmatmul.mubr.bf16.vlgmr.msra.gmra.mrb[144].mxu1 %v1898_v37 }
 0x218   : > { %2900 = vmatprep.mubr.msk.bf16.mxu1 %vm2975_vm1, %v2974_v2 }
 0x219   : > { %v1865_v24 = vadd.f32 %v3850_v39, %v1840_v1  ;;  %v1882_v62 = vmax.f32 %v1864_v47, 0.0 }
 0x21b   : > { %v1883_v63 = vmax.f32 %v1865_v24, 0.0 }
 0x21c   : > { %v1782_v9 = vpop.f32.mrb[152].mxu0 }
 0x21d   : > { %v1841_v23 = vadd.f32 %v1782_v9, %v3807_v33  ;;  %v2854_v29 = vpop.f32.mrb[153].mxu0  ;;  %v1899_v42 = vpack.c.bf16 %v1883_v63, %v1882_v62 }
 0x21e   : > { %v1785_v4 = vpop.f32.mrb[154].mxu0 }
 0x21f   : > { %v1866_v21 = vadd.f32 %v3850_v39, %v1841_v23  ;;  %v1842_v54 = vadd.f32 %v1785_v4, %v3809_v6  ;;  %v2855_v61 = vpop.f32.mrb[155].mxu0  ;;  %2901 = vmatmul.mubr.bf16.gmra.mrb[148].mxu1 %v1899_v42 }
 0x220   : > { %2904 = vmatprep.mubr.msk.bf16.mxu1 %vm2975_vm1, %v2974_v2 }
 0x221   : > { %v1867_v28 = vadd.f32 %v3850_v39, %v1842_v54  ;;  %v1884_v14 = vmax.f32 %v1866_v21, 0.0 }
 0x223   : > { %v1885_v34 = vmax.f32 %v1867_v28, 0.0 }
 0x224   : > { %v1790_v55 = vpop.f32.mrb[156].mxu0 }
 0x225   : > { %v1843_v45 = vadd.f32 %v1790_v55, %v3813_v57  ;;  %v2858_v33 = vpop.f32.mrb[157].mxu0  ;;  %v1900_v17 = vpack.c.bf16 %v1885_v34, %v1884_v14 }
 0x226   : > { %v1793_v31 = vpop.f32.mrb[158].mxu0 }
 0x227   : > { %v1868_v7 = vadd.f32 %v3850_v39, %v1843_v45  ;;  %v1844_v12 = vadd.f32 %v1793_v31, %v3815_v60  ;;  %v2859_v6 = vpop.f32.mrb[159].mxu0  ;;  %2905 = vmatmul.mubr.bf16.gmra.mrb[152].mxu1 %v1900_v17 }
 0x228   : > { %2908 = vmatprep.mubr.msk.bf16.mxu1 %vm2975_vm1, %v2974_v2 }
 0x229   : > { %v1869_v52 = vadd.f32 %v3850_v39, %v1844_v12  ;;  %v1886_v41 = vmax.f32 %v1868_v7, 0.0 }
 0x22b   : > { %v1887_v40 = vmax.f32 %v1869_v52, 0.0 }
 0x22c   : > { %v1798_v27 = vpop.f32.mrb[160].mxu0 }
 0x22d   : > { %v1845_v15 = vadd.f32 %v1798_v27, %v3819_v18  ;;  %v2862_v57 = vpop.f32.mrb[161].mxu0  ;;  %v1901_v10 = vpack.c.bf16 %v1887_v40, %v1886_v41 }
 0x22e   : > { %v1801_v51 = vpop.f32.mrb[162].mxu0 }
 0x22f   : > { %v1870_v26 = vadd.f32 %v3850_v39, %v1845_v15  ;;  %v1846_v59 = vadd.f32 %v1801_v51, %v3821_v20  ;;  %v2863_v60 = vpop.f32.mrb[163].mxu0  ;;  %2909 = vmatmul.mubr.bf16.gmra.mrb[156].mxu1 %v1901_v10 }
 0x230   : > { %2912 = vmatprep.mubr.msk.bf16.mxu1 %vm2975_vm1, %v2974_v2 }
 0x231   : > { %v1871_v25 = vadd.f32 %v3850_v39, %v1846_v59  ;;  %v1888_v49 = vmax.f32 %v1870_v26, 0.0 }
 0x233   : > { %v1889_v50 = vmax.f32 %v1871_v25, 0.0 }
 0x234   : > { %v1806_v32 = vpop.f32.mrb[164].mxu0 }
 0x235   : > { %v1847_v58 = vadd.f32 %v1806_v32, %v3825_v44  ;;  %v2866_v18 = vpop.f32.mrb[165].mxu0  ;;  %v1902_v19 = vpack.c.bf16 %v1889_v50, %v1888_v49 }
 0x236   : > { %v1809_v3 = vpop.f32.mrb[166].mxu0 }
 0x237   : > { %v1872_v13 = vadd.f32 %v3850_v39, %v1847_v58  ;;  %v1848_v56 = vadd.f32 %v1809_v3, %v3827_v38  ;;  %v2867_v20 = vpop.f32.mrb[167].mxu0  ;;  %2913 = vmatmul.mubr.bf16.gmra.mrb[160].mxu1 %v1902_v19 }
 0x238   : > { %2916 = vmatprep.mubr.msk.bf16.mxu1 %vm2975_vm1, %v2974_v2 }
 0x239   : > { %v1873_v22 = vadd.f32 %v3850_v39, %v1848_v56  ;;  %v1890_v43 = vmax.f32 %v1872_v13, 0.0 }
 0x23b   : > { %v1891_v5 = vmax.f32 %v1873_v22, 0.0 }
 0x23c   : > { %v1814_v37 = vpop.f32.mrb[168].mxu0 }
 0x23d   : > { %v1849_v16 = vadd.f32 %v1814_v37, %v3831_v0  ;;  %v2870_v44 = vpop.f32.mrb[169].mxu0  ;;  %v1903_v48 = vpack.c.bf16 %v1891_v5, %v1890_v43 }
 0x23e   : > { %v1817_v11 = vpop.f32.mrb[170].mxu0 }
 0x23f   : > { %v1874_v47 = vadd.f32 %v3850_v39, %v1849_v16  ;;  %v1850_v1 = vadd.f32 %v1817_v11, %v3833_v46  ;;  %v2871_v38 = vpop.f32.mrb[171].mxu0  ;;  %2917 = vmatmul.mubr.bf16.gmra.mrb[164].mxu1 %v1903_v48 }
 0x240   : > { %2920 = vmatprep.mubr.msk.bf16.mxu1 %vm2975_vm1, %v2974_v2 }
 0x241   : > { %v1875_v30 = vadd.f32 %v3850_v39, %v1850_v1  ;;  %v1892_v24 = vmax.f32 %v1874_v47, 0.0 }
 0x243   : > { %v1893_v62 = vmax.f32 %v1875_v30, 0.0 }
 0x244   : > { %v1822_v63 = vpop.f32.mrb[172].mxu0 }
 0x245   : > { %v1851_v9 = vadd.f32 %v1822_v63, %v3837_v35  ;;  %v2874_v0 = vpop.f32.mrb[173].mxu0  ;;  %v1904_v23 = vpack.c.bf16 %v1893_v62, %v1892_v24 }
 0x246   : > { %v1825_v29 = vpop.f32.mrb[174].mxu0 }
 0x247   : > { %v1876_v42 = vadd.f32 %v3850_v39, %v1851_v9  ;;  %v1852_v4 = vadd.f32 %v1825_v29, %v3839_v8  ;;  %v2875_v46 = vpop.f32.mrb[175].mxu0  ;;  %2921 = vmatmul.mubr.bf16.gmra.mrb[168].mxu1 %v1904_v23 }
 0x248   : > { %2924 = vmatprep.mubr.msk.bf16.mxu1 %vm2975_vm1, %v2974_v2 }
 0x249   : > { %v1877_v21 = vadd.f32 %v3850_v39, %v1852_v4  ;;  %v1894_v54 = vmax.f32 %v1876_v42, 0.0 }
 0x24b   : > { %v1895_v61 = vmax.f32 %v1877_v21, 0.0 }
 0x24c   : > { %v1830_v28 = vpop.f32.mrb[176].mxu0 }
 0x24d   : > { %v1853_v14 = vadd.f32 %v1830_v28, %v3843_v36  ;;  %v2878_v35 = vpop.f32.mrb[177].mxu0  ;;  %v1905_v34 = vpack.c.bf16 %v1895_v61, %v1894_v54  ;;  %v3907_v36 = vld [vmem:[%s3949_s4] ss:$0 sm:$0xff] }
 0x24e   : > { %v1833_v55 = vpop.f32.mrb[178].mxu0 }
 0x24f   : > { %v1878_v45 = vadd.f32 %v3850_v39, %v1853_v14  ;;  %v1854_v8 = vadd.f32 %v1833_v55, %v3845_v53  ;;  %v2879_v33 = vpop.f32.mrb[179].mxu0  ;;  %2925 = vmatmul.mubr.bf16.gmra.mrb[172].mxu1 %v1905_v34 }
 0x250   : > { %2928 = vmatprep.mubr.msk.bf16.mxu1 %vm2975_vm1, %v2974_v2 }
 0x251   : > { %v1879_v17 = vadd.f32 %v3850_v39, %v1854_v8  ;;  %v1896_v31 = vmax.f32 %v1878_v45, 0.0 }
 0x253   : > { %v1897_v7 = vmax.f32 %v1879_v17, 0.0 }
 0x255   : > { %v1906_v12 = vpack.c.bf16 %v1897_v7, %v1896_v31 }
 0x257   : > { %2929 = vmatmul.mubr.bf16.gmra.mrb[176].mxu1 %v1906_v12 }
 0x2ea   : > { %v2012_v6 = vpop.f32.mrb[144].mxu1 }
 0x2eb   : > { %v2898_v52 = vpop.f32.mrb[145].mxu1  ;;  %v2013_v41 = vadd.f32 %v3907_v36, %v2012_v6 }
 0x2ec   : > { %v2015_v53 = vpop.f32.mrb[146].mxu1 }
 0x2ed   : > { %v2016_v40 = vadd.f32 %v3907_v36, %v2015_v53  ;;  %v2899_v2 = vpop.f32.mrb[147].mxu1 }
 0x2ef   : > { %v2381_v39 = vpack.c.bf16 %v2016_v40, %v2013_v41 }
 0x2f1   : > { %2382 = vst [vmem:[%s3915_s17] sm:$0xff] %v2381_v39  }
 0x2f2   : > { %v2020_v27 = vpop.f32.mrb[148].mxu1 }
 0x2f3   : > { %v2902_v15 = vpop.f32.mrb[149].mxu1  ;;  %v2021_v10 = vadd.f32 %v3907_v36, %v2020_v27 }
 0x2f4   : > { %v2023_v57 = vpop.f32.mrb[150].mxu1 }
 0x2f5   : > { %v2024_v51 = vadd.f32 %v3907_v36, %v2023_v57  ;;  %v2903_v26 = vpop.f32.mrb[151].mxu1 }
 0x2f7   : > { %v2386_v59 = vpack.c.bf16 %v2024_v51, %v2021_v10 }
 0x2f9   : > { %2423 = vst [vmem:[%s3915_s17 + $0x8] sm:$0xff] %v2386_v59  }
 0x2fa   : > { %v2028_v60 = vpop.f32.mrb[152].mxu1 }
 0x2fb   : > { %v2906_v25 = vpop.f32.mrb[153].mxu1  ;;  %v2029_v50 = vadd.f32 %v3907_v36, %v2028_v60 }
 0x2fc   : > { %v2031_v49 = vpop.f32.mrb[154].mxu1 }
 0x2fd   : > { %v2032_v32 = vadd.f32 %v3907_v36, %v2031_v49  ;;  %v2907_v58 = vpop.f32.mrb[155].mxu1 }
 0x2ff   : > { %v2391_v18 = vpack.c.bf16 %v2032_v32, %v2029_v50 }
 0x301   : > { %2424 = vst [vmem:[%s3915_s17 + $0x10] sm:$0xff] %v2391_v18  }
 0x302   : > { %v2036_v19 = vpop.f32.mrb[156].mxu1 }
 0x303   : > { %v2910_v3 = vpop.f32.mrb[157].mxu1  ;;  %v2037_v56 = vadd.f32 %v3907_v36, %v2036_v19 }
 0x304   : > { %v2039_v13 = vpop.f32.mrb[158].mxu1 }
 0x305   : > { %v2040_v20 = vadd.f32 %v3907_v36, %v2039_v13  ;;  %v2911_v22 = vpop.f32.mrb[159].mxu1 }
 0x307   : > { %v2396_v43 = vpack.c.bf16 %v2040_v20, %v2037_v56 }
 0x309   : > { %2425 = vst [vmem:[%s3915_s17 + $0x18] sm:$0xff] %v2396_v43  }
 0x30a   : > { %v2044_v5 = vpop.f32.mrb[160].mxu1 }
 0x30b   : > { %v2914_v37 = vpop.f32.mrb[161].mxu1  ;;  %v2045_v44 = vadd.f32 %v3907_v36, %v2044_v5 }
 0x30c   : > { %v2047_v16 = vpop.f32.mrb[162].mxu1 }
 0x30d   : > { %v2048_v48 = vadd.f32 %v3907_v36, %v2047_v16  ;;  %v2915_v11 = vpop.f32.mrb[163].mxu1 }
 0x30f   : > { %v2401_v47 = vpack.c.bf16 %v2048_v48, %v2045_v44 }
 0x311   : > { %2426 = vst [vmem:[%s3915_s17 + $0x20] sm:$0xff] %v2401_v47  }
 0x312   : > { %v2052_v1 = vpop.f32.mrb[164].mxu1 }
 0x313   : > { %v2918_v38 = vpop.f32.mrb[165].mxu1  ;;  %v2053_v24 = vadd.f32 %v3907_v36, %v2052_v1 }
 0x314   : > { %v2055_v30 = vpop.f32.mrb[166].mxu1 }
 0x315   : > { %v2056_v62 = vadd.f32 %v3907_v36, %v2055_v30  ;;  %v2919_v63 = vpop.f32.mrb[167].mxu1 }
 0x317   : > { %v2406_v9 = vpack.c.bf16 %v2056_v62, %v2053_v24 }
 0x319   : > { %2427 = vst [vmem:[%s3915_s17 + $0x28] sm:$0xff] %v2406_v9  }
 0x31a   : > { %v2060_v0 = vpop.f32.mrb[168].mxu1 }
 0x31b   : > { %v2922_v23 = vpop.f32.mrb[169].mxu1  ;;  %v2061_v42 = vadd.f32 %v3907_v36, %v2060_v0 }
 0x31c   : > { %v2063_v29 = vpop.f32.mrb[170].mxu1 }
 0x31d   : > { %v2064_v4 = vadd.f32 %v3907_v36, %v2063_v29  ;;  %v2923_v46 = vpop.f32.mrb[171].mxu1 }
 0x31f   : > { %v2411_v21 = vpack.c.bf16 %v2064_v4, %v2061_v42 }
 0x321   : > { %2428 = vst [vmem:[%s3915_s17 + $0x30] sm:$0xff] %v2411_v21  }
 0x322   : > { %v2068_v54 = vpop.f32.mrb[172].mxu1 }
 0x323   : > { %v2926_v61 = vpop.f32.mrb[173].mxu1  ;;  %v2069_v14 = vadd.f32 %v3907_v36, %v2068_v54 }
 0x324   : > { %v2071_v28 = vpop.f32.mrb[174].mxu1 }
 0x325   : > { %v2072_v35 = vadd.f32 %v3907_v36, %v2071_v28  ;;  %v2927_v34 = vpop.f32.mrb[175].mxu1 }
 0x327   : > { %v2416_v55 = vpack.c.bf16 %v2072_v35, %v2069_v14 }
 0x329   : > { %2429 = vst [vmem:[%s3915_s17 + $0x38] sm:$0xff] %v2416_v55  }
 0x32a   : > { %v2076_v45 = vpop.f32.mrb[176].mxu1 }
 0x32b   : > { %v2077_v8 = vadd.f32 %v3907_v36, %v2076_v45  ;;  %v2930_v33 = vpop.f32.mrb[177].mxu1 }
 0x32c   : > { %v2079_v17 = vpop.f32.mrb[178].mxu1 }
 0x32d   : > { %v2080_v31 = vadd.f32 %v3907_v36, %v2079_v17  ;;  %v2931_v7 = vpop.f32.mrb[179].mxu1 }
 0x32f   : > { %v2421_v12 = vpack.c.bf16 %v2080_v31, %v2077_v8 }
 0x331   : > { %2430 = vst [vmem:[%s3915_s17 + $0x40] sm:$0xff] %v2421_v12  }
 0x332 PF: > { %s15_s18 = sadd.s32 1, %s2972_s18  }
 0x333   : > { %p12_p4 = scmp.ge.s32.totalorder %s15_s18, 6  }
 0x335   :  { %14 = sbr.rel (!%p12_p4) target bundleno = 1 (0x1), region = 70 }

// kernel: custom-call
= control target key start
LH: loop header
LB: loop body
LE: loop exit
PB: predicated region body
PF: predicated region fallthrough
CT: control target
= control target key end

     0   :  { %v2746_v0 = vmov 2147483648   ;;  %v2747_v1 = vmov 2147483647   ;;  %s3136_s0 = inlined_call_operand.vmem [shape: f32[2,32768], index: 0, kind: input, shape index: {}]   ;;  %s3137_s1 = inlined_call_operand.vmem [shape: f32[2,8], index: 1, kind: output, shape index: {0}]   ;;  %s3138_s2 = inlined_call_operand.vmem [shape: s32[2,8], index: 2, kind: output, shape index: {1}]  }
   0x1   :  { %6 = vst [vmem:[#allocation11] sm:$0xff] %v2746_v0  ;;  %7 = vst [vmem:[#allocation13] sm:$0xff] %v2747_v1 }
   0x2   :  { %v157_v2 = vlaneseq  ;;  %v24_v3 = vld [vmem:[%s3136_s0] sm:$0xff]  ;;  %v26_v4 = vld [vmem:[%s3136_s0 + $0x8] sm:$0xff]  ;;  %v2748_v5 = vmov 2147483648   ;;  %v2749_v6 = vmov 2147483647   ;;  %v28_v7 = vld [vmem:[%s3136_s0 + $0x10] sm:$0xff] }
   0x3   :  { %942 = vst [vmem:[#allocation12] sm:$0xff] %v2748_v5  ;;  %943 = vst [vmem:[#allocation14] sm:$0xff] %v2749_v6  ;;  %v30_v8 = vld [vmem:[%s3136_s0 + $0x18] sm:$0xff]  ;;  %v32_v10 = vld [vmem:[%s3136_s0 + $0x20] sm:$0xff]  ;;  %v168_v14 = vsub.s32 2147483647, %v24_v3 }
   0x4   :  { %v2783_v9 = vshrl.u32 %v157_v2, 7  ;;  %v34_v11 = vld [vmem:[%s3136_s0 + $0x28] sm:$0xff]  ;;  %v158_v12 = vand.u32 127, %v157_v2  ;;  %v177_v15 = vsub.s32 2147483647, %v26_v4  ;;  %vm167_vm0 = vcmp.lt.s32.totalorder %v24_v3, 0 }
   0x5   :  { %vm176_vm1 = vcmp.lt.s32.totalorder %v26_v4, 0  ;;  %v186_v16 = vsub.s32 2147483647, %v28_v7  ;;  %v195_v17 = vsub.s32 2147483647, %v30_v8  ;;  %v36_v18 = vld [vmem:[%s3136_s0 + $0x30] sm:$0xff]  ;;  %v169_v22 = vsel %vm167_vm0, %v168_v14, %v24_v3 }
   0x6   :  { %v161_v13 = vshrl.u32 %v2783_v9, 1  ;;  %vm185_vm2 = vcmp.lt.s32.totalorder %v28_v7, 0  ;;  %vm194_vm3 = vcmp.lt.s32.totalorder %v30_v8, 0  ;;  %vm203_vm4 = vcmp.lt.s32.totalorder %v32_v10, 0  ;;  %v38_v30 = vld [vmem:[%s3136_s0 + $0x38] sm:$0xff]  ;;  %v40_v37 = vld [vmem:[%s3136_s0 + $0x40] sm:$0xff] }
   0x7   :  { %v204_v20 = vsub.s32 2147483647, %v32_v10  ;;  %v178_v23 = vsel %vm176_vm1, %v177_v15, %v26_v4  ;;  %v213_v24 = vsub.s32 2147483647, %v34_v11  ;;  %v187_v25 = vsel %vm185_vm2, %v186_v16, %v28_v7  ;;  %v42_v45 = vld [vmem:[%s3136_s0 + $0x48] sm:$0xff]  ;;  %v44_v49 = vld [vmem:[%s3136_s0 + $0x50] sm:$0xff] }
   0x8   :  { %v163_v19 = vmul.u32 128, %v161_v13  ;;  %v196_v26 = vsel %vm194_vm3, %v195_v17, %v30_v8  ;;  %vm212_vm5 = vcmp.lt.s32.totalorder %v34_v11, 0  ;;  %vm221_vm6 = vcmp.lt.s32.totalorder %v36_v18, 0  ;;  %v46_v53 = vld [vmem:[%s3136_s0 + $0x58] sm:$0xff]  ;;  %v48_v57 = vld [vmem:[%s3136_s0 + $0x60] sm:$0xff]  ;;  %v50_v61 = vld [vmem:[%s3136_s0 + $0x68] sm:$0xff] }
   0x9   :  { %v205_v29 = vsel %vm203_vm4, %v204_v20, %v32_v10  ;;  %v222_v34 = vsub.s32 2147483647, %v36_v18  ;;  %v214_v35 = vsel %vm212_vm5, %v213_v24, %v34_v11  ;;  %vm230_vm13 = vcmp.lt.s32.totalorder %v38_v30, 0  ;;  %v52_v5 = vld [vmem:[%s3136_s0 + $0x70] sm:$0xff]  ;;  %v54_v10 = vld [vmem:[%s3136_s0 + $0x78] sm:$0xff]  ;;  %v56_v13 = vld [vmem:[%s3136_s0 + $0x80] sm:$0xff] }
   0xa   :  { %v2796_v21 = vadd.s32 %v163_v19, %v158_v12  ;;  %v231_v46 = vsub.s32 2147483647, %v38_v30  ;;  %vm239_vm14 = vcmp.lt.s32.totalorder %v40_v37, 0  ;;  %v240_v48 = vsub.s32 2147483647, %v40_v37  ;;  %v58_v20 = vld [vmem:[%s3136_s0 + $0x88] sm:$0xff] }
   0xb   :  { %v223_v43 = vsel %vm221_vm6, %v222_v34, %v36_v18  ;;  %vm248_vm1 = vcmp.lt.s32.totalorder %v42_v45, 0  ;;  %v249_v58 = vsub.s32 2147483647, %v42_v45  ;;  %vm257_vm4 = vcmp.lt.s32.totalorder %v44_v49, 0  ;;  %v64_v34 = vld [vmem:[%s3136_s0 + $0xa0] sm:$0xff] }
   0xc   :  { %vm171_vm7 = vcmp.lt.s32.totalorder %v2796_v21, 32768  ;;  %v179_v27 = vadd.s32 512, %v2796_v21  ;;  %v188_v28 = vadd.s32 1024, %v2796_v21  ;;  %751 = vst [vmem:[#allocation16] sm:$0xff] %v2796_v21  ;;  %v197_v32 = vadd.s32 1536, %v2796_v21 }
   0xd   :  { %v172_v31 = vsel %vm171_vm7, %v169_v22, 2147483648  ;;  %v206_v33 = vadd.s32 2048, %v2796_v21  ;;  %v215_v36 = vadd.s32 2560, %v2796_v21  ;;  %v224_v44 = vadd.s32 3072, %v2796_v21 }
   0xe   :  { %173 = vst [vmem:[#allocation15] sm:$0xff] %v172_v31  ;;  %vm180_vm8 = vcmp.lt.s32.totalorder %v179_v27, 32768  ;;  %vm189_vm9 = vcmp.lt.s32.totalorder %v188_v28, 32768  ;;  %754 = vst [vmem:[#allocation16 + $0x8] sm:$0xff] %v179_v27  ;;  %vm198_vm10 = vcmp.lt.s32.totalorder %v197_v32, 32768  ;;  %v233_v47 = vadd.s32 3584, %v2796_v21 }
   0xf   :  { %757 = vst [vmem:[#allocation16 + $0x10] sm:$0xff] %v188_v28  ;;  %v181_v38 = vsel %vm180_vm8, %v178_v23, 2147483648  ;;  %v190_v39 = vsel %vm189_vm9, %v187_v25, 2147483648  ;;  %760 = vst [vmem:[#allocation16 + $0x18] sm:$0xff] %v197_v32  ;;  %v199_v40 = vsel %vm198_vm10, %v196_v26, 2147483648  ;;  %vm207_vm11 = vcmp.lt.s32.totalorder %v206_v33, 32768 }
  0x10   :  { %763 = vst [vmem:[#allocation16 + $0x20] sm:$0xff] %v206_v33  ;;  %182 = vst [vmem:[#allocation15 + $0x8] sm:$0xff] %v181_v38  ;;  %vm216_vm12 = vcmp.lt.s32.totalorder %v215_v36, 32768  ;;  %v208_v41 = vsel %vm207_vm11, %v205_v29, 2147483648  ;;  %vm225_vm15 = vcmp.lt.s32.totalorder %v224_v44, 32768  ;;  %v232_v51 = vsel %vm230_vm13, %v231_v46, %v38_v30  ;;  %v60_v27 = vld [vmem:[%s3136_s0 + $0x90] sm:$0xff] }
  0x11   :  { %191 = vst [vmem:[#allocation15 + $0x10] sm:$0xff] %v190_v39  ;;  %766 = vst [vmem:[#allocation16 + $0x28] sm:$0xff] %v215_v36  ;;  %v217_v42 = vsel %vm216_vm12, %v214_v35, 2147483648  ;;  %v226_v50 = vsel %vm225_vm15, %v223_v43, 2147483648  ;;  %vm234_vm0 = vcmp.lt.s32.totalorder %v233_v47, 32768  ;;  %v242_v52 = vadd.s32 4096, %v2796_v21 }
  0x12   :  { %200 = vst [vmem:[#allocation15 + $0x18] sm:$0xff] %v199_v40  ;;  %209 = vst [vmem:[#allocation15 + $0x20] sm:$0xff] %v208_v41  ;;  %v235_v54 = vsel %vm234_vm0, %v232_v51, 2147483648  ;;  %v241_v55 = vsel %vm239_vm14, %v240_v48, %v40_v37  ;;  %v251_v56 = vadd.s32 4608, %v2796_v21  ;;  %v258_v60 = vsub.s32 2147483647, %v44_v49 }
  0x13   :  { %218 = vst [vmem:[#allocation15 + $0x28] sm:$0xff] %v217_v42  ;;  %769 = vst [vmem:[#allocation16 + $0x30] sm:$0xff] %v224_v44  ;;  %vm243_vm2 = vcmp.lt.s32.totalorder %v242_v52, 32768  ;;  %v250_v62 = vsel %vm248_vm1, %v249_v58, %v42_v45  ;;  %v260_v63 = vadd.s32 5120, %v2796_v21  ;;  %vm266_vm5 = vcmp.lt.s32.totalorder %v46_v53, 0  ;;  %v62_v31 = vld [vmem:[%s3136_s0 + $0x98] sm:$0xff] }
  0x14   :  { %772 = vst [vmem:[#allocation16 + $0x38] sm:$0xff] %v233_v47  ;;  %227 = vst [vmem:[#allocation15 + $0x30] sm:$0xff] %v226_v50  ;;  %v244_v59 = vsel %vm243_vm2, %v241_v55, 2147483648  ;;  %vm252_vm3 = vcmp.lt.s32.totalorder %v251_v56, 32768  ;;  %v267_v0 = vsub.s32 2147483647, %v46_v53  ;;  %v259_v3 = vsel %vm257_vm4, %v258_v60, %v44_v49 }
  0x15   :  { %236 = vst [vmem:[#allocation15 + $0x38] sm:$0xff] %v235_v54  ;;  %775 = vst [vmem:[#allocation16 + $0x40] sm:$0xff] %v242_v52  ;;  %v253_v1 = vsel %vm252_vm3, %v250_v62, 2147483648  ;;  %v269_v4 = vadd.s32 5632, %v2796_v21  ;;  %vm275_vm6 = vcmp.lt.s32.totalorder %v48_v57, 0  ;;  %vm261_vm7 = vcmp.lt.s32.totalorder %v260_v63, 32768 }
  0x16   :  { %778 = vst [vmem:[#allocation16 + $0x48] sm:$0xff] %v251_v56  ;;  %245 = vst [vmem:[#allocation15 + $0x40] sm:$0xff] %v244_v59  ;;  %v268_v6 = vsel %vm266_vm5, %v267_v0, %v46_v53  ;;  %v276_v7 = vsub.s32 2147483647, %v48_v57  ;;  %v278_v8 = vadd.s32 6144, %v2796_v21  ;;  %v262_v11 = vsel %vm261_vm7, %v259_v3, 2147483648 }
  0x17   :  { %254 = vst [vmem:[#allocation15 + $0x48] sm:$0xff] %v253_v1  ;;  %781 = vst [vmem:[#allocation16 + $0x50] sm:$0xff] %v260_v63  ;;  %vm270_vm8 = vcmp.lt.s32.totalorder %v269_v4, 32768  ;;  %vm284_vm9 = vcmp.lt.s32.totalorder %v50_v61, 0  ;;  %v285_v12 = vsub.s32 2147483647, %v50_v61 }
  0x18   :  { %784 = vst [vmem:[#allocation16 + $0x58] sm:$0xff] %v269_v4  ;;  %263 = vst [vmem:[#allocation15 + $0x50] sm:$0xff] %v262_v11  ;;  %v271_v14 = vsel %vm270_vm8, %v268_v6, 2147483648  ;;  %v277_v15 = vsel %vm275_vm6, %v276_v7, %v48_v57  ;;  %vm279_vm10 = vcmp.lt.s32.totalorder %v278_v8, 32768  ;;  %v287_v16 = vadd.s32 6656, %v2796_v21  ;;  %v66_v41 = vld [vmem:[%s3136_s0 + $0xa8] sm:$0xff] }
  0x19   :  { %787 = vst [vmem:[#allocation16 + $0x60] sm:$0xff] %v278_v8  ;;  %272 = vst [vmem:[#allocation15 + $0x58] sm:$0xff] %v271_v14  ;;  %v280_v17 = vsel %vm279_vm10, %v277_v15, 2147483648  ;;  %v286_v18 = vsel %vm284_vm9, %v285_v12, %v50_v61  ;;  %vm293_vm11 = vcmp.lt.s32.totalorder %v52_v5, 0  ;;  %v294_v19 = vsub.s32 2147483647, %v52_v5 }
  0x1a   :  { %281 = vst [vmem:[#allocation15 + $0x60] sm:$0xff] %v280_v17  ;;  %vm288_vm12 = vcmp.lt.s32.totalorder %v287_v16, 32768  ;;  %v296_v22 = vadd.s32 7168, %v2796_v21  ;;  %vm302_vm13 = vcmp.lt.s32.totalorder %v54_v10, 0  ;;  %v303_v23 = vsub.s32 2147483647, %v54_v10 }
  0x1b   :  { %790 = vst [vmem:[#allocation16 + $0x68] sm:$0xff] %v287_v16  ;;  %v289_v24 = vsel %vm288_vm12, %v286_v18, 2147483648  ;;  %v295_v25 = vsel %vm293_vm11, %v294_v19, %v52_v5  ;;  %v305_v26 = vadd.s32 7680, %v2796_v21  ;;  %vm311_vm14 = vcmp.lt.s32.totalorder %v56_v13, 0  ;;  %v68_v47 = vld [vmem:[%s3136_s0 + $0xb0] sm:$0xff]  ;;  %v70_v51 = vld [vmem:[%s3136_s0 + $0xb8] sm:$0xff] }
  0x1c   :  { %290 = vst [vmem:[#allocation15 + $0x68] sm:$0xff] %v289_v24  ;;  %vm297_vm15 = vcmp.lt.s32.totalorder %v296_v22, 32768  ;;  %v304_v28 = vsel %vm302_vm13, %v303_v23, %v54_v10  ;;  %v312_v29 = vsub.s32 2147483647, %v56_v13  ;;  %v314_v30 = vadd.s32 8192, %v2796_v21  ;;  %793 = vst [vmem:[#allocation16 + $0x70] sm:$0xff] %v296_v22 }
  0x1d   :  { %v298_v32 = vsel %vm297_vm15, %v295_v25, 2147483648  ;;  %vm306_vm0 = vcmp.lt.s32.totalorder %v305_v26, 32768  ;;  %vm320_vm1 = vcmp.lt.s32.totalorder %v58_v20, 0  ;;  %v321_v33 = vsub.s32 2147483647, %v58_v20  ;;  %796 = vst [vmem:[#allocation16 + $0x78] sm:$0xff] %v305_v26 }
  0x1e   :  { %299 = vst [vmem:[#allocation15 + $0x70] sm:$0xff] %v298_v32  ;;  %v307_v35 = vsel %vm306_vm0, %v304_v28, 2147483648  ;;  %v313_v36 = vsel %vm311_vm14, %v312_v29, %v56_v13  ;;  %vm315_vm2 = vcmp.lt.s32.totalorder %v314_v30, 32768  ;;  %v323_v37 = vadd.s32 8704, %v2796_v21  ;;  %799 = vst [vmem:[#allocation16 + $0x80] sm:$0xff] %v314_v30  ;;  %v72_v54 = vld [vmem:[%s3136_s0 + $0xc0] sm:$0xff] }
  0x1f   :  { %308 = vst [vmem:[#allocation15 + $0x78] sm:$0xff] %v307_v35  ;;  %v316_v38 = vsel %vm315_vm2, %v313_v36, 2147483648  ;;  %v322_v39 = vsel %vm320_vm1, %v321_v33, %v58_v20  ;;  %vm329_vm3 = vcmp.lt.s32.totalorder %v60_v27, 0  ;;  %v330_v40 = vsub.s32 2147483647, %v60_v27  ;;  %v74_v61 = vld [vmem:[%s3136_s0 + $0xc8] sm:$0xff] }
  0x20   :  { %317 = vst [vmem:[#allocation15 + $0x80] sm:$0xff] %v316_v38  ;;  %vm324_vm4 = vcmp.lt.s32.totalorder %v323_v37, 32768  ;;  %v332_v42 = vadd.s32 9216, %v2796_v21  ;;  %vm338_vm5 = vcmp.lt.s32.totalorder %v62_v31, 0  ;;  %v339_v43 = vsub.s32 2147483647, %v62_v31 }
  0x21   :  { %802 = vst [vmem:[#allocation16 + $0x88] sm:$0xff] %v323_v37  ;;  %v325_v44 = vsel %vm324_vm4, %v322_v39, 2147483648  ;;  %v331_v45 = vsel %vm329_vm3, %v330_v40, %v60_v27  ;;  %v341_v46 = vadd.s32 9728, %v2796_v21  ;;  %vm347_vm6 = vcmp.lt.s32.totalorder %v64_v34, 0  ;;  %v76_v4 = vld [vmem:[%s3136_s0 + $0xd0] sm:$0xff]  ;;  %v78_v8 = vld [vmem:[%s3136_s0 + $0xd8] sm:$0xff] }
  0x22   :  { %326 = vst [vmem:[#allocation15 + $0x88] sm:$0xff] %v325_v44  ;;  %vm333_vm7 = vcmp.lt.s32.totalorder %v332_v42, 32768  ;;  %v340_v48 = vsel %vm338_vm5, %v339_v43, %v62_v31  ;;  %v348_v49 = vsub.s32 2147483647, %v64_v34  ;;  %v350_v50 = vadd.s32 10240, %v2796_v21  ;;  %805 = vst [vmem:[#allocation16 + $0x90] sm:$0xff] %v332_v42 }
  0x23   :  { %v334_v52 = vsel %vm333_vm7, %v331_v45, 2147483648  ;;  %vm342_vm8 = vcmp.lt.s32.totalorder %v341_v46, 32768  ;;  %vm356_vm9 = vcmp.lt.s32.totalorder %v66_v41, 0  ;;  %v357_v53 = vsub.s32 2147483647, %v66_v41  ;;  %808 = vst [vmem:[#allocation16 + $0x98] sm:$0xff] %v341_v46 }
  0x24   :  { %335 = vst [vmem:[#allocation15 + $0x90] sm:$0xff] %v334_v52  ;;  %v343_v55 = vsel %vm342_vm8, %v340_v48, 2147483648  ;;  %v349_v56 = vsel %vm347_vm6, %v348_v49, %v64_v34  ;;  %vm351_vm10 = vcmp.lt.s32.totalorder %v350_v50, 32768  ;;  %v359_v57 = vadd.s32 10752, %v2796_v21  ;;  %811 = vst [vmem:[#allocation16 + $0xa0] sm:$0xff] %v350_v50  ;;  %v80_v12 = vld [vmem:[%s3136_s0 + $0xe0] sm:$0xff] }
  0x25   :  { %344 = vst [vmem:[#allocation15 + $0x98] sm:$0xff] %v343_v55  ;;  %v352_v58 = vsel %vm351_vm10, %v349_v56, 2147483648  ;;  %v358_v59 = vsel %vm356_vm9, %v357_v53, %v66_v41  ;;  %vm365_vm11 = vcmp.lt.s32.totalorder %v68_v47, 0  ;;  %v366_v60 = vsub.s32 2147483647, %v68_v47  ;;  %v82_v19 = vld [vmem:[%s3136_s0 + $0xe8] sm:$0xff] }
  0x26   :  { %353 = vst [vmem:[#allocation15 + $0xa0] sm:$0xff] %v352_v58  ;;  %vm360_vm12 = vcmp.lt.s32.totalorder %v359_v57, 32768  ;;  %v368_v62 = vadd.s32 11264, %v2796_v21  ;;  %vm374_vm13 = vcmp.lt.s32.totalorder %v70_v51, 0  ;;  %v375_v63 = vsub.s32 2147483647, %v70_v51 }
  0x27   :  { %814 = vst [vmem:[#allocation16 + $0xa8] sm:$0xff] %v359_v57  ;;  %v361_v0 = vsel %vm360_vm12, %v358_v59, 2147483648  ;;  %v367_v1 = vsel %vm365_vm11, %v366_v60, %v68_v47  ;;  %v377_v3 = vadd.s32 11776, %v2796_v21  ;;  %vm383_vm14 = vcmp.lt.s32.totalorder %v72_v54, 0  ;;  %v84_v26 = vld [vmem:[%s3136_s0 + $0xf0] sm:$0xff]  ;;  %v86_v30 = vld [vmem:[%s3136_s0 + $0xf8] sm:$0xff] }
  0x28   :  { %362 = vst [vmem:[#allocation15 + $0xa8] sm:$0xff] %v361_v0  ;;  %vm369_vm15 = vcmp.lt.s32.totalorder %v368_v62, 32768  ;;  %v376_v5 = vsel %vm374_vm13, %v375_v63, %v70_v51  ;;  %v384_v6 = vsub.s32 2147483647, %v72_v54  ;;  %v386_v7 = vadd.s32 12288, %v2796_v21  ;;  %817 = vst [vmem:[#allocation16 + $0xb0] sm:$0xff] %v368_v62 }
  0x29   :  { %v370_v10 = vsel %vm369_vm15, %v367_v1, 2147483648  ;;  %vm378_vm0 = vcmp.lt.s32.totalorder %v377_v3, 32768  ;;  %vm392_vm1 = vcmp.lt.s32.totalorder %v74_v61, 0  ;;  %v393_v11 = vsub.s32 2147483647, %v74_v61  ;;  %820 = vst [vmem:[#allocation16 + $0xb8] sm:$0xff] %v377_v3 }
  0x2a   :  { %371 = vst [vmem:[#allocation15 + $0xb0] sm:$0xff] %v370_v10  ;;  %v379_v13 = vsel %vm378_vm0, %v376_v5, 2147483648  ;;  %v385_v14 = vsel %vm383_vm14, %v384_v6, %v72_v54  ;;  %vm387_vm2 = vcmp.lt.s32.totalorder %v386_v7, 32768  ;;  %v395_v15 = vadd.s32 12800, %v2796_v21  ;;  %823 = vst [vmem:[#allocation16 + $0xc0] sm:$0xff] %v386_v7  ;;  %v88_v33 = vld [vmem:[%s3136_s0 + $0x100] sm:$0xff] }
  0x2b   :  { %380 = vst [vmem:[#allocation15 + $0xb8] sm:$0xff] %v379_v13  ;;  %v388_v16 = vsel %vm387_vm2, %v385_v14, 2147483648  ;;  %v394_v17 = vsel %vm392_vm1, %v393_v11, %v74_v61  ;;  %vm401_vm3 = vcmp.lt.s32.totalorder %v76_v4, 0  ;;  %v402_v18 = vsub.s32 2147483647, %v76_v4  ;;  %v90_v40 = vld [vmem:[%s3136_s0 + $0x108] sm:$0xff] }
  0x2c   :  { %389 = vst [vmem:[#allocation15 + $0xc0] sm:$0xff] %v388_v16  ;;  %vm396_vm4 = vcmp.lt.s32.totalorder %v395_v15, 32768  ;;  %v404_v20 = vadd.s32 13312, %v2796_v21  ;;  %vm410_vm5 = vcmp.lt.s32.totalorder %v78_v8, 0  ;;  %v411_v22 = vsub.s32 2147483647, %v78_v8 }
  0x2d   :  { %826 = vst [vmem:[#allocation16 + $0xc8] sm:$0xff] %v395_v15  ;;  %v397_v23 = vsel %vm396_vm4, %v394_v17, 2147483648  ;;  %v403_v24 = vsel %vm401_vm3, %v402_v18, %v76_v4  ;;  %v413_v25 = vadd.s32 13824, %v2796_v21  ;;  %vm419_vm6 = vcmp.lt.s32.totalorder %v80_v12, 0  ;;  %v92_v46 = vld [vmem:[%s3136_s0 + $0x110] sm:$0xff]  ;;  %v94_v50 = vld [vmem:[%s3136_s0 + $0x118] sm:$0xff] }
  0x2e   :  { %398 = vst [vmem:[#allocation15 + $0xc8] sm:$0xff] %v397_v23  ;;  %vm405_vm7 = vcmp.lt.s32.totalorder %v404_v20, 32768  ;;  %v412_v27 = vsel %vm410_vm5, %v411_v22, %v78_v8  ;;  %v420_v28 = vsub.s32 2147483647, %v80_v12  ;;  %v422_v29 = vadd.s32 14336, %v2796_v21  ;;  %829 = vst [vmem:[#allocation16 + $0xd0] sm:$0xff] %v404_v20 }
  0x2f   :  { %v406_v31 = vsel %vm405_vm7, %v403_v24, 2147483648  ;;  %vm414_vm8 = vcmp.lt.s32.totalorder %v413_v25, 32768  ;;  %vm428_vm9 = vcmp.lt.s32.totalorder %v82_v19, 0  ;;  %v429_v32 = vsub.s32 2147483647, %v82_v19  ;;  %832 = vst [vmem:[#allocation16 + $0xd8] sm:$0xff] %v413_v25 }
  0x30   :  { %407 = vst [vmem:[#allocation15 + $0xd0] sm:$0xff] %v406_v31  ;;  %v415_v34 = vsel %vm414_vm8, %v412_v27, 2147483648  ;;  %v421_v35 = vsel %vm419_vm6, %v420_v28, %v80_v12  ;;  %vm423_vm10 = vcmp.lt.s32.totalorder %v422_v29, 32768  ;;  %v431_v36 = vadd.s32 14848, %v2796_v21  ;;  %835 = vst [vmem:[#allocation16 + $0xe0] sm:$0xff] %v422_v29  ;;  %v96_v53 = vld [vmem:[%s3136_s0 + $0x120] sm:$0xff] }
  0x31   :  { %416 = vst [vmem:[#allocation15 + $0xd8] sm:$0xff] %v415_v34  ;;  %v424_v37 = vsel %vm423_vm10, %v421_v35, 2147483648  ;;  %v430_v38 = vsel %vm428_vm9, %v429_v32, %v82_v19  ;;  %vm437_vm11 = vcmp.lt.s32.totalorder %v84_v26, 0  ;;  %v438_v39 = vsub.s32 2147483647, %v84_v26  ;;  %v98_v60 = vld [vmem:[%s3136_s0 + $0x128] sm:$0xff] }
  0x32   :  { %425 = vst [vmem:[#allocation15 + $0xe0] sm:$0xff] %v424_v37  ;;  %vm432_vm12 = vcmp.lt.s32.totalorder %v431_v36, 32768  ;;  %v440_v41 = vadd.s32 15360, %v2796_v21  ;;  %vm446_vm13 = vcmp.lt.s32.totalorder %v86_v30, 0  ;;  %v447_v42 = vsub.s32 2147483647, %v86_v30 }
  0x33   :  { %838 = vst [vmem:[#allocation16 + $0xe8] sm:$0xff] %v431_v36  ;;  %v433_v43 = vsel %vm432_vm12, %v430_v38, 2147483648  ;;  %v439_v44 = vsel %vm437_vm11, %v438_v39, %v84_v26  ;;  %v449_v45 = vadd.s32 15872, %v2796_v21  ;;  %vm455_vm14 = vcmp.lt.s32.totalorder %v88_v33, 0  ;;  %v100_v3 = vld [vmem:[%s3136_s0 + $0x130] sm:$0xff]  ;;  %v102_v7 = vld [vmem:[%s3136_s0 + $0x138] sm:$0xff] }
  0x34   :  { %434 = vst [vmem:[#allocation15 + $0xe8] sm:$0xff] %v433_v43  ;;  %vm441_vm15 = vcmp.lt.s32.totalorder %v440_v41, 32768  ;;  %v448_v47 = vsel %vm446_vm13, %v447_v42, %v86_v30  ;;  %v456_v48 = vsub.s32 2147483647, %v88_v33  ;;  %v458_v49 = vadd.s32 16384, %v2796_v21  ;;  %841 = vst [vmem:[#allocation16 + $0xf0] sm:$0xff] %v440_v41 }
  0x35   :  { %v442_v51 = vsel %vm441_vm15, %v439_v44, 2147483648  ;;  %vm450_vm0 = vcmp.lt.s32.totalorder %v449_v45, 32768  ;;  %vm464_vm1 = vcmp.lt.s32.totalorder %v90_v40, 0  ;;  %v465_v52 = vsub.s32 2147483647, %v90_v40  ;;  %844 = vst [vmem:[#allocation16 + $0xf8] sm:$0xff] %v449_v45 }
  0x36   :  { %443 = vst [vmem:[#allocation15 + $0xf0] sm:$0xff] %v442_v51  ;;  %v451_v54 = vsel %vm450_vm0, %v448_v47, 2147483648  ;;  %v457_v55 = vsel %vm455_vm14, %v456_v48, %v88_v33  ;;  %vm459_vm2 = vcmp.lt.s32.totalorder %v458_v49, 32768  ;;  %v467_v56 = vadd.s32 16896, %v2796_v21  ;;  %847 = vst [vmem:[#allocation16 + $0x100] sm:$0xff] %v458_v49  ;;  %v104_v11 = vld [vmem:[%s3136_s0 + $0x140] sm:$0xff] }
  0x37   :  { %452 = vst [vmem:[#allocation15 + $0xf8] sm:$0xff] %v451_v54  ;;  %v460_v57 = vsel %vm459_vm2, %v457_v55, 2147483648  ;;  %v466_v58 = vsel %vm464_vm1, %v465_v52, %v90_v40  ;;  %vm473_vm3 = vcmp.lt.s32.totalorder %v92_v46, 0  ;;  %v474_v59 = vsub.s32 2147483647, %v92_v46  ;;  %v106_v18 = vld [vmem:[%s3136_s0 + $0x148] sm:$0xff] }
  0x38   :  { %461 = vst [vmem:[#allocation15 + $0x100] sm:$0xff] %v460_v57  ;;  %vm468_vm4 = vcmp.lt.s32.totalorder %v467_v56, 32768  ;;  %v476_v61 = vadd.s32 17408, %v2796_v21  ;;  %vm482_vm5 = vcmp.lt.s32.totalorder %v94_v50, 0  ;;  %v483_v62 = vsub.s32 2147483647, %v94_v50 }
  0x39   :  { %850 = vst [vmem:[#allocation16 + $0x108] sm:$0xff] %v467_v56  ;;  %v469_v63 = vsel %vm468_vm4, %v466_v58, 2147483648  ;;  %v475_v0 = vsel %vm473_vm3, %v474_v59, %v92_v46  ;;  %v485_v1 = vadd.s32 17920, %v2796_v21  ;;  %vm491_vm6 = vcmp.lt.s32.totalorder %v96_v53, 0  ;;  %v108_v25 = vld [vmem:[%s3136_s0 + $0x150] sm:$0xff]  ;;  %v110_v29 = vld [vmem:[%s3136_s0 + $0x158] sm:$0xff] }
  0x3a   :  { %470 = vst [vmem:[#allocation15 + $0x108] sm:$0xff] %v469_v63  ;;  %vm477_vm7 = vcmp.lt.s32.totalorder %v476_v61, 32768  ;;  %v484_v4 = vsel %vm482_vm5, %v483_v62, %v94_v50  ;;  %v492_v5 = vsub.s32 2147483647, %v96_v53  ;;  %v494_v6 = vadd.s32 18432, %v2796_v21  ;;  %853 = vst [vmem:[#allocation16 + $0x110] sm:$0xff] %v476_v61 }
  0x3b   :  { %v478_v8 = vsel %vm477_vm7, %v475_v0, 2147483648  ;;  %vm486_vm8 = vcmp.lt.s32.totalorder %v485_v1, 32768  ;;  %vm500_vm9 = vcmp.lt.s32.totalorder %v98_v60, 0  ;;  %v501_v10 = vsub.s32 2147483647, %v98_v60  ;;  %856 = vst [vmem:[#allocation16 + $0x118] sm:$0xff] %v485_v1 }
  0x3c   :  { %479 = vst [vmem:[#allocation15 + $0x110] sm:$0xff] %v478_v8  ;;  %v487_v12 = vsel %vm486_vm8, %v484_v4, 2147483648  ;;  %v493_v13 = vsel %vm491_vm6, %v492_v5, %v96_v53  ;;  %vm495_vm10 = vcmp.lt.s32.totalorder %v494_v6, 32768  ;;  %v503_v14 = vadd.s32 18944, %v2796_v21  ;;  %859 = vst [vmem:[#allocation16 + $0x120] sm:$0xff] %v494_v6  ;;  %v112_v32 = vld [vmem:[%s3136_s0 + $0x160] sm:$0xff] }
  0x3d   :  { %488 = vst [vmem:[#allocation15 + $0x118] sm:$0xff] %v487_v12  ;;  %v496_v15 = vsel %vm495_vm10, %v493_v13, 2147483648  ;;  %v502_v16 = vsel %vm500_vm9, %v501_v10, %v98_v60  ;;  %vm509_vm11 = vcmp.lt.s32.totalorder %v100_v3, 0  ;;  %v510_v17 = vsub.s32 2147483647, %v100_v3  ;;  %v114_v39 = vld [vmem:[%s3136_s0 + $0x168] sm:$0xff] }
  0x3e   :  { %497 = vst [vmem:[#allocation15 + $0x120] sm:$0xff] %v496_v15  ;;  %vm504_vm12 = vcmp.lt.s32.totalorder %v503_v14, 32768  ;;  %v512_v19 = vadd.s32 19456, %v2796_v21  ;;  %vm518_vm13 = vcmp.lt.s32.totalorder %v102_v7, 0  ;;  %v519_v20 = vsub.s32 2147483647, %v102_v7 }
  0x3f   :  { %862 = vst [vmem:[#allocation16 + $0x128] sm:$0xff] %v503_v14  ;;  %v505_v22 = vsel %vm504_vm12, %v502_v16, 2147483648  ;;  %v511_v23 = vsel %vm509_vm11, %v510_v17, %v100_v3  ;;  %v521_v24 = vadd.s32 19968, %v2796_v21  ;;  %vm527_vm14 = vcmp.lt.s32.totalorder %v104_v11, 0  ;;  %v116_v45 = vld [vmem:[%s3136_s0 + $0x170] sm:$0xff]  ;;  %v118_v49 = vld [vmem:[%s3136_s0 + $0x178] sm:$0xff] }
  0x40   :  { %506 = vst [vmem:[#allocation15 + $0x128] sm:$0xff] %v505_v22  ;;  %vm513_vm15 = vcmp.lt.s32.totalorder %v512_v19, 32768  ;;  %v520_v26 = vsel %vm518_vm13, %v519_v20, %v102_v7  ;;  %v528_v27 = vsub.s32 2147483647, %v104_v11  ;;  %v530_v28 = vadd.s32 20480, %v2796_v21  ;;  %865 = vst [vmem:[#allocation16 + $0x130] sm:$0xff] %v512_v19 }
  0x41   :  { %v514_v30 = vsel %vm513_vm15, %v511_v23, 2147483648  ;;  %vm522_vm0 = vcmp.lt.s32.totalorder %v521_v24, 32768  ;;  %vm536_vm1 = vcmp.lt.s32.totalorder %v106_v18, 0  ;;  %v537_v31 = vsub.s32 2147483647, %v106_v18  ;;  %868 = vst [vmem:[#allocation16 + $0x138] sm:$0xff] %v521_v24 }
  0x42   :  { %515 = vst [vmem:[#allocation15 + $0x130] sm:$0xff] %v514_v30  ;;  %v523_v33 = vsel %vm522_vm0, %v520_v26, 2147483648  ;;  %v529_v34 = vsel %vm527_vm14, %v528_v27, %v104_v11  ;;  %vm531_vm2 = vcmp.lt.s32.totalorder %v530_v28, 32768  ;;  %v539_v35 = vadd.s32 20992, %v2796_v21  ;;  %871 = vst [vmem:[#allocation16 + $0x140] sm:$0xff] %v530_v28  ;;  %v120_v52 = vld [vmem:[%s3136_s0 + $0x180] sm:$0xff] }
  0x43   :  { %524 = vst [vmem:[#allocation15 + $0x138] sm:$0xff] %v523_v33  ;;  %v532_v36 = vsel %vm531_vm2, %v529_v34, 2147483648  ;;  %v538_v37 = vsel %vm536_vm1, %v537_v31, %v106_v18  ;;  %vm545_vm3 = vcmp.lt.s32.totalorder %v108_v25, 0  ;;  %v546_v38 = vsub.s32 2147483647, %v108_v25  ;;  %v122_v59 = vld [vmem:[%s3136_s0 + $0x188] sm:$0xff] }
  0x44   :  { %533 = vst [vmem:[#allocation15 + $0x140] sm:$0xff] %v532_v36  ;;  %vm540_vm4 = vcmp.lt.s32.totalorder %v539_v35, 32768  ;;  %v548_v40 = vadd.s32 21504, %v2796_v21  ;;  %vm554_vm5 = vcmp.lt.s32.totalorder %v110_v29, 0  ;;  %v555_v41 = vsub.s32 2147483647, %v110_v29 }
  0x45   :  { %874 = vst [vmem:[#allocation16 + $0x148] sm:$0xff] %v539_v35  ;;  %v541_v42 = vsel %vm540_vm4, %v538_v37, 2147483648  ;;  %v547_v43 = vsel %vm545_vm3, %v546_v38, %v108_v25  ;;  %v557_v44 = vadd.s32 22016, %v2796_v21  ;;  %vm563_vm6 = vcmp.lt.s32.totalorder %v112_v32, 0  ;;  %v124_v1 = vld [vmem:[%s3136_s0 + $0x190] sm:$0xff]  ;;  %v126_v6 = vld [vmem:[%s3136_s0 + $0x198] sm:$0xff] }
  0x46   :  { %542 = vst [vmem:[#allocation15 + $0x148] sm:$0xff] %v541_v42  ;;  %vm549_vm7 = vcmp.lt.s32.totalorder %v548_v40, 32768  ;;  %v556_v46 = vsel %vm554_vm5, %v555_v41, %v110_v29  ;;  %v564_v47 = vsub.s32 2147483647, %v112_v32  ;;  %v566_v48 = vadd.s32 22528, %v2796_v21  ;;  %877 = vst [vmem:[#allocation16 + $0x150] sm:$0xff] %v548_v40 }
  0x47   :  { %v550_v50 = vsel %vm549_vm7, %v547_v43, 2147483648  ;;  %vm558_vm8 = vcmp.lt.s32.totalorder %v557_v44, 32768  ;;  %vm572_vm9 = vcmp.lt.s32.totalorder %v114_v39, 0  ;;  %v573_v51 = vsub.s32 2147483647, %v114_v39  ;;  %880 = vst [vmem:[#allocation16 + $0x158] sm:$0xff] %v557_v44 }
  0x48   :  { %551 = vst [vmem:[#allocation15 + $0x150] sm:$0xff] %v550_v50  ;;  %v559_v53 = vsel %vm558_vm8, %v556_v46, 2147483648  ;;  %v565_v54 = vsel %vm563_vm6, %v564_v47, %v112_v32  ;;  %vm567_vm10 = vcmp.lt.s32.totalorder %v566_v48, 32768  ;;  %v575_v55 = vadd.s32 23040, %v2796_v21  ;;  %883 = vst [vmem:[#allocation16 + $0x160] sm:$0xff] %v566_v48  ;;  %v128_v10 = vld [vmem:[%s3136_s0 + $0x1a0] sm:$0xff] }
  0x49   :  { %560 = vst [vmem:[#allocation15 + $0x158] sm:$0xff] %v559_v53  ;;  %v568_v56 = vsel %vm567_vm10, %v565_v54, 2147483648  ;;  %v574_v57 = vsel %vm572_vm9, %v573_v51, %v114_v39  ;;  %vm581_vm11 = vcmp.lt.s32.totalorder %v116_v45, 0  ;;  %v582_v58 = vsub.s32 2147483647, %v116_v45  ;;  %v130_v17 = vld [vmem:[%s3136_s0 + $0x1a8] sm:$0xff] }
  0x4a   :  { %569 = vst [vmem:[#allocation15 + $0x160] sm:$0xff] %v568_v56  ;;  %vm576_vm12 = vcmp.lt.s32.totalorder %v575_v55, 32768  ;;  %v584_v60 = vadd.s32 23552, %v2796_v21  ;;  %vm590_vm13 = vcmp.lt.s32.totalorder %v118_v49, 0  ;;  %v591_v61 = vsub.s32 2147483647, %v118_v49 }
  0x4b   :  { %886 = vst [vmem:[#allocation16 + $0x168] sm:$0xff] %v575_v55  ;;  %v577_v62 = vsel %vm576_vm12, %v574_v57, 2147483648  ;;  %v583_v63 = vsel %vm581_vm11, %v582_v58, %v116_v45  ;;  %v593_v0 = vadd.s32 24064, %v2796_v21  ;;  %vm599_vm14 = vcmp.lt.s32.totalorder %v120_v52, 0  ;;  %v132_v24 = vld [vmem:[%s3136_s0 + $0x1b0] sm:$0xff]  ;;  %v134_v28 = vld [vmem:[%s3136_s0 + $0x1b8] sm:$0xff] }
  0x4c   :  { %578 = vst [vmem:[#allocation15 + $0x168] sm:$0xff] %v577_v62  ;;  %vm585_vm15 = vcmp.lt.s32.totalorder %v584_v60, 32768  ;;  %v592_v3 = vsel %vm590_vm13, %v591_v61, %v118_v49  ;;  %v600_v4 = vsub.s32 2147483647, %v120_v52  ;;  %v602_v5 = vadd.s32 24576, %v2796_v21  ;;  %889 = vst [vmem:[#allocation16 + $0x170] sm:$0xff] %v584_v60 }
  0x4d   :  { %v586_v7 = vsel %vm585_vm15, %v583_v63, 2147483648  ;;  %vm594_vm0 = vcmp.lt.s32.totalorder %v593_v0, 32768  ;;  %vm608_vm1 = vcmp.lt.s32.totalorder %v122_v59, 0  ;;  %v609_v8 = vsub.s32 2147483647, %v122_v59  ;;  %892 = vst [vmem:[#allocation16 + $0x178] sm:$0xff] %v593_v0 }
  0x4e   :  { %587 = vst [vmem:[#allocation15 + $0x170] sm:$0xff] %v586_v7  ;;  %v595_v11 = vsel %vm594_vm0, %v592_v3, 2147483648  ;;  %v601_v12 = vsel %vm599_vm14, %v600_v4, %v120_v52  ;;  %vm603_vm2 = vcmp.lt.s32.totalorder %v602_v5, 32768  ;;  %v611_v13 = vadd.s32 25088, %v2796_v21  ;;  %895 = vst [vmem:[#allocation16 + $0x180] sm:$0xff] %v602_v5  ;;  %v136_v31 = vld [vmem:[%s3136_s0 + $0x1c0] sm:$0xff] }
  0x4f   :  { %596 = vst [vmem:[#allocation15 + $0x178] sm:$0xff] %v595_v11  ;;  %v604_v14 = vsel %vm603_vm2, %v601_v12, 2147483648  ;;  %v610_v15 = vsel %vm608_vm1, %v609_v8, %v122_v59  ;;  %vm617_vm3 = vcmp.lt.s32.totalorder %v124_v1, 0  ;;  %v618_v16 = vsub.s32 2147483647, %v124_v1  ;;  %v138_v38 = vld [vmem:[%s3136_s0 + $0x1c8] sm:$0xff] }
  0x50   :  { %605 = vst [vmem:[#allocation15 + $0x180] sm:$0xff] %v604_v14  ;;  %vm612_vm4 = vcmp.lt.s32.totalorder %v611_v13, 32768  ;;  %v620_v18 = vadd.s32 25600, %v2796_v21  ;;  %vm626_vm5 = vcmp.lt.s32.totalorder %v126_v6, 0  ;;  %v627_v19 = vsub.s32 2147483647, %v126_v6 }
  0x51   :  { %898 = vst [vmem:[#allocation16 + $0x188] sm:$0xff] %v611_v13  ;;  %v613_v20 = vsel %vm612_vm4, %v610_v15, 2147483648  ;;  %v619_v22 = vsel %vm617_vm3, %v618_v16, %v124_v1  ;;  %v629_v23 = vadd.s32 26112, %v2796_v21  ;;  %vm635_vm6 = vcmp.lt.s32.totalorder %v128_v10, 0  ;;  %v140_v44 = vld [vmem:[%s3136_s0 + $0x1d0] sm:$0xff]  ;;  %v142_v48 = vld [vmem:[%s3136_s0 + $0x1d8] sm:$0xff] }
  0x52   :  { %614 = vst [vmem:[#allocation15 + $0x188] sm:$0xff] %v613_v20  ;;  %vm621_vm7 = vcmp.lt.s32.totalorder %v620_v18, 32768  ;;  %v628_v25 = vsel %vm626_vm5, %v627_v19, %v126_v6  ;;  %v636_v26 = vsub.s32 2147483647, %v128_v10  ;;  %v638_v27 = vadd.s32 26624, %v2796_v21  ;;  %901 = vst [vmem:[#allocation16 + $0x190] sm:$0xff] %v620_v18 }
  0x53   :  { %v622_v29 = vsel %vm621_vm7, %v619_v22, 2147483648  ;;  %vm630_vm8 = vcmp.lt.s32.totalorder %v629_v23, 32768  ;;  %vm644_vm9 = vcmp.lt.s32.totalorder %v130_v17, 0  ;;  %v645_v30 = vsub.s32 2147483647, %v130_v17  ;;  %904 = vst [vmem:[#allocation16 + $0x198] sm:$0xff] %v629_v23 }
  0x54   :  { %623 = vst [vmem:[#allocation15 + $0x190] sm:$0xff] %v622_v29  ;;  %v631_v32 = vsel %vm630_vm8, %v628_v25, 2147483648  ;;  %v637_v33 = vsel %vm635_vm6, %v636_v26, %v128_v10  ;;  %vm639_vm10 = vcmp.lt.s32.totalorder %v638_v27, 32768  ;;  %v647_v34 = vadd.s32 27136, %v2796_v21  ;;  %907 = vst [vmem:[#allocation16 + $0x1a0] sm:$0xff] %v638_v27  ;;  %v144_v51 = vld [vmem:[%s3136_s0 + $0x1e0] sm:$0xff] }
  0x55   :  { %632 = vst [vmem:[#allocation15 + $0x198] sm:$0xff] %v631_v32  ;;  %v640_v35 = vsel %vm639_vm10, %v637_v33, 2147483648  ;;  %v646_v36 = vsel %vm644_vm9, %v645_v30, %v130_v17  ;;  %vm653_vm11 = vcmp.lt.s32.totalorder %v132_v24, 0  ;;  %v654_v37 = vsub.s32 2147483647, %v132_v24  ;;  %v146_v58 = vld [vmem:[%s3136_s0 + $0x1e8] sm:$0xff] }
  0x56   :  { %641 = vst [vmem:[#allocation15 + $0x1a0] sm:$0xff] %v640_v35  ;;  %vm648_vm12 = vcmp.lt.s32.totalorder %v647_v34, 32768  ;;  %v656_v39 = vadd.s32 27648, %v2796_v21  ;;  %vm662_vm13 = vcmp.lt.s32.totalorder %v134_v28, 0  ;;  %v663_v40 = vsub.s32 2147483647, %v134_v28 }
  0x57   :  { %910 = vst [vmem:[#allocation16 + $0x1a8] sm:$0xff] %v647_v34  ;;  %v649_v41 = vsel %vm648_vm12, %v646_v36, 2147483648  ;;  %v655_v42 = vsel %vm653_vm11, %v654_v37, %v132_v24  ;;  %v665_v43 = vadd.s32 28160, %v2796_v21  ;;  %vm671_vm14 = vcmp.lt.s32.totalorder %v136_v31, 0  ;;  %v148_v0 = vld [vmem:[%s3136_s0 + $0x1f0] sm:$0xff]  ;;  %v150_v5 = vld [vmem:[%s3136_s0 + $0x1f8] sm:$0xff] }
  0x58   :  { %650 = vst [vmem:[#allocation15 + $0x1a8] sm:$0xff] %v649_v41  ;;  %vm657_vm15 = vcmp.lt.s32.totalorder %v656_v39, 32768  ;;  %v664_v45 = vsel %vm662_vm13, %v663_v40, %v134_v28  ;;  %v672_v46 = vsub.s32 2147483647, %v136_v31  ;;  %v674_v47 = vadd.s32 28672, %v2796_v21  ;;  %913 = vst [vmem:[#allocation16 + $0x1b0] sm:$0xff] %v656_v39 }
  0x59   :  { %v658_v49 = vsel %vm657_vm15, %v655_v42, 2147483648  ;;  %vm666_vm0 = vcmp.lt.s32.totalorder %v665_v43, 32768  ;;  %vm680_vm1 = vcmp.lt.s32.totalorder %v138_v38, 0  ;;  %v681_v50 = vsub.s32 2147483647, %v138_v38  ;;  %916 = vst [vmem:[#allocation16 + $0x1b8] sm:$0xff] %v665_v43 }
  0x5a   :  { %659 = vst [vmem:[#allocation15 + $0x1b0] sm:$0xff] %v658_v49  ;;  %v667_v52 = vsel %vm666_vm0, %v664_v45, 2147483648  ;;  %v673_v53 = vsel %vm671_vm14, %v672_v46, %v136_v31  ;;  %vm675_vm2 = vcmp.lt.s32.totalorder %v674_v47, 32768  ;;  %v683_v54 = vadd.s32 29184, %v2796_v21  ;;  %919 = vst [vmem:[#allocation16 + $0x1c0] sm:$0xff] %v674_v47  ;;  %v2737_v11 = vld [vmem:[#allocation16] sm:$0xff] }
  0x5b   :  { %668 = vst [vmem:[#allocation15 + $0x1b8] sm:$0xff] %v667_v52  ;;  %v676_v55 = vsel %vm675_vm2, %v673_v53, 2147483648  ;;  %v682_v56 = vsel %vm680_vm1, %v681_v50, %v138_v38  ;;  %vm689_vm3 = vcmp.lt.s32.totalorder %v140_v44, 0  ;;  %v690_v57 = vsub.s32 2147483647, %v140_v44  ;;  %s3046_s0 = smov 0  }
  0x5c   :  { %677 = vst [vmem:[#allocation15 + $0x1c0] sm:$0xff] %v676_v55  ;;  %vm684_vm4 = vcmp.lt.s32.totalorder %v683_v54, 32768  ;;  %v692_v59 = vadd.s32 29696, %v2796_v21  ;;  %vm698_vm5 = vcmp.lt.s32.totalorder %v142_v48, 0  ;;  %v699_v60 = vsub.s32 2147483647, %v142_v48 }
  0x5d   :  { %922 = vst [vmem:[#allocation16 + $0x1c8] sm:$0xff] %v683_v54  ;;  %v685_v61 = vsel %vm684_vm4, %v682_v56, 2147483648  ;;  %v691_v62 = vsel %vm689_vm3, %v690_v57, %v140_v44  ;;  %v701_v63 = vadd.s32 30208, %v2796_v21  ;;  %vm707_vm6 = vcmp.lt.s32.totalorder %v144_v51, 0 }
  0x5e   :  { %686 = vst [vmem:[#allocation15 + $0x1c8] sm:$0xff] %v685_v61  ;;  %vm693_vm7 = vcmp.lt.s32.totalorder %v692_v59, 32768  ;;  %v700_v1 = vsel %vm698_vm5, %v699_v60, %v142_v48  ;;  %v708_v3 = vsub.s32 2147483647, %v144_v51  ;;  %v710_v4 = vadd.s32 30720, %v2796_v21  ;;  %925 = vst [vmem:[#allocation16 + $0x1d0] sm:$0xff] %v692_v59 }
  0x5f   :  { %v694_v6 = vsel %vm693_vm7, %v691_v62, 2147483648  ;;  %vm702_vm8 = vcmp.lt.s32.totalorder %v701_v63, 32768  ;;  %vm716_vm9 = vcmp.lt.s32.totalorder %v146_v58, 0  ;;  %v717_v7 = vsub.s32 2147483647, %v146_v58  ;;  %928 = vst [vmem:[#allocation16 + $0x1d8] sm:$0xff] %v701_v63 }
  0x60   :  { %695 = vst [vmem:[#allocation15 + $0x1d0] sm:$0xff] %v694_v6  ;;  %v703_v8 = vsel %vm702_vm8, %v700_v1, 2147483648  ;;  %v709_v10 = vsel %vm707_vm6, %v708_v3, %v144_v51  ;;  %vm711_vm10 = vcmp.lt.s32.totalorder %v710_v4, 32768  ;;  %v719_v12 = vadd.s32 31232, %v2737_v11  ;;  %931 = vst [vmem:[#allocation16 + $0x1e0] sm:$0xff] %v710_v4 }
  0x61   :  { %704 = vst [vmem:[#allocation15 + $0x1d8] sm:$0xff] %v703_v8  ;;  %v712_v21 = vsel %vm711_vm10, %v709_v10, 2147483648  ;;  %v718_v13 = vsel %vm716_vm9, %v717_v7, %v146_v58  ;;  %vm725_vm11 = vcmp.lt.s32.totalorder %v148_v0, 0  ;;  %v726_v14 = vsub.s32 2147483647, %v148_v0 }
  0x62   :  { %713 = vst [vmem:[#allocation15 + $0x1e0] sm:$0xff] %v712_v21  ;;  %vm720_vm12 = vcmp.lt.s32.totalorder %v719_v12, 32768  ;;  %v728_v15 = vadd.s32 31744, %v2737_v11  ;;  %vm734_vm13 = vcmp.lt.s32.totalorder %v150_v5, 0  ;;  %v735_v16 = vsub.s32 2147483647, %v150_v5 }
  0x63   :  { %934 = vst [vmem:[#allocation16 + $0x1e8] sm:$0xff] %v719_v12  ;;  %v721_v17 = vsel %vm720_vm12, %v718_v13, 2147483648  ;;  %v727_v18 = vsel %vm725_vm11, %v726_v14, %v148_v0  ;;  %v737_v19 = vadd.s32 32256, %v2737_v11 }
  0x64   :  { %722 = vst [vmem:[#allocation15 + $0x1e8] sm:$0xff] %v721_v17  ;;  %vm729_vm14 = vcmp.lt.s32.totalorder %v728_v15, 32768  ;;  %v736_v20 = vsel %vm734_vm13, %v735_v16, %v150_v5  ;;  %937 = vst [vmem:[#allocation16 + $0x1f0] sm:$0xff] %v728_v15 }
  0x65   :  { %v730_v22 = vsel %vm729_vm14, %v727_v18, 2147483648  ;;  %vm738_vm15 = vcmp.lt.s32.totalorder %v737_v19, 32768  ;;  %940 = vst [vmem:[#allocation16 + $0x1f8] sm:$0xff] %v737_v19 }
  0x66   :  { %731 = vst [vmem:[#allocation15 + $0x1f0] sm:$0xff] %v730_v22  ;;  %v739_v23 = vsel %vm738_vm15, %v736_v20, 2147483648 }
  0x67   :  { %740 = vst [vmem:[#allocation15 + $0x1f8] sm:$0xff] %v739_v23 }
  0x68 LB: > { %v951_v24 = vld [vmem:[#allocation15] sm:$0xff]  ;;  %v955_v26 = vld [vmem:[#allocation15 + $0x8] sm:$0xff]  ;;  %v968_v28 = vld [vmem:[#allocation15 + $0x10] sm:$0xff]  ;;  %s2083_s25 = scalar_lea.vmem [#allocation12], %s2744_s0  ;;  %s2085_s26 = scalar_lea.vmem [#allocation14], %s2744_s0  ;;  %s2744_s0 = sphi %s3046_s0, %s950_s0  }
  0x69   : > { %v952_v25 = vld [vmem:[#allocation16] sm:$0xff]  ;;  %v957_v27 = vld [vmem:[#allocation16 + $0x8] sm:$0xff]  ;;  %vm959_vm0 = vcmp.gt.s32.totalorder %v955_v26, %v951_v24  ;;  %vm960_vm1 = vcmp.eq.s32.totalorder %v955_v26, %v951_v24  ;;  %v970_v29 = vld [vmem:[#allocation16 + $0x10] sm:$0xff]  ;;  %s950_s0 = sadd.s32 1, %s2744_s0  }
  0x6a   : > { %vm961_vm2 = vcmp.lt.s32.totalorder %v957_v27, %v952_v25  ;;  %v981_v32 = vld [vmem:[#allocation15 + $0x18] sm:$0xff]  ;;  %v994_v36 = vld [vmem:[#allocation15 + $0x20] sm:$0xff]  ;;  %v1007_v40 = vld [vmem:[#allocation15 + $0x28] sm:$0xff]  ;;  %p947_p2 = scmp.ge.s32.totalorder %s950_s0, 8  }
  0x6b   : > { %vm962_vm3 = vmand %vm960_vm1, %vm961_vm2  ;;  %v983_v33 = vld [vmem:[#allocation16 + $0x18] sm:$0xff]  ;;  %v996_v37 = vld [vmem:[#allocation16 + $0x20] sm:$0xff] }
  0x6c   : > { %vm963_vm4 = vmor %vm959_vm0, %vm962_vm3  ;;  %v1009_v41 = vld [vmem:[#allocation16 + $0x28] sm:$0xff]  ;;  %v1020_v44 = vld [vmem:[#allocation15 + $0x30] sm:$0xff] }
  0x6d   : > { %v964_v30 = vsel %vm963_vm4, %v955_v26, %v951_v24  ;;  %v965_v31 = vsel %vm963_vm4, %v957_v27, %v952_v25  ;;  %v1022_v45 = vld [vmem:[#allocation16 + $0x30] sm:$0xff]  ;;  %v1033_v48 = vld [vmem:[#allocation15 + $0x38] sm:$0xff]  ;;  %v1046_v52 = vld [vmem:[#allocation15 + $0x40] sm:$0xff] }
  0x6e   : > { %vm972_vm5 = vcmp.gt.s32.totalorder %v968_v28, %v964_v30  ;;  %vm973_vm6 = vcmp.eq.s32.totalorder %v968_v28, %v964_v30  ;;  %vm974_vm7 = vcmp.lt.s32.totalorder %v970_v29, %v965_v31  ;;  %v1035_v49 = vld [vmem:[#allocation16 + $0x38] sm:$0xff]  ;;  %v1048_v53 = vld [vmem:[#allocation16 + $0x40] sm:$0xff]  ;;  %v1059_v56 = vld [vmem:[#allocation15 + $0x48] sm:$0xff] }
  0x6f   : > { %vm975_vm8 = vmand %vm973_vm6, %vm974_vm7  ;;  %v1061_v57 = vld [vmem:[#allocation16 + $0x48] sm:$0xff]  ;;  %v1072_v60 = vld [vmem:[#allocation15 + $0x50] sm:$0xff] }
  0x70   : > { %vm976_vm9 = vmor %vm972_vm5, %vm975_vm8  ;;  %v1074_v61 = vld [vmem:[#allocation16 + $0x50] sm:$0xff]  ;;  %v1085_v0 = vld [vmem:[#allocation15 + $0x58] sm:$0xff] }
  0x71   : > { %v977_v34 = vsel %vm976_vm9, %v968_v28, %v964_v30  ;;  %v978_v35 = vsel %vm976_vm9, %v970_v29, %v965_v31  ;;  %v1087_v1 = vld [vmem:[#allocation16 + $0x58] sm:$0xff]  ;;  %v1098_v5 = vld [vmem:[#allocation15 + $0x60] sm:$0xff]  ;;  %v1111_v10 = vld [vmem:[#allocation15 + $0x68] sm:$0xff] }
  0x72   : > { %vm985_vm10 = vcmp.gt.s32.totalorder %v981_v32, %v977_v34  ;;  %vm986_vm11 = vcmp.eq.s32.totalorder %v981_v32, %v977_v34  ;;  %vm987_vm12 = vcmp.lt.s32.totalorder %v983_v33, %v978_v35  ;;  %v1100_v6 = vld [vmem:[#allocation16 + $0x60] sm:$0xff]  ;;  %v1113_v11 = vld [vmem:[#allocation16 + $0x68] sm:$0xff]  ;;  %v1124_v13 = vld [vmem:[#allocation15 + $0x70] sm:$0xff] }
  0x73   : > { %vm988_vm13 = vmand %vm986_vm11, %vm987_vm12  ;;  %v1126_v14 = vld [vmem:[#allocation16 + $0x70] sm:$0xff]  ;;  %v1137_v17 = vld [vmem:[#allocation15 + $0x78] sm:$0xff] }
  0x74   : > { %vm989_vm14 = vmor %vm985_vm10, %vm988_vm13  ;;  %v1139_v18 = vld [vmem:[#allocation16 + $0x78] sm:$0xff]  ;;  %v1150_v22 = vld [vmem:[#allocation15 + $0x80] sm:$0xff] }
  0x75   : > { %v990_v38 = vsel %vm989_vm14, %v981_v32, %v977_v34  ;;  %v991_v39 = vsel %vm989_vm14, %v983_v33, %v978_v35  ;;  %v1152_v23 = vld [vmem:[#allocation16 + $0x80] sm:$0xff]  ;;  %v1163_v26 = vld [vmem:[#allocation15 + $0x88] sm:$0xff]  ;;  %v1176_v30 = vld [vmem:[#allocation15 + $0x90] sm:$0xff] }
  0x76   : > { %vm998_vm15 = vcmp.gt.s32.totalorder %v994_v36, %v990_v38  ;;  %vm999_vm0 = vcmp.eq.s32.totalorder %v994_v36, %v990_v38  ;;  %vm1000_vm1 = vcmp.lt.s32.totalorder %v996_v37, %v991_v39  ;;  %v1165_v27 = vld [vmem:[#allocation16 + $0x88] sm:$0xff]  ;;  %v1178_v31 = vld [vmem:[#allocation16 + $0x90] sm:$0xff]  ;;  %v1189_v34 = vld [vmem:[#allocation15 + $0x98] sm:$0xff] }
  0x77   : > { %vm1001_vm2 = vmand %vm999_vm0, %vm1000_vm1  ;;  %v1191_v35 = vld [vmem:[#allocation16 + $0x98] sm:$0xff] }
  0x78   : > { %vm1002_vm3 = vmor %vm998_vm15, %vm1001_vm2 }
  0x79   : > { %v1003_v42 = vsel %vm1002_vm3, %v994_v36, %v990_v38  ;;  %v1004_v43 = vsel %vm1002_vm3, %v996_v37, %v991_v39  ;;  %v1202_v38 = vld [vmem:[#allocation15 + $0xa0] sm:$0xff] }
  0x7a   : > { %vm1011_vm4 = vcmp.gt.s32.totalorder %v1007_v40, %v1003_v42  ;;  %vm1012_vm5 = vcmp.eq.s32.totalorder %v1007_v40, %v1003_v42  ;;  %vm1013_vm6 = vcmp.lt.s32.totalorder %v1009_v41, %v1004_v43  ;;  %v1204_v39 = vld [vmem:[#allocation16 + $0xa0] sm:$0xff] }
  0x7b   : > { %vm1014_vm7 = vmand %vm1012_vm5, %vm1013_vm6 }
  0x7c   : > { %vm1015_vm8 = vmor %vm1011_vm4, %vm1014_vm7 }
  0x7d   : > { %v1016_v46 = vsel %vm1015_vm8, %v1007_v40, %v1003_v42  ;;  %v1017_v47 = vsel %vm1015_vm8, %v1009_v41, %v1004_v43  ;;  %v1215_v42 = vld [vmem:[#allocation15 + $0xa8] sm:$0xff] }
  0x7e   : > { %vm1024_vm9 = vcmp.gt.s32.totalorder %v1020_v44, %v1016_v46  ;;  %vm1025_vm10 = vcmp.eq.s32.totalorder %v1020_v44, %v1016_v46  ;;  %vm1026_vm11 = vcmp.lt.s32.totalorder %v1022_v45, %v1017_v47  ;;  %v1217_v43 = vld [vmem:[#allocation16 + $0xa8] sm:$0xff] }
  0x7f   : > { %vm1027_vm12 = vmand %vm1025_vm10, %vm1026_vm11 }
  0x80   : > { %vm1028_vm13 = vmor %vm1024_vm9, %vm1027_vm12 }
  0x81   : > { %v1029_v50 = vsel %vm1028_vm13, %v1020_v44, %v1016_v46  ;;  %v1030_v51 = vsel %vm1028_vm13, %v1022_v45, %v1017_v47  ;;  %v1228_v46 = vld [vmem:[#allocation15 + $0xb0] sm:$0xff] }
  0x82   : > { %vm1037_vm14 = vcmp.gt.s32.totalorder %v1033_v48, %v1029_v50  ;;  %vm1038_vm15 = vcmp.eq.s32.totalorder %v1033_v48, %v1029_v50  ;;  %vm1039_vm0 = vcmp.lt.s32.totalorder %v1035_v49, %v1030_v51  ;;  %v1230_v47 = vld [vmem:[#allocation16 + $0xb0] sm:$0xff] }
  0x83   : > { %vm1040_vm1 = vmand %vm1038_vm15, %vm1039_vm0 }
  0x84   : > { %vm1041_vm2 = vmor %vm1037_vm14, %vm1040_vm1 }
  0x85   : > { %v1042_v54 = vsel %vm1041_vm2, %v1033_v48, %v1029_v50  ;;  %v1043_v55 = vsel %vm1041_vm2, %v1035_v49, %v1030_v51  ;;  %v1241_v50 = vld [vmem:[#allocation15 + $0xb8] sm:$0xff] }
  0x86   : > { %vm1050_vm3 = vcmp.gt.s32.totalorder %v1046_v52, %v1042_v54  ;;  %vm1051_vm4 = vcmp.eq.s32.totalorder %v1046_v52, %v1042_v54  ;;  %vm1052_vm5 = vcmp.lt.s32.totalorder %v1048_v53, %v1043_v55  ;;  %v1243_v51 = vld [vmem:[#allocation16 + $0xb8] sm:$0xff] }
  0x87   : > { %vm1053_vm6 = vmand %vm1051_vm4, %vm1052_vm5 }
  0x88   : > { %vm1054_vm7 = vmor %vm1050_vm3, %vm1053_vm6 }
  0x89   : > { %v1055_v58 = vsel %vm1054_vm7, %v1046_v52, %v1042_v54  ;;  %v1056_v59 = vsel %vm1054_vm7, %v1048_v53, %v1043_v55  ;;  %v1254_v54 = vld [vmem:[#allocation15 + $0xc0] sm:$0xff] }
  0x8a   : > { %vm1063_vm8 = vcmp.gt.s32.totalorder %v1059_v56, %v1055_v58  ;;  %vm1064_vm9 = vcmp.eq.s32.totalorder %v1059_v56, %v1055_v58  ;;  %vm1065_vm10 = vcmp.lt.s32.totalorder %v1061_v57, %v1056_v59  ;;  %v1256_v55 = vld [vmem:[#allocation16 + $0xc0] sm:$0xff] }
  0x8b   : > { %vm1066_vm11 = vmand %vm1064_vm9, %vm1065_vm10 }
  0x8c   : > { %vm1067_vm12 = vmor %vm1063_vm8, %vm1066_vm11 }
  0x8d   : > { %v1068_v62 = vsel %vm1067_vm12, %v1059_v56, %v1055_v58  ;;  %v1069_v63 = vsel %vm1067_vm12, %v1061_v57, %v1056_v59  ;;  %v1267_v58 = vld [vmem:[#allocation15 + $0xc8] sm:$0xff] }
  0x8e   : > { %vm1076_vm13 = vcmp.gt.s32.totalorder %v1072_v60, %v1068_v62  ;;  %vm1077_vm14 = vcmp.eq.s32.totalorder %v1072_v60, %v1068_v62  ;;  %vm1078_vm15 = vcmp.lt.s32.totalorder %v1074_v61, %v1069_v63  ;;  %v1269_v59 = vld [vmem:[#allocation16 + $0xc8] sm:$0xff] }
  0x8f   : > { %vm1079_vm0 = vmand %vm1077_vm14, %vm1078_vm15 }
  0x90   : > { %vm1080_vm1 = vmor %vm1076_vm13, %vm1079_vm0 }
  0x91   : > { %v1081_v3 = vsel %vm1080_vm1, %v1072_v60, %v1068_v62  ;;  %v1082_v4 = vsel %vm1080_vm1, %v1074_v61, %v1069_v63  ;;  %v1280_v62 = vld [vmem:[#allocation15 + $0xd0] sm:$0xff] }
  0x92   : > { %vm1089_vm2 = vcmp.gt.s32.totalorder %v1085_v0, %v1081_v3  ;;  %vm1090_vm3 = vcmp.eq.s32.totalorder %v1085_v0, %v1081_v3  ;;  %vm1091_vm4 = vcmp.lt.s32.totalorder %v1087_v1, %v1082_v4  ;;  %v1282_v63 = vld [vmem:[#allocation16 + $0xd0] sm:$0xff] }
  0x93   : > { %vm1092_vm5 = vmand %vm1090_vm3, %vm1091_vm4 }
  0x94   : > { %vm1093_vm6 = vmor %vm1089_vm2, %vm1092_vm5 }
  0x95   : > { %v1094_v7 = vsel %vm1093_vm6, %v1085_v0, %v1081_v3  ;;  %v1095_v8 = vsel %vm1093_vm6, %v1087_v1, %v1082_v4  ;;  %v1293_v3 = vld [vmem:[#allocation15 + $0xd8] sm:$0xff] }
  0x96   : > { %vm1102_vm7 = vcmp.gt.s32.totalorder %v1098_v5, %v1094_v7  ;;  %vm1103_vm8 = vcmp.eq.s32.totalorder %v1098_v5, %v1094_v7  ;;  %vm1104_vm9 = vcmp.lt.s32.totalorder %v1100_v6, %v1095_v8  ;;  %v1295_v4 = vld [vmem:[#allocation16 + $0xd8] sm:$0xff] }
  0x97   : > { %vm1105_vm10 = vmand %vm1103_vm8, %vm1104_vm9 }
  0x98   : > { %vm1106_vm11 = vmor %vm1102_vm7, %vm1105_vm10 }
  0x99   : > { %v1107_v12 = vsel %vm1106_vm11, %v1098_v5, %v1094_v7  ;;  %v1108_v21 = vsel %vm1106_vm11, %v1100_v6, %v1095_v8  ;;  %v1306_v7 = vld [vmem:[#allocation15 + $0xe0] sm:$0xff] }
  0x9a   : > { %vm1115_vm12 = vcmp.gt.s32.totalorder %v1111_v10, %v1107_v12  ;;  %vm1116_vm13 = vcmp.eq.s32.totalorder %v1111_v10, %v1107_v12  ;;  %vm1117_vm14 = vcmp.lt.s32.totalorder %v1113_v11, %v1108_v21  ;;  %v1308_v8 = vld [vmem:[#allocation16 + $0xe0] sm:$0xff] }
  0x9b   : > { %vm1118_vm15 = vmand %vm1116_vm13, %vm1117_vm14 }
  0x9c   : > { %vm1119_vm0 = vmor %vm1115_vm12, %vm1118_vm15 }
  0x9d   : > { %v1120_v15 = vsel %vm1119_vm0, %v1111_v10, %v1107_v12  ;;  %v1121_v16 = vsel %vm1119_vm0, %v1113_v11, %v1108_v21  ;;  %v1319_v12 = vld [vmem:[#allocation15 + $0xe8] sm:$0xff] }
  0x9e   : > { %vm1128_vm1 = vcmp.gt.s32.totalorder %v1124_v13, %v1120_v15  ;;  %vm1129_vm2 = vcmp.eq.s32.totalorder %v1124_v13, %v1120_v15  ;;  %vm1130_vm3 = vcmp.lt.s32.totalorder %v1126_v14, %v1121_v16  ;;  %v1321_v21 = vld [vmem:[#allocation16 + $0xe8] sm:$0xff] }
  0x9f   : > { %vm1131_vm4 = vmand %vm1129_vm2, %vm1130_vm3 }
  0xa0   : > { %vm1132_vm5 = vmor %vm1128_vm1, %vm1131_vm4 }
  0xa1   : > { %v1133_v19 = vsel %vm1132_vm5, %v1124_v13, %v1120_v15  ;;  %v1134_v20 = vsel %vm1132_vm5, %v1126_v14, %v1121_v16  ;;  %v1332_v15 = vld [vmem:[#allocation15 + $0xf0] sm:$0xff] }
  0xa2   : > { %vm1141_vm6 = vcmp.gt.s32.totalorder %v1137_v17, %v1133_v19  ;;  %vm1142_vm7 = vcmp.eq.s32.totalorder %v1137_v17, %v1133_v19  ;;  %vm1143_vm8 = vcmp.lt.s32.totalorder %v1139_v18, %v1134_v20  ;;  %v1334_v16 = vld [vmem:[#allocation16 + $0xf0] sm:$0xff] }
  0xa3   : > { %vm1144_vm9 = vmand %vm1142_vm7, %vm1143_vm8 }
  0xa4   : > { %vm1145_vm10 = vmor %vm1141_vm6, %vm1144_vm9 }
  0xa5   : > { %v1146_v24 = vsel %vm1145_vm10, %v1137_v17, %v1133_v19  ;;  %v1147_v25 = vsel %vm1145_vm10, %v1139_v18, %v1134_v20  ;;  %v1345_v19 = vld [vmem:[#allocation15 + $0xf8] sm:$0xff] }
  0xa6   : > { %vm1154_vm11 = vcmp.gt.s32.totalorder %v1150_v22, %v1146_v24  ;;  %vm1155_vm12 = vcmp.eq.s32.totalorder %v1150_v22, %v1146_v24  ;;  %vm1156_vm13 = vcmp.lt.s32.totalorder %v1152_v23, %v1147_v25  ;;  %v1347_v20 = vld [vmem:[#allocation16 + $0xf8] sm:$0xff] }
  0xa7   : > { %vm1157_vm14 = vmand %vm1155_vm12, %vm1156_vm13 }
  0xa8   : > { %vm1158_vm15 = vmor %vm1154_vm11, %vm1157_vm14 }
  0xa9   : > { %v1159_v28 = vsel %vm1158_vm15, %v1150_v22, %v1146_v24  ;;  %v1160_v29 = vsel %vm1158_vm15, %v1152_v23, %v1147_v25  ;;  %v1358_v24 = vld [vmem:[#allocation15 + $0x100] sm:$0xff] }
  0xaa   : > { %vm1167_vm0 = vcmp.gt.s32.totalorder %v1163_v26, %v1159_v28  ;;  %vm1168_vm1 = vcmp.eq.s32.totalorder %v1163_v26, %v1159_v28  ;;  %vm1169_vm2 = vcmp.lt.s32.totalorder %v1165_v27, %v1160_v29  ;;  %v1360_v25 = vld [vmem:[#allocation16 + $0x100] sm:$0xff] }
  0xab   : > { %vm1170_vm3 = vmand %vm1168_vm1, %vm1169_vm2 }
  0xac   : > { %vm1171_vm4 = vmor %vm1167_vm0, %vm1170_vm3 }
  0xad   : > { %v1172_v32 = vsel %vm1171_vm4, %v1163_v26, %v1159_v28  ;;  %v1173_v33 = vsel %vm1171_vm4, %v1165_v27, %v1160_v29  ;;  %v1371_v28 = vld [vmem:[#allocation15 + $0x108] sm:$0xff] }
  0xae   : > { %vm1180_vm5 = vcmp.gt.s32.totalorder %v1176_v30, %v1172_v32  ;;  %vm1181_vm6 = vcmp.eq.s32.totalorder %v1176_v30, %v1172_v32  ;;  %vm1182_vm7 = vcmp.lt.s32.totalorder %v1178_v31, %v1173_v33  ;;  %v1373_v29 = vld [vmem:[#allocation16 + $0x108] sm:$0xff] }
  0xaf   : > { %vm1183_vm8 = vmand %vm1181_vm6, %vm1182_vm7 }
  0xb0   : > { %vm1184_vm9 = vmor %vm1180_vm5, %vm1183_vm8 }
  0xb1   : > { %v1185_v36 = vsel %vm1184_vm9, %v1176_v30, %v1172_v32  ;;  %v1186_v37 = vsel %vm1184_vm9, %v1178_v31, %v1173_v33  ;;  %v1384_v32 = vld [vmem:[#allocation15 + $0x110] sm:$0xff] }
  0xb2   : > { %vm1193_vm10 = vcmp.gt.s32.totalorder %v1189_v34, %v1185_v36  ;;  %vm1194_vm11 = vcmp.eq.s32.totalorder %v1189_v34, %v1185_v36  ;;  %vm1195_vm12 = vcmp.lt.s32.totalorder %v1191_v35, %v1186_v37  ;;  %v1386_v33 = vld [vmem:[#allocation16 + $0x110] sm:$0xff] }
  0xb3   : > { %vm1196_vm13 = vmand %vm1194_vm11, %vm1195_vm12 }
  0xb4   : > { %vm1197_vm14 = vmor %vm1193_vm10, %vm1196_vm13 }
  0xb5   : > { %v1198_v40 = vsel %vm1197_vm14, %v1189_v34, %v1185_v36  ;;  %v1199_v41 = vsel %vm1197_vm14, %v1191_v35, %v1186_v37  ;;  %v1397_v36 = vld [vmem:[#allocation15 + $0x118] sm:$0xff] }
  0xb6   : > { %vm1206_vm15 = vcmp.gt.s32.totalorder %v1202_v38, %v1198_v40  ;;  %vm1207_vm0 = vcmp.eq.s32.totalorder %v1202_v38, %v1198_v40  ;;  %vm1208_vm1 = vcmp.lt.s32.totalorder %v1204_v39, %v1199_v41  ;;  %v1399_v37 = vld [vmem:[#allocation16 + $0x118] sm:$0xff] }
  0xb7   : > { %vm1209_vm2 = vmand %vm1207_vm0, %vm1208_vm1 }
  0xb8   : > { %vm1210_vm3 = vmor %vm1206_vm15, %vm1209_vm2 }
  0xb9   : > { %v1211_v44 = vsel %vm1210_vm3, %v1202_v38, %v1198_v40  ;;  %v1212_v45 = vsel %vm1210_vm3, %v1204_v39, %v1199_v41  ;;  %v1410_v40 = vld [vmem:[#allocation15 + $0x120] sm:$0xff] }
  0xba   : > { %vm1219_vm4 = vcmp.gt.s32.totalorder %v1215_v42, %v1211_v44  ;;  %vm1220_vm5 = vcmp.eq.s32.totalorder %v1215_v42, %v1211_v44  ;;  %vm1221_vm6 = vcmp.lt.s32.totalorder %v1217_v43, %v1212_v45  ;;  %v1412_v41 = vld [vmem:[#allocation16 + $0x120] sm:$0xff] }
  0xbb   : > { %vm1222_vm7 = vmand %vm1220_vm5, %vm1221_vm6 }
  0xbc   : > { %vm1223_vm8 = vmor %vm1219_vm4, %vm1222_vm7 }
  0xbd   : > { %v1224_v48 = vsel %vm1223_vm8, %v1215_v42, %v1211_v44  ;;  %v1225_v49 = vsel %vm1223_vm8, %v1217_v43, %v1212_v45  ;;  %v1423_v44 = vld [vmem:[#allocation15 + $0x128] sm:$0xff] }
  0xbe   : > { %vm1232_vm9 = vcmp.gt.s32.totalorder %v1228_v46, %v1224_v48  ;;  %vm1233_vm10 = vcmp.eq.s32.totalorder %v1228_v46, %v1224_v48  ;;  %vm1234_vm11 = vcmp.lt.s32.totalorder %v1230_v47, %v1225_v49  ;;  %v1425_v45 = vld [vmem:[#allocation16 + $0x128] sm:$0xff] }
  0xbf   : > { %vm1235_vm12 = vmand %vm1233_vm10, %vm1234_vm11 }
  0xc0   : > { %vm1236_vm13 = vmor %vm1232_vm9, %vm1235_vm12 }
  0xc1   : > { %v1237_v52 = vsel %vm1236_vm13, %v1228_v46, %v1224_v48  ;;  %v1238_v53 = vsel %vm1236_vm13, %v1230_v47, %v1225_v49  ;;  %v1436_v48 = vld [vmem:[#allocation15 + $0x130] sm:$0xff] }
  0xc2   : > { %vm1245_vm14 = vcmp.gt.s32.totalorder %v1241_v50, %v1237_v52  ;;  %vm1246_vm15 = vcmp.eq.s32.totalorder %v1241_v50, %v1237_v52  ;;  %vm1247_vm0 = vcmp.lt.s32.totalorder %v1243_v51, %v1238_v53  ;;  %v1438_v49 = vld [vmem:[#allocation16 + $0x130] sm:$0xff] }
  0xc3   : > { %vm1248_vm1 = vmand %vm1246_vm15, %vm1247_vm0 }
  0xc4   : > { %vm1249_vm2 = vmor %vm1245_vm14, %vm1248_vm1 }
  0xc5   : > { %v1250_v56 = vsel %vm1249_vm2, %v1241_v50, %v1237_v52  ;;  %v1251_v57 = vsel %vm1249_vm2, %v1243_v51, %v1238_v53  ;;  %v1449_v52 = vld [vmem:[#allocation15 + $0x138] sm:$0xff] }
  0xc6   : > { %vm1258_vm3 = vcmp.gt.s32.totalorder %v1254_v54, %v1250_v56  ;;  %vm1259_vm4 = vcmp.eq.s32.totalorder %v1254_v54, %v1250_v56  ;;  %vm1260_vm5 = vcmp.lt.s32.totalorder %v1256_v55, %v1251_v57  ;;  %v1451_v53 = vld [vmem:[#allocation16 + $0x138] sm:$0xff] }
  0xc7   : > { %vm1261_vm6 = vmand %vm1259_vm4, %vm1260_vm5 }
  0xc8   : > { %vm1262_vm7 = vmor %vm1258_vm3, %vm1261_vm6 }
  0xc9   : > { %v1263_v60 = vsel %vm1262_vm7, %v1254_v54, %v1250_v56  ;;  %v1264_v61 = vsel %vm1262_vm7, %v1256_v55, %v1251_v57  ;;  %v1462_v56 = vld [vmem:[#allocation15 + $0x140] sm:$0xff] }
  0xca   : > { %vm1271_vm8 = vcmp.gt.s32.totalorder %v1267_v58, %v1263_v60  ;;  %vm1272_vm9 = vcmp.eq.s32.totalorder %v1267_v58, %v1263_v60  ;;  %vm1273_vm10 = vcmp.lt.s32.totalorder %v1269_v59, %v1264_v61  ;;  %v1464_v57 = vld [vmem:[#allocation16 + $0x140] sm:$0xff] }
  0xcb   : > { %vm1274_vm11 = vmand %vm1272_vm9, %vm1273_vm10 }
  0xcc   : > { %vm1275_vm12 = vmor %vm1271_vm8, %vm1274_vm11 }
  0xcd   : > { %v1276_v0 = vsel %vm1275_vm12, %v1267_v58, %v1263_v60  ;;  %v1277_v1 = vsel %vm1275_vm12, %v1269_v59, %v1264_v61  ;;  %v1475_v60 = vld [vmem:[#allocation15 + $0x148] sm:$0xff] }
  0xce   : > { %vm1284_vm13 = vcmp.gt.s32.totalorder %v1280_v62, %v1276_v0  ;;  %vm1285_vm14 = vcmp.eq.s32.totalorder %v1280_v62, %v1276_v0  ;;  %vm1286_vm15 = vcmp.lt.s32.totalorder %v1282_v63, %v1277_v1  ;;  %v1477_v61 = vld [vmem:[#allocation16 + $0x148] sm:$0xff] }
  0xcf   : > { %vm1287_vm0 = vmand %vm1285_vm14, %vm1286_vm15 }
  0xd0   : > { %vm1288_vm1 = vmor %vm1284_vm13, %vm1287_vm0 }
  0xd1   : > { %v1289_v5 = vsel %vm1288_vm1, %v1280_v62, %v1276_v0  ;;  %v1290_v6 = vsel %vm1288_vm1, %v1282_v63, %v1277_v1  ;;  %v1488_v0 = vld [vmem:[#allocation15 + $0x150] sm:$0xff] }
  0xd2   : > { %vm1297_vm2 = vcmp.gt.s32.totalorder %v1293_v3, %v1289_v5  ;;  %vm1298_vm3 = vcmp.eq.s32.totalorder %v1293_v3, %v1289_v5  ;;  %vm1299_vm4 = vcmp.lt.s32.totalorder %v1295_v4, %v1290_v6  ;;  %v1490_v1 = vld [vmem:[#allocation16 + $0x150] sm:$0xff] }
  0xd3   : > { %vm1300_vm5 = vmand %vm1298_vm3, %vm1299_vm4 }
  0xd4   : > { %vm1301_vm6 = vmor %vm1297_vm2, %vm1300_vm5 }
  0xd5   : > { %v1302_v10 = vsel %vm1301_vm6, %v1293_v3, %v1289_v5  ;;  %v1303_v11 = vsel %vm1301_vm6, %v1295_v4, %v1290_v6  ;;  %v1501_v5 = vld [vmem:[#allocation15 + $0x158] sm:$0xff] }
  0xd6   : > { %vm1310_vm7 = vcmp.gt.s32.totalorder %v1306_v7, %v1302_v10  ;;  %vm1311_vm8 = vcmp.eq.s32.totalorder %v1306_v7, %v1302_v10  ;;  %vm1312_vm9 = vcmp.lt.s32.totalorder %v1308_v8, %v1303_v11  ;;  %v1503_v6 = vld [vmem:[#allocation16 + $0x158] sm:$0xff] }
  0xd7   : > { %vm1313_vm10 = vmand %vm1311_vm8, %vm1312_vm9 }
  0xd8   : > { %vm1314_vm11 = vmor %vm1310_vm7, %vm1313_vm10 }
  0xd9   : > { %v1315_v13 = vsel %vm1314_vm11, %v1306_v7, %v1302_v10  ;;  %v1316_v14 = vsel %vm1314_vm11, %v1308_v8, %v1303_v11  ;;  %v1514_v10 = vld [vmem:[#allocation15 + $0x160] sm:$0xff] }
  0xda   : > { %vm1323_vm12 = vcmp.gt.s32.totalorder %v1319_v12, %v1315_v13  ;;  %vm1324_vm13 = vcmp.eq.s32.totalorder %v1319_v12, %v1315_v13  ;;  %vm1325_vm14 = vcmp.lt.s32.totalorder %v1321_v21, %v1316_v14  ;;  %v1516_v11 = vld [vmem:[#allocation16 + $0x160] sm:$0xff] }
  0xdb   : > { %vm1326_vm15 = vmand %vm1324_vm13, %vm1325_vm14 }
  0xdc   : > { %vm1327_vm0 = vmor %vm1323_vm12, %vm1326_vm15 }
  0xdd   : > { %v1328_v17 = vsel %vm1327_vm0, %v1319_v12, %v1315_v13  ;;  %v1329_v18 = vsel %vm1327_vm0, %v1321_v21, %v1316_v14  ;;  %v1527_v13 = vld [vmem:[#allocation15 + $0x168] sm:$0xff] }
  0xde   : > { %vm1336_vm1 = vcmp.gt.s32.totalorder %v1332_v15, %v1328_v17  ;;  %vm1337_vm2 = vcmp.eq.s32.totalorder %v1332_v15, %v1328_v17  ;;  %vm1338_vm3 = vcmp.lt.s32.totalorder %v1334_v16, %v1329_v18  ;;  %v1529_v14 = vld [vmem:[#allocation16 + $0x168] sm:$0xff] }
  0xdf   : > { %vm1339_vm4 = vmand %vm1337_vm2, %vm1338_vm3 }
  0xe0   : > { %vm1340_vm5 = vmor %vm1336_vm1, %vm1339_vm4 }
  0xe1   : > { %v1341_v22 = vsel %vm1340_vm5, %v1332_v15, %v1328_v17  ;;  %v1342_v23 = vsel %vm1340_vm5, %v1334_v16, %v1329_v18  ;;  %v1540_v17 = vld [vmem:[#allocation15 + $0x170] sm:$0xff] }
  0xe2   : > { %vm1349_vm6 = vcmp.gt.s32.totalorder %v1345_v19, %v1341_v22  ;;  %vm1350_vm7 = vcmp.eq.s32.totalorder %v1345_v19, %v1341_v22  ;;  %vm1351_vm8 = vcmp.lt.s32.totalorder %v1347_v20, %v1342_v23  ;;  %v1542_v18 = vld [vmem:[#allocation16 + $0x170] sm:$0xff] }
  0xe3   : > { %vm1352_vm9 = vmand %vm1350_vm7, %vm1351_vm8 }
  0xe4   : > { %vm1353_vm10 = vmor %vm1349_vm6, %vm1352_vm9 }
  0xe5   : > { %v1354_v26 = vsel %vm1353_vm10, %v1345_v19, %v1341_v22  ;;  %v1355_v27 = vsel %vm1353_vm10, %v1347_v20, %v1342_v23  ;;  %v1553_v22 = vld [vmem:[#allocation15 + $0x178] sm:$0xff] }
  0xe6   : > { %vm1362_vm11 = vcmp.gt.s32.totalorder %v1358_v24, %v1354_v26  ;;  %vm1363_vm12 = vcmp.eq.s32.totalorder %v1358_v24, %v1354_v26  ;;  %vm1364_vm13 = vcmp.lt.s32.totalorder %v1360_v25, %v1355_v27  ;;  %v1555_v23 = vld [vmem:[#allocation16 + $0x178] sm:$0xff] }
  0xe7   : > { %vm1365_vm14 = vmand %vm1363_vm12, %vm1364_vm13 }
  0xe8   : > { %vm1366_vm15 = vmor %vm1362_vm11, %vm1365_vm14 }
  0xe9   : > { %v1367_v30 = vsel %vm1366_vm15, %v1358_v24, %v1354_v26  ;;  %v1368_v31 = vsel %vm1366_vm15, %v1360_v25, %v1355_v27  ;;  %v1566_v26 = vld [vmem:[#allocation15 + $0x180] sm:$0xff] }
  0xea   : > { %vm1375_vm0 = vcmp.gt.s32.totalorder %v1371_v28, %v1367_v30  ;;  %vm1376_vm1 = vcmp.eq.s32.totalorder %v1371_v28, %v1367_v30  ;;  %vm1377_vm2 = vcmp.lt.s32.totalorder %v1373_v29, %v1368_v31  ;;  %v1568_v27 = vld [vmem:[#allocation16 + $0x180] sm:$0xff] }
  0xeb   : > { %vm1378_vm3 = vmand %vm1376_vm1, %vm1377_vm2 }
  0xec   : > { %vm1379_vm4 = vmor %vm1375_vm0, %vm1378_vm3 }
  0xed   : > { %v1380_v34 = vsel %vm1379_vm4, %v1371_v28, %v1367_v30  ;;  %v1381_v35 = vsel %vm1379_vm4, %v1373_v29, %v1368_v31  ;;  %v1579_v30 = vld [vmem:[#allocation15 + $0x188] sm:$0xff] }
  0xee   : > { %vm1388_vm5 = vcmp.gt.s32.totalorder %v1384_v32, %v1380_v34  ;;  %vm1389_vm6 = vcmp.eq.s32.totalorder %v1384_v32, %v1380_v34  ;;  %vm1390_vm7 = vcmp.lt.s32.totalorder %v1386_v33, %v1381_v35  ;;  %v1581_v31 = vld [vmem:[#allocation16 + $0x188] sm:$0xff] }
  0xef   : > { %vm1391_vm8 = vmand %vm1389_vm6, %vm1390_vm7 }
  0xf0   : > { %vm1392_vm9 = vmor %vm1388_vm5, %vm1391_vm8 }
  0xf1   : > { %v1393_v38 = vsel %vm1392_vm9, %v1384_v32, %v1380_v34  ;;  %v1394_v39 = vsel %vm1392_vm9, %v1386_v33, %v1381_v35  ;;  %v1592_v34 = vld [vmem:[#allocation15 + $0x190] sm:$0xff] }
  0xf2   : > { %vm1401_vm10 = vcmp.gt.s32.totalorder %v1397_v36, %v1393_v38  ;;  %vm1402_vm11 = vcmp.eq.s32.totalorder %v1397_v36, %v1393_v38  ;;  %vm1403_vm12 = vcmp.lt.s32.totalorder %v1399_v37, %v1394_v39  ;;  %v1594_v35 = vld [vmem:[#allocation16 + $0x190] sm:$0xff] }
  0xf3   : > { %vm1404_vm13 = vmand %vm1402_vm11, %vm1403_vm12 }
  0xf4   : > { %vm1405_vm14 = vmor %vm1401_vm10, %vm1404_vm13 }
  0xf5   : > { %v1406_v42 = vsel %vm1405_vm14, %v1397_v36, %v1393_v38  ;;  %v1407_v43 = vsel %vm1405_vm14, %v1399_v37, %v1394_v39  ;;  %v1605_v38 = vld [vmem:[#allocation15 + $0x198] sm:$0xff] }
  0xf6   : > { %vm1414_vm15 = vcmp.gt.s32.totalorder %v1410_v40, %v1406_v42  ;;  %vm1415_vm0 = vcmp.eq.s32.totalorder %v1410_v40, %v1406_v42  ;;  %vm1416_vm1 = vcmp.lt.s32.totalorder %v1412_v41, %v1407_v43  ;;  %v1607_v39 = vld [vmem:[#allocation16 + $0x198] sm:$0xff] }
  0xf7   : > { %vm1417_vm2 = vmand %vm1415_vm0, %vm1416_vm1 }
  0xf8   : > { %vm1418_vm3 = vmor %vm1414_vm15, %vm1417_vm2 }
  0xf9   : > { %v1419_v46 = vsel %vm1418_vm3, %v1410_v40, %v1406_v42  ;;  %v1420_v47 = vsel %vm1418_vm3, %v1412_v41, %v1407_v43  ;;  %v1618_v42 = vld [vmem:[#allocation15 + $0x1a0] sm:$0xff] }
  0xfa   : > { %vm1427_vm4 = vcmp.gt.s32.totalorder %v1423_v44, %v1419_v46  ;;  %vm1428_vm5 = vcmp.eq.s32.totalorder %v1423_v44, %v1419_v46  ;;  %vm1429_vm6 = vcmp.lt.s32.totalorder %v1425_v45, %v1420_v47  ;;  %v1620_v43 = vld [vmem:[#allocation16 + $0x1a0] sm:$0xff] }
  0xfb   : > { %vm1430_vm7 = vmand %vm1428_vm5, %vm1429_vm6 }
  0xfc   : > { %vm1431_vm8 = vmor %vm1427_vm4, %vm1430_vm7 }
  0xfd   : > { %v1432_v50 = vsel %vm1431_vm8, %v1423_v44, %v1419_v46  ;;  %v1433_v51 = vsel %vm1431_vm8, %v1425_v45, %v1420_v47  ;;  %v1631_v46 = vld [vmem:[#allocation15 + $0x1a8] sm:$0xff] }
  0xfe   : > { %vm1440_vm9 = vcmp.gt.s32.totalorder %v1436_v48, %v1432_v50  ;;  %vm1441_vm10 = vcmp.eq.s32.totalorder %v1436_v48, %v1432_v50  ;;  %vm1442_vm11 = vcmp.lt.s32.totalorder %v1438_v49, %v1433_v51  ;;  %v1633_v47 = vld [vmem:[#allocation16 + $0x1a8] sm:$0xff] }
  0xff   : > { %vm1443_vm12 = vmand %vm1441_vm10, %vm1442_vm11 }
 0x100   : > { %vm1444_vm13 = vmor %vm1440_vm9, %vm1443_vm12 }
 0x101   : > { %v1445_v54 = vsel %vm1444_vm13, %v1436_v48, %v1432_v50  ;;  %v1446_v55 = vsel %vm1444_vm13, %v1438_v49, %v1433_v51  ;;  %v1644_v50 = vld [vmem:[#allocation15 + $0x1b0] sm:$0xff] }
 0x102   : > { %vm1453_vm14 = vcmp.gt.s32.totalorder %v1449_v52, %v1445_v54  ;;  %vm1454_vm15 = vcmp.eq.s32.totalorder %v1449_v52, %v1445_v54  ;;  %vm1455_vm0 = vcmp.lt.s32.totalorder %v1451_v53, %v1446_v55  ;;  %v1646_v51 = vld [vmem:[#allocation16 + $0x1b0] sm:$0xff] }
 0x103   : > { %vm1456_vm1 = vmand %vm1454_vm15, %vm1455_vm0 }
 0x104   : > { %vm1457_vm2 = vmor %vm1453_vm14, %vm1456_vm1 }
 0x105   : > { %v1458_v58 = vsel %vm1457_vm2, %v1449_v52, %v1445_v54  ;;  %v1459_v59 = vsel %vm1457_vm2, %v1451_v53, %v1446_v55  ;;  %v1657_v54 = vld [vmem:[#allocation15 + $0x1b8] sm:$0xff] }
 0x106   : > { %vm1466_vm3 = vcmp.gt.s32.totalorder %v1462_v56, %v1458_v58  ;;  %vm1467_vm4 = vcmp.eq.s32.totalorder %v1462_v56, %v1458_v58  ;;  %vm1468_vm5 = vcmp.lt.s32.totalorder %v1464_v57, %v1459_v59  ;;  %v1659_v55 = vld [vmem:[#allocation16 + $0x1b8] sm:$0xff] }
 0x107   : > { %vm1469_vm6 = vmand %vm1467_vm4, %vm1468_vm5 }
 0x108   : > { %vm1470_vm7 = vmor %vm1466_vm3, %vm1469_vm6 }
 0x109   : > { %v1471_v62 = vsel %vm1470_vm7, %v1462_v56, %v1458_v58  ;;  %v1472_v63 = vsel %vm1470_vm7, %v1464_v57, %v1459_v59  ;;  %v1670_v58 = vld [vmem:[#allocation15 + $0x1c0] sm:$0xff] }
 0x10a   : > { %vm1479_vm8 = vcmp.gt.s32.totalorder %v1475_v60, %v1471_v62  ;;  %vm1480_vm9 = vcmp.eq.s32.totalorder %v1475_v60, %v1471_v62  ;;  %vm1481_vm10 = vcmp.lt.s32.totalorder %v1477_v61, %v1472_v63  ;;  %v1672_v59 = vld [vmem:[#allocation16 + $0x1c0] sm:$0xff] }
 0x10b   : > { %vm1482_vm11 = vmand %vm1480_vm9, %vm1481_vm10 }
 0x10c   : > { %vm1483_vm12 = vmor %vm1479_vm8, %vm1482_vm11 }
 0x10d   : > { %v1484_v3 = vsel %vm1483_vm12, %v1475_v60, %v1471_v62  ;;  %v1485_v4 = vsel %vm1483_vm12, %v1477_v61, %v1472_v63  ;;  %v1683_v62 = vld [vmem:[#allocation15 + $0x1c8] sm:$0xff] }
 0x10e   : > { %vm1492_vm13 = vcmp.gt.s32.totalorder %v1488_v0, %v1484_v3  ;;  %vm1493_vm14 = vcmp.eq.s32.totalorder %v1488_v0, %v1484_v3  ;;  %vm1494_vm15 = vcmp.lt.s32.totalorder %v1490_v1, %v1485_v4  ;;  %v1685_v63 = vld [vmem:[#allocation16 + $0x1c8] sm:$0xff] }
 0x10f   : > { %vm1495_vm0 = vmand %vm1493_vm14, %vm1494_vm15 }
 0x110   : > { %vm1496_vm1 = vmor %vm1492_vm13, %vm1495_vm0 }
 0x111   : > { %v1497_v7 = vsel %vm1496_vm1, %v1488_v0, %v1484_v3  ;;  %v1498_v8 = vsel %vm1496_vm1, %v1490_v1, %v1485_v4  ;;  %v1696_v3 = vld [vmem:[#allocation15 + $0x1d0] sm:$0xff] }
 0x112   : > { %vm1505_vm2 = vcmp.gt.s32.totalorder %v1501_v5, %v1497_v7  ;;  %vm1506_vm3 = vcmp.eq.s32.totalorder %v1501_v5, %v1497_v7  ;;  %vm1507_vm4 = vcmp.lt.s32.totalorder %v1503_v6, %v1498_v8  ;;  %v1698_v4 = vld [vmem:[#allocation16 + $0x1d0] sm:$0xff] }
 0x113   : > { %vm1508_vm5 = vmand %vm1506_vm3, %vm1507_vm4 }
 0x114   : > { %vm1509_vm6 = vmor %vm1505_vm2, %vm1508_vm5 }
 0x115   : > { %v1510_v12 = vsel %vm1509_vm6, %v1501_v5, %v1497_v7  ;;  %v1511_v21 = vsel %vm1509_vm6, %v1503_v6, %v1498_v8  ;;  %v1709_v7 = vld [vmem:[#allocation15 + $0x1d8] sm:$0xff] }
 0x116   : > { %vm1518_vm7 = vcmp.gt.s32.totalorder %v1514_v10, %v1510_v12  ;;  %vm1519_vm8 = vcmp.eq.s32.totalorder %v1514_v10, %v1510_v12  ;;  %vm1520_vm9 = vcmp.lt.s32.totalorder %v1516_v11, %v1511_v21  ;;  %v1711_v8 = vld [vmem:[#allocation16 + $0x1d8] sm:$0xff] }
 0x117   : > { %vm1521_vm10 = vmand %vm1519_vm8, %vm1520_vm9 }
 0x118   : > { %vm1522_vm11 = vmor %vm1518_vm7, %vm1521_vm10 }
 0x119   : > { %v1523_v15 = vsel %vm1522_vm11, %v1514_v10, %v1510_v12  ;;  %v1524_v16 = vsel %vm1522_vm11, %v1516_v11, %v1511_v21  ;;  %v1722_v12 = vld [vmem:[#allocation15 + $0x1e0] sm:$0xff] }
 0x11a   : > { %vm1531_vm12 = vcmp.gt.s32.totalorder %v1527_v13, %v1523_v15  ;;  %vm1532_vm13 = vcmp.eq.s32.totalorder %v1527_v13, %v1523_v15  ;;  %vm1533_vm14 = vcmp.lt.s32.totalorder %v1529_v14, %v1524_v16  ;;  %v1724_v21 = vld [vmem:[#allocation16 + $0x1e0] sm:$0xff] }
 0x11b   : > { %vm1534_vm15 = vmand %vm1532_vm13, %vm1533_vm14 }
 0x11c   : > { %vm1535_vm0 = vmor %vm1531_vm12, %vm1534_vm15 }
 0x11d   : > { %v1536_v19 = vsel %vm1535_vm0, %v1527_v13, %v1523_v15  ;;  %v1537_v20 = vsel %vm1535_vm0, %v1529_v14, %v1524_v16  ;;  %v1735_v15 = vld [vmem:[#allocation15 + $0x1e8] sm:$0xff] }
 0x11e   : > { %vm1544_vm1 = vcmp.gt.s32.totalorder %v1540_v17, %v1536_v19  ;;  %vm1545_vm2 = vcmp.eq.s32.totalorder %v1540_v17, %v1536_v19  ;;  %vm1546_vm3 = vcmp.lt.s32.totalorder %v1542_v18, %v1537_v20  ;;  %v1737_v16 = vld [vmem:[#allocation16 + $0x1e8] sm:$0xff] }
 0x11f   : > { %vm1547_vm4 = vmand %vm1545_vm2, %vm1546_vm3 }
 0x120   : > { %vm1548_vm5 = vmor %vm1544_vm1, %vm1547_vm4 }
 0x121   : > { %v1549_v24 = vsel %vm1548_vm5, %v1540_v17, %v1536_v19  ;;  %v1550_v25 = vsel %vm1548_vm5, %v1542_v18, %v1537_v20  ;;  %v1748_v19 = vld [vmem:[#allocation15 + $0x1f0] sm:$0xff] }
 0x122   : > { %vm1557_vm6 = vcmp.gt.s32.totalorder %v1553_v22, %v1549_v24  ;;  %vm1558_vm7 = vcmp.eq.s32.totalorder %v1553_v22, %v1549_v24  ;;  %vm1559_vm8 = vcmp.lt.s32.totalorder %v1555_v23, %v1550_v25  ;;  %v1750_v20 = vld [vmem:[#allocation16 + $0x1f0] sm:$0xff] }
 0x123   : > { %vm1560_vm9 = vmand %vm1558_vm7, %vm1559_vm8 }
 0x124   : > { %vm1561_vm10 = vmor %vm1557_vm6, %vm1560_vm9 }
 0x125   : > { %v1562_v28 = vsel %vm1561_vm10, %v1553_v22, %v1549_v24  ;;  %v1563_v29 = vsel %vm1561_vm10, %v1555_v23, %v1550_v25  ;;  %v1761_v24 = vld [vmem:[#allocation15 + $0x1f8] sm:$0xff] }
 0x126   : > { %vm1570_vm11 = vcmp.gt.s32.totalorder %v1566_v26, %v1562_v28  ;;  %vm1571_vm12 = vcmp.eq.s32.totalorder %v1566_v26, %v1562_v28  ;;  %vm1572_vm13 = vcmp.lt.s32.totalorder %v1568_v27, %v1563_v29  ;;  %v1763_v25 = vld [vmem:[#allocation16 + $0x1f8] sm:$0xff] }
 0x127   : > { %vm1573_vm14 = vmand %vm1571_vm12, %vm1572_vm13 }
 0x128   : > { %vm1574_vm15 = vmor %vm1570_vm11, %vm1573_vm14 }
 0x129   : > { %v1575_v32 = vsel %vm1574_vm15, %v1566_v26, %v1562_v28  ;;  %v1576_v33 = vsel %vm1574_vm15, %v1568_v27, %v1563_v29 }
 0x12a   : > { %vm1583_vm0 = vcmp.gt.s32.totalorder %v1579_v30, %v1575_v32  ;;  %vm1584_vm1 = vcmp.eq.s32.totalorder %v1579_v30, %v1575_v32  ;;  %vm1585_vm2 = vcmp.lt.s32.totalorder %v1581_v31, %v1576_v33 }
 0x12b   : > { %vm1586_vm3 = vmand %vm1584_vm1, %vm1585_vm2 }
 0x12c   : > { %vm1587_vm4 = vmor %vm1583_vm0, %vm1586_vm3 }
 0x12d   : > { %v1588_v36 = vsel %vm1587_vm4, %v1579_v30, %v1575_v32  ;;  %v1589_v37 = vsel %vm1587_vm4, %v1581_v31, %v1576_v33 }
 0x12e   : > { %vm1596_vm5 = vcmp.gt.s32.totalorder %v1592_v34, %v1588_v36  ;;  %vm1597_vm6 = vcmp.eq.s32.totalorder %v1592_v34, %v1588_v36  ;;  %vm1598_vm7 = vcmp.lt.s32.totalorder %v1594_v35, %v1589_v37 }
 0x12f   : > { %vm1599_vm8 = vmand %vm1597_vm6, %vm1598_vm7 }
 0x130   : > { %vm1600_vm9 = vmor %vm1596_vm5, %vm1599_vm8 }
 0x131   : > { %v1601_v40 = vsel %vm1600_vm9, %v1592_v34, %v1588_v36  ;;  %v1602_v41 = vsel %vm1600_vm9, %v1594_v35, %v1589_v37 }
 0x132   : > { %vm1609_vm10 = vcmp.gt.s32.totalorder %v1605_v38, %v1601_v40  ;;  %vm1610_vm11 = vcmp.eq.s32.totalorder %v1605_v38, %v1601_v40  ;;  %vm1611_vm12 = vcmp.lt.s32.totalorder %v1607_v39, %v1602_v41 }
 0x133   : > { %vm1612_vm13 = vmand %vm1610_vm11, %vm1611_vm12 }
 0x134   : > { %vm1613_vm14 = vmor %vm1609_vm10, %vm1612_vm13 }
 0x135   : > { %v1614_v44 = vsel %vm1613_vm14, %v1605_v38, %v1601_v40  ;;  %v1615_v45 = vsel %vm1613_vm14, %v1607_v39, %v1602_v41 }
 0x136   : > { %vm1622_vm15 = vcmp.gt.s32.totalorder %v1618_v42, %v1614_v44  ;;  %vm1623_vm0 = vcmp.eq.s32.totalorder %v1618_v42, %v1614_v44  ;;  %vm1624_vm1 = vcmp.lt.s32.totalorder %v1620_v43, %v1615_v45 }
 0x137   : > { %vm1625_vm2 = vmand %vm1623_vm0, %vm1624_vm1 }
 0x138   : > { %vm1626_vm3 = vmor %vm1622_vm15, %vm1625_vm2 }
 0x139   : > { %v1627_v48 = vsel %vm1626_vm3, %v1618_v42, %v1614_v44  ;;  %v1628_v49 = vsel %vm1626_vm3, %v1620_v43, %v1615_v45 }
 0x13a   : > { %vm1635_vm4 = vcmp.gt.s32.totalorder %v1631_v46, %v1627_v48  ;;  %vm1636_vm5 = vcmp.eq.s32.totalorder %v1631_v46, %v1627_v48  ;;  %vm1637_vm6 = vcmp.lt.s32.totalorder %v1633_v47, %v1628_v49 }
 0x13b   : > { %vm1638_vm7 = vmand %vm1636_vm5, %vm1637_vm6 }
 0x13c   : > { %vm1639_vm8 = vmor %vm1635_vm4, %vm1638_vm7 }
 0x13d   : > { %v1640_v52 = vsel %vm1639_vm8, %v1631_v46, %v1627_v48  ;;  %v1641_v53 = vsel %vm1639_vm8, %v1633_v47, %v1628_v49 }
 0x13e   : > { %vm1648_vm9 = vcmp.gt.s32.totalorder %v1644_v50, %v1640_v52  ;;  %vm1649_vm10 = vcmp.eq.s32.totalorder %v1644_v50, %v1640_v52  ;;  %vm1650_vm11 = vcmp.lt.s32.totalorder %v1646_v51, %v1641_v53 }
 0x13f   : > { %vm1651_vm12 = vmand %vm1649_vm10, %vm1650_vm11 }
 0x140   : > { %vm1652_vm13 = vmor %vm1648_vm9, %vm1651_vm12 }
 0x141   : > { %v1653_v56 = vsel %vm1652_vm13, %v1644_v50, %v1640_v52  ;;  %v1654_v57 = vsel %vm1652_vm13, %v1646_v51, %v1641_v53 }
 0x142   : > { %vm1661_vm14 = vcmp.gt.s32.totalorder %v1657_v54, %v1653_v56  ;;  %vm1662_vm15 = vcmp.eq.s32.totalorder %v1657_v54, %v1653_v56  ;;  %vm1663_vm0 = vcmp.lt.s32.totalorder %v1659_v55, %v1654_v57 }
 0x143   : > { %vm1664_vm1 = vmand %vm1662_vm15, %vm1663_vm0 }
 0x144   : > { %vm1665_vm2 = vmor %vm1661_vm14, %vm1664_vm1 }
 0x145   : > { %v1666_v60 = vsel %vm1665_vm2, %v1657_v54, %v1653_v56  ;;  %v1667_v61 = vsel %vm1665_vm2, %v1659_v55, %v1654_v57 }
 0x146   : > { %vm1674_vm3 = vcmp.gt.s32.totalorder %v1670_v58, %v1666_v60  ;;  %vm1675_vm4 = vcmp.eq.s32.totalorder %v1670_v58, %v1666_v60  ;;  %vm1676_vm5 = vcmp.lt.s32.totalorder %v1672_v59, %v1667_v61 }
 0x147   : > { %vm1677_vm6 = vmand %vm1675_vm4, %vm1676_vm5 }
 0x148   : > { %vm1678_vm7 = vmor %vm1674_vm3, %vm1677_vm6 }
 0x149   : > { %v1679_v0 = vsel %vm1678_vm7, %v1670_v58, %v1666_v60  ;;  %v1680_v1 = vsel %vm1678_vm7, %v1672_v59, %v1667_v61 }
 0x14a   : > { %vm1687_vm8 = vcmp.gt.s32.totalorder %v1683_v62, %v1679_v0  ;;  %vm1688_vm9 = vcmp.eq.s32.totalorder %v1683_v62, %v1679_v0  ;;  %vm1689_vm10 = vcmp.lt.s32.totalorder %v1685_v63, %v1680_v1 }
 0x14b   : > { %vm1690_vm11 = vmand %vm1688_vm9, %vm1689_vm10 }
 0x14c   : > { %vm1691_vm12 = vmor %vm1687_vm8, %vm1690_vm11 }
 0x14d   : > { %v1692_v5 = vsel %vm1691_vm12, %v1683_v62, %v1679_v0  ;;  %v1693_v6 = vsel %vm1691_vm12, %v1685_v63, %v1680_v1 }
 0x14e   : > { %vm1700_vm13 = vcmp.gt.s32.totalorder %v1696_v3, %v1692_v5  ;;  %vm1701_vm14 = vcmp.eq.s32.totalorder %v1696_v3, %v1692_v5  ;;  %vm1702_vm15 = vcmp.lt.s32.totalorder %v1698_v4, %v1693_v6 }
 0x14f   : > { %vm1703_vm0 = vmand %vm1701_vm14, %vm1702_vm15 }
 0x150   : > { %vm1704_vm1 = vmor %vm1700_vm13, %vm1703_vm0 }
 0x151   : > { %v1705_v10 = vsel %vm1704_vm1, %v1696_v3, %v1692_v5  ;;  %v1706_v11 = vsel %vm1704_vm1, %v1698_v4, %v1693_v6 }
 0x152   : > { %vm1713_vm2 = vcmp.gt.s32.totalorder %v1709_v7, %v1705_v10  ;;  %vm1714_vm3 = vcmp.eq.s32.totalorder %v1709_v7, %v1705_v10  ;;  %vm1715_vm4 = vcmp.lt.s32.totalorder %v1711_v8, %v1706_v11 }
 0x153   : > { %vm1716_vm5 = vmand %vm1714_vm3, %vm1715_vm4 }
 0x154   : > { %vm1717_vm6 = vmor %vm1713_vm2, %vm1716_vm5 }
 0x155   : > { %v1718_v13 = vsel %vm1717_vm6, %v1709_v7, %v1705_v10  ;;  %v1719_v14 = vsel %vm1717_vm6, %v1711_v8, %v1706_v11 }
 0x156   : > { %vm1726_vm7 = vcmp.gt.s32.totalorder %v1722_v12, %v1718_v13  ;;  %vm1727_vm8 = vcmp.eq.s32.totalorder %v1722_v12, %v1718_v13  ;;  %vm1728_vm9 = vcmp.lt.s32.totalorder %v1724_v21, %v1719_v14 }
 0x157   : > { %vm1729_vm10 = vmand %vm1727_vm8, %vm1728_vm9 }
 0x158   : > { %vm1730_vm11 = vmor %vm1726_vm7, %vm1729_vm10 }
 0x159   : > { %v1731_v17 = vsel %vm1730_vm11, %v1722_v12, %v1718_v13  ;;  %v1732_v18 = vsel %vm1730_vm11, %v1724_v21, %v1719_v14 }
 0x15a   : > { %vm1739_vm12 = vcmp.gt.s32.totalorder %v1735_v15, %v1731_v17  ;;  %vm1740_vm13 = vcmp.eq.s32.totalorder %v1735_v15, %v1731_v17  ;;  %vm1741_vm14 = vcmp.lt.s32.totalorder %v1737_v16, %v1732_v18 }
 0x15b   : > { %vm1742_vm15 = vmand %vm1740_vm13, %vm1741_vm14 }
 0x15c   : > { %vm1743_vm0 = vmor %vm1739_vm12, %vm1742_vm15 }
 0x15d   : > { %v1744_v22 = vsel %vm1743_vm0, %v1735_v15, %v1731_v17  ;;  %v1745_v23 = vsel %vm1743_vm0, %v1737_v16, %v1732_v18 }
 0x15e   : > { %vm1752_vm1 = vcmp.gt.s32.totalorder %v1748_v19, %v1744_v22  ;;  %vm1753_vm2 = vcmp.eq.s32.totalorder %v1748_v19, %v1744_v22  ;;  %vm1754_vm3 = vcmp.lt.s32.totalorder %v1750_v20, %v1745_v23 }
 0x15f   : > { %vm1755_vm4 = vmand %vm1753_vm2, %vm1754_vm3 }
 0x160   : > { %vm1756_vm5 = vmor %vm1752_vm1, %vm1755_vm4 }
 0x161   : > { %v1757_v26 = vsel %vm1756_vm5, %v1748_v19, %v1744_v22  ;;  %v1758_v27 = vsel %vm1756_vm5, %v1750_v20, %v1745_v23 }
 0x162   : > { %vm1765_vm6 = vcmp.gt.s32.totalorder %v1761_v24, %v1757_v26  ;;  %vm1766_vm7 = vcmp.eq.s32.totalorder %v1761_v24, %v1757_v26  ;;  %vm1767_vm8 = vcmp.lt.s32.totalorder %v1763_v25, %v1758_v27 }
 0x163   : > { %vm1768_vm9 = vmand %vm1766_vm7, %vm1767_vm8 }
 0x164   : > { %vm1769_vm10 = vmor %vm1765_vm6, %vm1768_vm9 }
 0x165   : > { %v1770_v28 = vsel %vm1769_vm10, %v1761_v24, %v1757_v26  ;;  %v1771_v29 = vsel %vm1769_vm10, %v1763_v25, %v1758_v27 }
 0x166   : > { %v1773_v30 = vrot.slane %v1770_v28, 2  ;;  %v1774_v31 = vrot.slane %v1771_v29, 2 }
 0x168   : > { %vm1776_vm11 = vcmp.gt.s32.totalorder %v1773_v30, %v1770_v28  ;;  %vm1777_vm12 = vcmp.eq.s32.totalorder %v1773_v30, %v1770_v28  ;;  %vm1778_vm13 = vcmp.lt.s32.totalorder %v1774_v31, %v1771_v29 }
 0x169   : > { %vm1779_vm14 = vmand %vm1777_vm12, %vm1778_vm13 }
 0x16a   : > { %vm1780_vm15 = vmor %vm1776_vm11, %vm1779_vm14 }
 0x16b   : > { %v1781_v32 = vsel %vm1780_vm15, %v1773_v30, %v1770_v28  ;;  %v1782_v33 = vsel %vm1780_vm15, %v1774_v31, %v1771_v29 }
 0x16c   : > { %v1784_v34 = vrot.slane %v1781_v32, 2  ;;  %v1785_v35 = vrot.slane %v1782_v33, 2 }
 0x16e   : > { %vm1787_vm0 = vcmp.gt.s32.totalorder %v1784_v34, %v1781_v32  ;;  %vm1788_vm1 = vcmp.eq.s32.totalorder %v1784_v34, %v1781_v32  ;;  %vm1789_vm2 = vcmp.lt.s32.totalorder %v1785_v35, %v1782_v33 }
 0x16f   : > { %vm1790_vm3 = vmand %vm1788_vm1, %vm1789_vm2 }
 0x170   : > { %vm1791_vm4 = vmor %vm1787_vm0, %vm1790_vm3 }
 0x171   : > { %v1792_v36 = vsel %vm1791_vm4, %v1784_v34, %v1781_v32  ;;  %v1793_v37 = vsel %vm1791_vm4, %v1785_v35, %v1782_v33 }
 0x172   : > { %v1795_v38 = vrot.slane %v1792_v36, 2  ;;  %v1796_v39 = vrot.slane %v1793_v37, 2 }
 0x174   : > { %vm1798_vm5 = vcmp.gt.s32.totalorder %v1795_v38, %v1792_v36  ;;  %vm1799_vm6 = vcmp.eq.s32.totalorder %v1795_v38, %v1792_v36  ;;  %vm1800_vm7 = vcmp.lt.s32.totalorder %v1796_v39, %v1793_v37 }
 0x175   : > { %vm1801_vm8 = vmand %vm1799_vm6, %vm1800_vm7 }
 0x176   : > { %vm1802_vm9 = vmor %vm1798_vm5, %vm1801_vm8 }
 0x177   : > { %v1804_v40 = vsel %vm1802_vm9, %v1796_v39, %v1793_v37  ;;  %v1803_v41 = vsel %vm1802_vm9, %v1795_v38, %v1792_v36 }
 0x178   : > { %1838 = vxpose.xlu1.b32.start [1/16] %v1804_v40, 128  ;;  %1806 = vxpose.xlu0.b32.start [1/16] %v1803_v41, 128 }
 0x17c   : > { %1839 = vxpose.xlu1.b32.cont [2/16] %v1804_v40, 128  ;;  %1807 = vxpose.xlu0.b32.cont [2/16] %v1803_v41, 128 }
 0x180   : > { %1840 = vxpose.xlu1.b32.cont [3/16] %v1804_v40, 128  ;;  %1808 = vxpose.xlu0.b32.cont [3/16] %v1803_v41, 128 }
 0x184   : > { %1841 = vxpose.xlu1.b32.cont [4/16] %v1804_v40, 128  ;;  %1809 = vxpose.xlu0.b32.cont [4/16] %v1803_v41, 128 }
 0x188   : > { %1842 = vxpose.xlu1.b32.cont [5/16] %v1804_v40, 128  ;;  %1810 = vxpose.xlu0.b32.cont [5/16] %v1803_v41, 128 }
 0x18c   : > { %1843 = vxpose.xlu1.b32.cont [6/16] %v1804_v40, 128  ;;  %1811 = vxpose.xlu0.b32.cont [6/16] %v1803_v41, 128 }
 0x190   : > { %1844 = vxpose.xlu1.b32.cont [7/16] %v1804_v40, 128  ;;  %1812 = vxpose.xlu0.b32.cont [7/16] %v1803_v41, 128 }
 0x194   : > { %1845 = vxpose.xlu1.b32.cont [8/16] %v1804_v40, 128  ;;  %1813 = vxpose.xlu0.b32.cont [8/16] %v1803_v41, 128 }
 0x198   : > { %1846 = vxpose.xlu1.b32.cont [9/16] %v1804_v40, 128  ;;  %1814 = vxpose.xlu0.b32.cont [9/16] %v1803_v41, 128 }
 0x19c   : > { %1847 = vxpose.xlu1.b32.cont [10/16] %v1804_v40, 128  ;;  %1815 = vxpose.xlu0.b32.cont [10/16] %v1803_v41, 128 }
 0x1a0   : > { %1848 = vxpose.xlu1.b32.cont [11/16] %v1804_v40, 128  ;;  %1816 = vxpose.xlu0.b32.cont [11/16] %v1803_v41, 128 }
 0x1a4   : > { %1849 = vxpose.xlu1.b32.cont [12/16] %v1804_v40, 128  ;;  %1817 = vxpose.xlu0.b32.cont [12/16] %v1803_v41, 128 }
 0x1a8   : > { %1850 = vxpose.xlu1.b32.cont [13/16] %v1804_v40, 128  ;;  %1818 = vxpose.xlu0.b32.cont [13/16] %v1803_v41, 128 }
 0x1ac   : > { %1851 = vxpose.xlu1.b32.cont [14/16] %v1804_v40, 128  ;;  %1819 = vxpose.xlu0.b32.cont [14/16] %v1803_v41, 128 }
 0x1b0   : > { %1852 = vxpose.xlu1.b32.cont [15/16] %v1804_v40, 128  ;;  %1820 = vxpose.xlu0.b32.cont [15/16] %v1803_v41, 128 }
 0x1b4   : > { %1853 = vxpose.xlu1.b32.end [16/16] %v1804_v40, 128  ;;  %1821 = vxpose.xlu0.b32.end [16/16] %v1803_v41, 128 }
 0x1f8   : > { %v1854_v42 = vpop.trf.xlu1  ;;  %v1822_v43 = vpop.trf.xlu0 }
 0x1fc   : > { %v1855_v44 = vpop.trf.xlu1  ;;  %v1823_v45 = vpop.trf.xlu0 }
 0x1fd   : > { %vm1874_vm10 = vcmp.lt.s32.totalorder %v1855_v44, %v1854_v42  ;;  %vm1872_vm11 = vcmp.gt.s32.totalorder %v1823_v45, %v1822_v43  ;;  %vm1873_vm12 = vcmp.eq.s32.totalorder %v1823_v45, %v1822_v43 }
 0x1fe   : > { %vm1875_vm13 = vmand %vm1873_vm12, %vm1874_vm10 }
 0x1ff   : > { %vm1876_vm14 = vmor %vm1872_vm11, %vm1875_vm13 }
 0x200   : > { %v1877_v46 = vsel %vm1876_vm14, %v1823_v45, %v1822_v43  ;;  %v1856_v47 = vpop.trf.xlu1  ;;  %v1878_v48 = vsel %vm1876_vm14, %v1855_v44, %v1854_v42  ;;  %v1824_v49 = vpop.trf.xlu0 }
 0x201   : > { %vm1883_vm15 = vcmp.lt.s32.totalorder %v1856_v47, %v1878_v48  ;;  %vm1881_vm0 = vcmp.gt.s32.totalorder %v1824_v49, %v1877_v46  ;;  %vm1882_vm1 = vcmp.eq.s32.totalorder %v1824_v49, %v1877_v46 }
 0x202   : > { %vm1884_vm2 = vmand %vm1882_vm1, %vm1883_vm15 }
 0x203   : > { %vm1885_vm3 = vmor %vm1881_vm0, %vm1884_vm2 }
 0x204   : > { %v1886_v50 = vsel %vm1885_vm3, %v1824_v49, %v1877_v46  ;;  %v1857_v51 = vpop.trf.xlu1  ;;  %v1887_v52 = vsel %vm1885_vm3, %v1856_v47, %v1878_v48  ;;  %v1825_v53 = vpop.trf.xlu0 }
 0x205   : > { %vm1892_vm4 = vcmp.lt.s32.totalorder %v1857_v51, %v1887_v52  ;;  %vm1890_vm5 = vcmp.gt.s32.totalorder %v1825_v53, %v1886_v50  ;;  %vm1891_vm6 = vcmp.eq.s32.totalorder %v1825_v53, %v1886_v50 }
 0x206   : > { %vm1893_vm7 = vmand %vm1891_vm6, %vm1892_vm4 }
 0x207   : > { %vm1894_vm8 = vmor %vm1890_vm5, %vm1893_vm7 }
 0x208   : > { %v1895_v54 = vsel %vm1894_vm8, %v1825_v53, %v1886_v50  ;;  %v1858_v55 = vpop.trf.xlu1  ;;  %v1896_v56 = vsel %vm1894_vm8, %v1857_v51, %v1887_v52  ;;  %v1826_v57 = vpop.trf.xlu0 }
 0x209   : > { %vm1901_vm9 = vcmp.lt.s32.totalorder %v1858_v55, %v1896_v56  ;;  %vm1899_vm10 = vcmp.gt.s32.totalorder %v1826_v57, %v1895_v54  ;;  %vm1900_vm11 = vcmp.eq.s32.totalorder %v1826_v57, %v1895_v54 }
 0x20a   : > { %vm1902_vm12 = vmand %vm1900_vm11, %vm1901_vm9 }
 0x20b   : > { %vm1903_vm13 = vmor %vm1899_vm10, %vm1902_vm12 }
 0x20c   : > { %v1904_v58 = vsel %vm1903_vm13, %v1826_v57, %v1895_v54  ;;  %v1859_v59 = vpop.trf.xlu1  ;;  %v1905_v60 = vsel %vm1903_vm13, %v1858_v55, %v1896_v56  ;;  %v1827_v61 = vpop.trf.xlu0 }
 0x20d   : > { %vm1910_vm14 = vcmp.lt.s32.totalorder %v1859_v59, %v1905_v60  ;;  %vm1908_vm15 = vcmp.gt.s32.totalorder %v1827_v61, %v1904_v58  ;;  %vm1909_vm0 = vcmp.eq.s32.totalorder %v1827_v61, %v1904_v58 }
 0x20e   : > { %vm1911_vm1 = vmand %vm1909_vm0, %vm1910_vm14 }
 0x20f   : > { %vm1912_vm2 = vmor %vm1908_vm15, %vm1911_vm1 }
 0x210   : > { %v1913_v62 = vsel %vm1912_vm2, %v1827_v61, %v1904_v58  ;;  %v1860_v63 = vpop.trf.xlu1  ;;  %v1914_v0 = vsel %vm1912_vm2, %v1859_v59, %v1905_v60  ;;  %v1828_v1 = vpop.trf.xlu0 }
 0x211   : > { %vm1919_vm3 = vcmp.lt.s32.totalorder %v1860_v63, %v1914_v0  ;;  %vm1917_vm4 = vcmp.gt.s32.totalorder %v1828_v1, %v1913_v62  ;;  %vm1918_vm5 = vcmp.eq.s32.totalorder %v1828_v1, %v1913_v62 }
 0x212   : > { %vm1920_vm6 = vmand %vm1918_vm5, %vm1919_vm3 }
 0x213   : > { %vm1921_vm7 = vmor %vm1917_vm4, %vm1920_vm6 }
 0x214   : > { %v1922_v3 = vsel %vm1921_vm7, %v1828_v1, %v1913_v62  ;;  %v1861_v4 = vpop.trf.xlu1  ;;  %v1923_v5 = vsel %vm1921_vm7, %v1860_v63, %v1914_v0  ;;  %v1829_v6 = vpop.trf.xlu0 }
 0x215   : > { %vm1928_vm8 = vcmp.lt.s32.totalorder %v1861_v4, %v1923_v5  ;;  %vm1926_vm9 = vcmp.gt.s32.totalorder %v1829_v6, %v1922_v3  ;;  %vm1927_vm10 = vcmp.eq.s32.totalorder %v1829_v6, %v1922_v3 }
 0x216   : > { %vm1929_vm11 = vmand %vm1927_vm10, %vm1928_vm8 }
 0x217   : > { %vm1930_vm12 = vmor %vm1926_vm9, %vm1929_vm11 }
 0x218   : > { %v1931_v7 = vsel %vm1930_vm12, %v1829_v6, %v1922_v3  ;;  %v1862_v8 = vpop.trf.xlu1  ;;  %v1932_v10 = vsel %vm1930_vm12, %v1861_v4, %v1923_v5  ;;  %v1830_v11 = vpop.trf.xlu0 }
 0x219   : > { %vm1937_vm13 = vcmp.lt.s32.totalorder %v1862_v8, %v1932_v10  ;;  %vm1935_vm14 = vcmp.gt.s32.totalorder %v1830_v11, %v1931_v7  ;;  %vm1936_vm15 = vcmp.eq.s32.totalorder %v1830_v11, %v1931_v7 }
 0x21a   : > { %vm1938_vm0 = vmand %vm1936_vm15, %vm1937_vm13 }
 0x21b   : > { %vm1939_vm1 = vmor %vm1935_vm14, %vm1938_vm0 }
 0x21c   : > { %v1940_v12 = vsel %vm1939_vm1, %v1830_v11, %v1931_v7  ;;  %v1863_v21 = vpop.trf.xlu1  ;;  %v1941_v13 = vsel %vm1939_vm1, %v1862_v8, %v1932_v10  ;;  %v1831_v14 = vpop.trf.xlu0  ;;  %v2750_v11 = vmov 2147483648  }
 0x21d   : > { %vm1946_vm2 = vcmp.lt.s32.totalorder %v1863_v21, %v1941_v13  ;;  %vm1944_vm3 = vcmp.gt.s32.totalorder %v1831_v14, %v1940_v12  ;;  %vm1945_vm4 = vcmp.eq.s32.totalorder %v1831_v14, %v1940_v12 }
 0x21e   : > { %vm1947_vm5 = vmand %vm1945_vm4, %vm1946_vm2 }
 0x21f   : > { %vm1948_vm6 = vmor %vm1944_vm3, %vm1947_vm5 }
 0x220   : > { %v1949_v15 = vsel %vm1948_vm6, %v1831_v14, %v1940_v12  ;;  %v1864_v16 = vpop.trf.xlu1  ;;  %v1950_v17 = vsel %vm1948_vm6, %v1863_v21, %v1941_v13  ;;  %v1832_v18 = vpop.trf.xlu0  ;;  %v2751_v12 = vmov 2147483647  }
 0x221   : > { %vm1955_vm7 = vcmp.lt.s32.totalorder %v1864_v16, %v1950_v17  ;;  %vm1953_vm8 = vcmp.gt.s32.totalorder %v1832_v18, %v1949_v15  ;;  %vm1954_vm9 = vcmp.eq.s32.totalorder %v1832_v18, %v1949_v15 }
 0x222   : > { %vm1956_vm10 = vmand %vm1954_vm9, %vm1955_vm7 }
 0x223   : > { %vm1957_vm11 = vmor %vm1953_vm8, %vm1956_vm10 }
 0x224   : > { %v1958_v19 = vsel %vm1957_vm11, %v1832_v18, %v1949_v15  ;;  %v1865_v20 = vpop.trf.xlu1  ;;  %v1959_v22 = vsel %vm1957_vm11, %v1864_v16, %v1950_v17  ;;  %v1833_v23 = vpop.trf.xlu0  ;;  %v2181_v16 = vld [vmem:[#allocation11] sm:$0xff] (%p947_p2)  ;;  %v2182_v17 = vld [vmem:[#allocation13] sm:$0xff] (%p947_p2)  ;;  %v2752_v18 = vmov (%p947_p2), 839939668  }
 0x225   : > { %vm1964_vm12 = vcmp.lt.s32.totalorder %v1865_v20, %v1959_v22  ;;  %vm1962_vm13 = vcmp.gt.s32.totalorder %v1833_v23, %v1958_v19  ;;  %vm1963_vm14 = vcmp.eq.s32.totalorder %v1833_v23, %v1958_v19 }
 0x226   : > { %vm1965_vm15 = vmand %vm1963_vm14, %vm1964_vm12 }
 0x227   : > { %vm1966_vm0 = vmor %vm1962_vm13, %vm1965_vm15 }
 0x228   : > { %v1967_v24 = vsel %vm1966_vm0, %v1833_v23, %v1958_v19  ;;  %v1866_v25 = vpop.trf.xlu1  ;;  %v1968_v26 = vsel %vm1966_vm0, %v1865_v20, %v1959_v22  ;;  %v1834_v27 = vpop.trf.xlu0  ;;  %v2206_v19 = vunpack.c.l.s4 (%p947_p2), %v2752_v18  ;;  %v2753_v20 = vmov (%p947_p2), 1417023538  }
 0x229   : > { %vm1973_vm1 = vcmp.lt.s32.totalorder %v1866_v25, %v1968_v26  ;;  %vm1971_vm2 = vcmp.gt.s32.totalorder %v1834_v27, %v1967_v24  ;;  %vm1972_vm3 = vcmp.eq.s32.totalorder %v1834_v27, %v1967_v24  ;;  %v2234_v22 = vunpack.c.l.s4 (%p947_p2), %v2753_v20 }
 0x22a   : > { %vm1974_vm4 = vmand %vm1972_vm3, %vm1973_vm1  ;;  %v2207_v23 = vunpack.c.0.s8 (%p947_p2), %v2206_v19 }
 0x22b   : > { %vm1975_vm5 = vmor %vm1971_vm2, %vm1974_vm4 }
 0x22c   : > { %v1976_v28 = vsel %vm1975_vm5, %v1834_v27, %v1967_v24  ;;  %v1867_v29 = vpop.trf.xlu1  ;;  %v1977_v30 = vsel %vm1975_vm5, %v1866_v25, %v1968_v26  ;;  %v1835_v31 = vpop.trf.xlu0  ;;  %v2227_v27 = vand.u32 (%p947_p2), 4, %v2783_v9 }
 0x22d   : > { %vm1982_vm6 = vcmp.lt.s32.totalorder %v1867_v29, %v1977_v30  ;;  %vm1980_vm7 = vcmp.gt.s32.totalorder %v1835_v31, %v1976_v28  ;;  %vm1981_vm8 = vcmp.eq.s32.totalorder %v1835_v31, %v1976_v28 }
 0x22e   : > { %vm1983_vm9 = vmand %vm1981_vm8, %vm1982_vm6 }
 0x22f   : > { %vm1984_vm10 = vmor %vm1980_vm7, %vm1983_vm9 }
 0x230   : > { %v1985_v32 = vsel %vm1984_vm10, %v1835_v31, %v1976_v28  ;;  %v1868_v33 = vpop.trf.xlu1  ;;  %v1986_v34 = vsel %vm1984_vm10, %v1867_v29, %v1977_v30  ;;  %v1836_v35 = vpop.trf.xlu0  ;;  %v2235_v29 = vunpack.c.0.s8 (%p947_p2), %v2234_v22 }
 0x231   : > { %vm1991_vm11 = vcmp.lt.s32.totalorder %v1868_v33, %v1986_v34  ;;  %vm1989_vm12 = vcmp.gt.s32.totalorder %v1836_v35, %v1985_v32  ;;  %vm1990_vm13 = vcmp.eq.s32.totalorder %v1836_v35, %v1985_v32 }
 0x232   : > { %vm1992_vm14 = vmand %vm1990_vm13, %vm1991_vm11 }
 0x233   : > { %vm1993_vm15 = vmor %vm1989_vm12, %vm1992_vm14 }
 0x234   : > { %v1994_v36 = vsel %vm1993_vm15, %v1836_v35, %v1985_v32  ;;  %v1869_v37 = vpop.trf.xlu1  ;;  %v1995_v38 = vsel %vm1993_vm15, %v1868_v33, %v1986_v34  ;;  %v1837_v39 = vpop.trf.xlu0  ;;  %v2754_v35 = vmov (%p947_p2), 1732584193  }
 0x235   : > { %vm2000_vm0 = vcmp.lt.s32.totalorder %v1869_v37, %v1995_v38  ;;  %vm1998_vm1 = vcmp.gt.s32.totalorder %v1837_v39, %v1994_v36  ;;  %vm1999_vm2 = vcmp.eq.s32.totalorder %v1837_v39, %v1994_v36 }
 0x236   : > { %vm2001_vm3 = vmand %vm1999_vm2, %vm2000_vm0 }
 0x237   : > { %vm2002_vm4 = vmor %vm1998_vm1, %vm2001_vm3 }
 0x238   : > { %v2003_v40 = vsel %vm2002_vm4, %v1837_v39, %v1994_v36  ;;  %v2004_v41 = vsel %vm2002_vm4, %v1869_v37, %v1995_v38  ;;  %v2262_v36 = vunpack.c.l.s4 (%p947_p2), %v2754_v35  ;;  %v3071_v37 = vsub.s32 (%p947_p2), %v2235_v29, %v2783_v9 }
 0x239   : > { %v2006_v42 = vrot.slane %v2003_v40, 1  ;;  %v2007_v43 = vrot.slane %v2004_v41, 1  ;;  %v2255_v38 = vand.u32 (%p947_p2), 2, %v2783_v9 }
 0x23b   : > { %vm2009_vm5 = vcmp.gt.s32.totalorder %v2006_v42, %v2003_v40  ;;  %vm2010_vm6 = vcmp.eq.s32.totalorder %v2006_v42, %v2003_v40  ;;  %vm2011_vm7 = vcmp.lt.s32.totalorder %v2007_v43, %v2004_v41 }
 0x23c   : > { %vm2012_vm8 = vmand %vm2010_vm6, %vm2011_vm7 }
 0x23d   : > { %vm2013_vm9 = vmor %vm2009_vm5, %vm2012_vm8 }
 0x23e   : > { %v2014_v44 = vsel %vm2013_vm9, %v2006_v42, %v2003_v40  ;;  %v2015_v45 = vsel %vm2013_vm9, %v2007_v43, %v2004_v41  ;;  %v2263_v41 = vunpack.c.0.s8 (%p947_p2), %v2262_v36 }
 0x23f   : > { %v2017_v46 = vrot.slane %v2014_v44, 1  ;;  %v2018_v47 = vrot.slane %v2015_v45, 1 }
 0x241   : > { %vm2020_vm10 = vcmp.gt.s32.totalorder %v2017_v46, %v2014_v44  ;;  %vm2021_vm11 = vcmp.eq.s32.totalorder %v2017_v46, %v2014_v44  ;;  %vm2022_vm12 = vcmp.lt.s32.totalorder %v2018_v47, %v2015_v45 }
 0x242   : > { %vm2023_vm13 = vmand %vm2021_vm11, %vm2022_vm12 }
 0x243   : > { %vm2024_vm14 = vmor %vm2020_vm10, %vm2023_vm13 }
 0x244   : > { %v2025_v48 = vsel %vm2024_vm14, %v2017_v46, %v2014_v44  ;;  %v2026_v49 = vsel %vm2024_vm14, %v2018_v47, %v2015_v45  ;;  %v3085_v46 = vsub.s32 (%p947_p2), %v2263_v41, %v2783_v9 }
 0x245   : > { %v2028_v50 = vrot.slane %v2025_v48, 1  ;;  %v2029_v51 = vrot.slane %v2026_v49, 1 }
 0x247   : > { %vm2033_vm15 = vcmp.lt.s32.totalorder %v2029_v51, %v2026_v49  ;;  %vm2031_vm0 = vcmp.gt.s32.totalorder %v2028_v50, %v2025_v48  ;;  %vm2032_vm1 = vcmp.eq.s32.totalorder %v2028_v50, %v2025_v48 }
 0x248   : > { %vm2034_vm2 = vmand %vm2032_vm1, %vm2033_vm15 }
 0x249   : > { %vm2035_vm3 = vmor %vm2031_vm0, %vm2034_vm2 }
 0x24a   : > { %v2036_v52 = vsel %vm2035_vm3, %v2028_v50, %v2025_v48  ;;  %v2037_v53 = vsel %vm2035_vm3, %v2029_v51, %v2026_v49  ;;  %v2283_v50 = vand.u32 (%p947_p2), 1, %v2783_v9 }
 0x24b   : > { %v2039_v54 = vrot.slane %v2036_v52, 1  ;;  %v2040_v55 = vrot.slane %v2037_v53, 1 }
 0x24d   : > { %vm2042_vm4 = vcmp.gt.s32.totalorder %v2039_v54, %v2036_v52  ;;  %vm2043_vm5 = vcmp.eq.s32.totalorder %v2039_v54, %v2036_v52  ;;  %vm2044_vm6 = vcmp.lt.s32.totalorder %v2040_v55, %v2037_v53 }
 0x24e   : > { %vm2045_vm7 = vmand %vm2043_vm5, %vm2044_vm6 }
 0x24f   : > { %vm2046_vm8 = vmor %vm2042_vm4, %vm2045_vm7 }
 0x250   : > { %v2047_v56 = vsel %vm2046_vm8, %v2039_v54, %v2036_v52  ;;  %v2048_v57 = vsel %vm2046_vm8, %v2040_v55, %v2037_v53 }
 0x251   : > { %v2050_v58 = vrot.slane %v2047_v56, 1  ;;  %v2051_v59 = vrot.slane %v2048_v57, 1 }
 0x253   : > { %vm2053_vm9 = vcmp.gt.s32.totalorder %v2050_v58, %v2047_v56  ;;  %vm2054_vm10 = vcmp.eq.s32.totalorder %v2050_v58, %v2047_v56  ;;  %vm2055_vm11 = vcmp.lt.s32.totalorder %v2051_v59, %v2048_v57 }
 0x254   : > { %vm2056_vm12 = vmand %vm2054_vm10, %vm2055_vm11 }
 0x255   : > { %vm2057_vm13 = vmor %vm2053_vm9, %vm2056_vm12 }
 0x256   : > { %v2058_v60 = vsel %vm2057_vm13, %v2050_v58, %v2047_v56  ;;  %v2059_v61 = vsel %vm2057_vm13, %v2051_v59, %v2048_v57 }
 0x257   : > { %v2061_v62 = vrot.slane %v2058_v60, 1  ;;  %v2062_v63 = vrot.slane %v2059_v61, 1 }
 0x259   : > { %vm2064_vm14 = vcmp.gt.s32.totalorder %v2061_v62, %v2058_v60  ;;  %vm2065_vm15 = vcmp.eq.s32.totalorder %v2061_v62, %v2058_v60  ;;  %vm2066_vm0 = vcmp.lt.s32.totalorder %v2062_v63, %v2059_v61 }
 0x25a   : > { %vm2067_vm1 = vmand %vm2065_vm15, %vm2066_vm0  ;;  %vm3065_vm15 = vcmp.ne.s32.totalorder (%p947_p2), %v2227_v27, 0 }
 0x25b   : > { %vm2068_vm2 = vmor %vm2064_vm14, %vm2067_vm1 }
 0x25c   : > { %v2069_v0 = vsel %vm2068_vm2, %v2061_v62, %v2058_v60  ;;  %v2070_v1 = vsel %vm2068_vm2, %v2062_v63, %v2059_v61 }
 0x25d   : > { %v2072_v3 = vrot.slane %v2069_v0, 1  ;;  %v2073_v4 = vrot.slane %v2070_v1, 1 }
 0x25f   : > { %vm2075_vm3 = vcmp.gt.s32.totalorder %v2072_v3, %v2069_v0  ;;  %vm2076_vm4 = vcmp.eq.s32.totalorder %v2072_v3, %v2069_v0  ;;  %vm2077_vm5 = vcmp.lt.s32.totalorder %v2073_v4, %v2070_v1 }
 0x260   : > { %vm2078_vm6 = vmand %vm2076_vm4, %vm2077_vm5 }
 0x261   : > { %vm2079_vm7 = vmor %vm2075_vm3, %vm2078_vm6 }
 0x262   : > { %v2081_v5 = vsel %vm2079_vm7, %v2073_v4, %v2070_v1  ;;  %v2080_v6 = vsel %vm2079_vm7, %v2072_v3, %v2069_v0 }
 0x263   : > { %2088 = vxpose.xlu0.b32.start.end [1/1] (short) (narrow) %v2081_v5, 8  ;;  %2084 = vst [vmem:[%s2083_s25] sm:$0x1] %v2080_v6  ;;  %2086 = vst [vmem:[%s2085_s26] sm:$0x1] %v2081_v5 }
 0x26a   :  { %v2169_v14 = vld [vmem:[#allocation12 + $0x7] ss:$-1 sm:$0xff] (%p947_p2)  ;;  %v2175_v15 = vld [vmem:[#allocation14 + $0x7] ss:$-1 sm:$0xff] (%p947_p2) }
 0x26b   :  { %vm2187_vm10 = vcmp.gt.s32.totalorder (%p947_p2), %v2181_v16, %v2169_v14  ;;  %vm2188_vm11 = vcmp.eq.s32.totalorder (%p947_p2), %v2181_v16, %v2169_v14  ;;  %vm2189_vm12 = vcmp.lt.s32.totalorder (%p947_p2), %v2182_v17, %v2175_v15 }
 0x26c   :  { %vm2190_vm13 = vmand (%p947_p2), %vm2188_vm11, %vm2189_vm12  ;;  %vm3078_vm11 = vcmp.ne.s32.totalorder (%p947_p2), %v2255_v38, 0 }
 0x26d   :  { %vm2191_vm14 = vmor (%p947_p2), %vm2187_vm10, %vm2190_vm13 }
 0x26e   :  { %v2192_v24 = vsel (%p947_p2), %vm2191_vm14, %v2181_v16, %v2169_v14  ;;  %v2194_v25 = vsel (%p947_p2), %vm2191_vm14, %v2169_v14, %v2181_v16  ;;  %v2196_v26 = vsel (%p947_p2), %vm2191_vm14, %v2182_v17, %v2175_v15  ;;  %v2198_v28 = vsel (%p947_p2), %vm2191_vm14, %v2175_v15, %v2182_v17 }
 0x2e3   : > { %v2104_v7 = vpop.trf.xlu0 }
 0x2e4   : > { %v2143_v8 = vrot.slane %v2104_v7, 1  ;;  %2715 = vpush %v2104_v7 }
 0x2e6   : > { %2717 = vpush %v2143_v8 }
 0x315   : > { %s2716_s27 = spop %2715 }
 0x316   : > { %s2121_s28 = sshrl.u32 %s2716_s27, 9  ;;  %s2123_s29 = ssub.s32 0, %s2716_s27 }
 0x317   : > { %p2122_p0 = scmp.lt.s32.totalorder %s2716_s27, 0  ;;  %s2707_s30 = smin.u32 %s2716_s27, %s2123_s29 }
 0x318   : > { %s2125_s3 = sand.u32 511, %s2707_s30   ;;  %s2709_s4 = sshll.u32 %s2121_s28, 3 }
 0x319   : > { %s2126_s5 = ssub.s32 0, %s2125_s3  ;;  %s2718_s6 = spop %2717 }
 0x31a   : > { %s3146_s5 = smov (!%p2122_p0, %s2126_s5), %s2125_s3  ;;  %s2147_s10 = ssub.s32 0, %s2718_s6 }
 0x31b   : > { %s2128_s7 = sshrl.u32 %s3146_s5, 7  ;;  %s2130_s8 = sand.u32 127, %s3146_s5  }
 0x31c   : > { %s2708_s9 = sshll.u32 %s2128_s7, 8  ;;  %s2711_s12 = smin.u32 %s2718_s6, %s2147_s10 }
 0x31d   : > { %s2131_s11 = sadd.s32 %s2708_s9, %s2130_s8  ;;  %p2146_p1 = scmp.lt.s32.totalorder %s2718_s6, 0 }
 0x31e   : > { %v2133_v10 = vstv %s2131_s11  ;;  %s2149_s13 = sand.u32 511, %s2711_s12   ;;  %s2137_s15 = scalar_lea.vmem [#allocation15], %s2709_s4 }
 0x31f   : > { %vm2135_vm8 = vcmp.eq.s32.totalorder %v157_v2, %v2133_v10  ;;  %s2150_s14 = ssub.s32 0, %s2149_s13  ;;  %s2140_s16 = scalar_lea.vmem [#allocation16], %s2709_s4 }
 0x320   : > { %2138 = vst.msk [vmem:[%s2137_s15] sm:$0xff] %vm2135_vm8, %v2750_v11  ;;  %2141 = vst.msk [vmem:[%s2140_s16] sm:$0xff] %vm2135_vm8, %v2751_v12  ;;  %s3148_s14 = smov (!%p2146_p1, %s2150_s14), %s2149_s13  ;;  %s2145_s17 = sshrl.u32 %s2718_s6, 9 }
 0x321   : > { %s2152_s18 = sshrl.u32 %s3148_s14, 7  ;;  %s2154_s19 = sand.u32 127, %s3148_s14  }
 0x322   : > { %s2712_s20 = sshll.u32 %s2152_s18, 8  ;;  %s2713_s22 = sshll.u32 %s2145_s17, 3 }
 0x323   : > { %s2155_s21 = sadd.s32 %s2712_s20, %s2154_s19  ;;  %s2161_s23 = scalar_lea.vmem [#allocation15], %s2713_s22 }
 0x324   : > { %v2157_v21 = vstv %s2155_s21  ;;  %s2164_s24 = scalar_lea.vmem [#allocation16], %s2713_s22 }
 0x325   : > { %v2158_v13 = vadd.s32 128, %v2157_v21  ;;  %949 = sbr.rel (!%p947_p2) target bundleno = 104 (0x68), region = 380 }
 0x327   : > { %vm2159_vm9 = vcmp.eq.s32.totalorder %v157_v2, %v2158_v13  ;;  %v3060_v2 = vsub.s32 (%p947_p2), %v2207_v23, %v2783_v9 }
 0x328   : > { %2162 = vst.msk [vmem:[%s2161_s23] sm:$0xff] %vm2159_vm9, %v2750_v11  ;;  %2165 = vst.msk [vmem:[%s2164_s24] sm:$0xff] %vm2159_vm9, %v2751_v12 }
 0x329   :  { %v2211_v30 = vrot.slane (%p947_p2), %v2192_v24, %v3060_v2  ;;  %v2218_v31 = vrot.slane (%p947_p2), %v2196_v26, %v3060_v2  ;;  %v2392_v32 = vrot.slane (%p947_p2), %v2194_v25, %v3060_v2  ;;  %v2399_v34 = vrot.slane (%p947_p2), %v2198_v28, %v3060_v2 }
 0x32b   :  { %vm2220_vm0 = vcmp.gt.s32.totalorder (%p947_p2), %v2192_v24, %v2211_v30  ;;  %vm2221_vm1 = vcmp.eq.s32.totalorder (%p947_p2), %v2192_v24, %v2211_v30  ;;  %vm2222_vm2 = vcmp.lt.s32.totalorder (%p947_p2), %v2196_v26, %v2218_v31  ;;  %vm2402_vm4 = vcmp.eq.s32.totalorder (%p947_p2), %v2194_v25, %v2392_v32 }
 0x32c   :  { %vm2223_vm3 = vmand %vm2221_vm1, %vm2222_vm2  ;;  %vm2403_vm5 = vcmp.lt.s32.totalorder %v2198_v28, %v2399_v34  ;;  %vm2401_vm7 = vcmp.gt.s32.totalorder %v2194_v25, %v2392_v32 }
 0x32d   :  { %vm2224_vm6 = vmor %vm2220_vm0, %vm2223_vm3 }
 0x32e   :  { %vm2229_vm8 = vmxor %vm2224_vm6, %vm3065_vm15 }
 0x32f   :  { %v2230_v39 = vsel %vm2229_vm8, %v2192_v24, %v2211_v30  ;;  %v2231_v40 = vsel %vm2229_vm8, %v2196_v26, %v2218_v31  ;;  %vm2404_vm9 = vmand %vm2402_vm4, %vm2403_vm5 }
 0x330   :  { %v2239_v42 = vrot.slane %v2230_v39, %v3071_v37  ;;  %v2246_v43 = vrot.slane %v2231_v40, %v3071_v37  ;;  %vm2405_vm10 = vmor %vm2401_vm7, %vm2404_vm9 }
 0x331   :  { %vm2410_vm12 = vmxor %vm2405_vm10, %vm3065_vm15 }
 0x332   :  { %vm2248_vm13 = vcmp.gt.s32.totalorder %v2230_v39, %v2239_v42  ;;  %vm2249_vm14 = vcmp.eq.s32.totalorder %v2230_v39, %v2239_v42  ;;  %vm2250_vm0 = vcmp.lt.s32.totalorder %v2231_v40, %v2246_v43  ;;  %v2411_v45 = vsel %vm2410_vm12, %v2194_v25, %v2392_v32 }
 0x333   :  { %vm2251_vm1 = vmand %vm2249_vm14, %vm2250_vm0  ;;  %v2412_v47 = vsel %vm2410_vm12, %v2198_v28, %v2399_v34  ;;  %v2420_v48 = vrot.slane %v2411_v45, %v3071_v37 }
 0x334   :  { %vm2252_vm2 = vmor %vm2248_vm13, %vm2251_vm1  ;;  %v2427_v49 = vrot.slane %v2412_v47, %v3071_v37  ;;  %vm3094_vm13 = vcmp.ne.s32.totalorder %v2283_v50, 0 }
 0x335   :  { %vm2257_vm3 = vmxor %vm2252_vm2, %vm3078_vm11  ;;  %vm2429_vm4 = vcmp.gt.s32.totalorder %v2411_v45, %v2420_v48  ;;  %vm2430_vm5 = vcmp.eq.s32.totalorder %v2411_v45, %v2420_v48 }
 0x336   :  { %v2258_v51 = vsel %vm2257_vm3, %v2230_v39, %v2239_v42  ;;  %v2259_v52 = vsel %vm2257_vm3, %v2231_v40, %v2246_v43  ;;  %vm2431_vm6 = vcmp.lt.s32.totalorder %v2412_v47, %v2427_v49 }
 0x337   :  { %v2267_v53 = vrot.slane %v2258_v51, %v3085_v46  ;;  %v2274_v54 = vrot.slane %v2259_v52, %v3085_v46  ;;  %vm2432_vm7 = vmand %vm2430_vm5, %vm2431_vm6 }
 0x338   :  { %vm2433_vm8 = vmor %vm2429_vm4, %vm2432_vm7 }
 0x339   :  { %vm2276_vm9 = vcmp.gt.s32.totalorder %v2258_v51, %v2267_v53  ;;  %vm2277_vm10 = vcmp.eq.s32.totalorder %v2258_v51, %v2267_v53  ;;  %vm2278_vm12 = vcmp.lt.s32.totalorder %v2259_v52, %v2274_v54  ;;  %vm2438_vm14 = vmxor %vm2433_vm8, %vm3078_vm11 }
 0x33a   :  { %vm2279_vm0 = vmand %vm2277_vm10, %vm2278_vm12  ;;  %v2439_v9 = vsel %vm2438_vm14, %v2411_v45, %v2420_v48  ;;  %v2440_v56 = vsel %vm2438_vm14, %v2412_v47, %v2427_v49 }
 0x33b   :  { %vm2280_vm1 = vmor %vm2276_vm9, %vm2279_vm0  ;;  %v2448_v57 = vrot.slane %v2439_v9, %v3085_v46  ;;  %v2455_v58 = vrot.slane %v2440_v56, %v3085_v46 }
 0x33c   :  { %vm2285_vm2 = vmxor %vm2280_vm1, %vm3094_vm13 }
 0x33d   :  { %v2286_v59 = vsel %vm2285_vm2, %v2258_v51, %v2267_v53  ;;  %v2287_v60 = vsel %vm2285_vm2, %v2259_v52, %v2274_v54  ;;  %vm2457_vm3 = vcmp.gt.s32.totalorder %v2439_v9, %v2448_v57  ;;  %vm2458_vm4 = vcmp.eq.s32.totalorder %v2439_v9, %v2448_v57 }
 0x33e   :  { %v2301_v61 = vrot.slane %v2286_v59, %v3060_v2  ;;  %v2308_v62 = vrot.slane %v2287_v60, %v3060_v2  ;;  %vm2459_vm5 = vcmp.lt.s32.totalorder %v2440_v56, %v2455_v58 }
 0x33f   :  { %vm2460_vm6 = vmand %vm2458_vm4, %vm2459_vm5 }
 0x340   :  { %vm2310_vm7 = vcmp.gt.s32.totalorder %v2286_v59, %v2301_v61  ;;  %vm2311_vm8 = vcmp.eq.s32.totalorder %v2286_v59, %v2301_v61  ;;  %vm2312_vm9 = vcmp.lt.s32.totalorder %v2287_v60, %v2308_v62  ;;  %vm2461_vm10 = vmor %vm2457_vm3, %vm2460_vm6 }
 0x341   :  { %vm2313_vm12 = vmand %vm2311_vm8, %vm2312_vm9 }
 0x342   :  { %vm2314_vm14 = vmor %vm2310_vm7, %vm2313_vm12 }
 0x343   :  { %vm2319_vm0 = vmxor %vm2314_vm14, %vm3065_vm15 }
 0x344   :  { %v2320_v63 = vsel %vm2319_vm0, %v2286_v59, %v2301_v61  ;;  %v2321_v0 = vsel %vm2319_vm0, %v2287_v60, %v2308_v62  ;;  %vm2466_vm1 = vmxor %vm2461_vm10, %vm3094_vm13 }
 0x345   :  { %v2329_v1 = vrot.slane %v2320_v63, %v3071_v37  ;;  %v2336_v3 = vrot.slane %v2321_v0, %v3071_v37  ;;  %v2467_v4 = vsel %vm2466_vm1, %v2439_v9, %v2448_v57  ;;  %v2468_v5 = vsel %vm2466_vm1, %v2440_v56, %v2455_v58 }
 0x346   :  { %v2482_v6 = vrot.slane %v2467_v4, %v3060_v2  ;;  %v2489_v7 = vrot.slane %v2468_v5, %v3060_v2 }
 0x347   :  { %vm2338_vm2 = vcmp.gt.s32.totalorder %v2320_v63, %v2329_v1  ;;  %vm2339_vm3 = vcmp.eq.s32.totalorder %v2320_v63, %v2329_v1  ;;  %vm2340_vm4 = vcmp.lt.s32.totalorder %v2321_v0, %v2336_v3 }
 0x348   :  { %vm2341_vm5 = vmand %vm2339_vm3, %vm2340_vm4  ;;  %vm2492_vm6 = vcmp.eq.s32.totalorder %v2467_v4, %v2482_v6  ;;  %vm2493_vm7 = vcmp.lt.s32.totalorder %v2468_v5, %v2489_v7  ;;  %vm2491_vm9 = vcmp.gt.s32.totalorder %v2467_v4, %v2482_v6 }
 0x349   :  { %vm2342_vm8 = vmor %vm2338_vm2, %vm2341_vm5 }
 0x34a   :  { %vm2347_vm10 = vmxor %vm2342_vm8, %vm3078_vm11 }
 0x34b   :  { %v2348_v8 = vsel %vm2347_vm10, %v2320_v63, %v2329_v1  ;;  %v2349_v10 = vsel %vm2347_vm10, %v2321_v0, %v2336_v3  ;;  %vm2494_vm12 = vmand %vm2492_vm6, %vm2493_vm7 }
 0x34c   :  { %v2357_v11 = vrot.slane %v2348_v8, %v3085_v46  ;;  %v2364_v12 = vrot.slane %v2349_v10, %v3085_v46  ;;  %vm2495_vm14 = vmor %vm2491_vm9, %vm2494_vm12 }
 0x34d   :  { %vm2500_vm0 = vmxor %vm2495_vm14, %vm3065_vm15 }
 0x34e   :  { %vm2366_vm1 = vcmp.gt.s32.totalorder %v2348_v8, %v2357_v11  ;;  %vm2367_vm3 = vcmp.eq.s32.totalorder %v2348_v8, %v2357_v11  ;;  %vm2368_vm4 = vcmp.lt.s32.totalorder %v2349_v10, %v2364_v12  ;;  %v2501_v21 = vsel %vm2500_vm0, %v2467_v4, %v2482_v6 }
 0x34f   :  { %vm2369_vm2 = vmand %vm2367_vm3, %vm2368_vm4  ;;  %v2502_v13 = vsel %vm2500_vm0, %v2468_v5, %v2489_v7  ;;  %v2510_v14 = vrot.slane %v2501_v21, %v3071_v37 }
 0x350   :  { %vm2370_vm5 = vmor %vm2366_vm1, %vm2369_vm2  ;;  %v2517_v15 = vrot.slane %v2502_v13, %v3071_v37 }
 0x351   :  { %vm2375_vm6 = vmxor %vm2370_vm5, %vm3094_vm13  ;;  %vm2519_vm7 = vcmp.gt.s32.totalorder %v2501_v21, %v2510_v14  ;;  %vm2520_vm8 = vcmp.eq.s32.totalorder %v2501_v21, %v2510_v14 }
 0x352   :  { %v2376_v16 = vsel %vm2375_vm6, %v2348_v8, %v2357_v11  ;;  %v2377_v17 = vsel %vm2375_vm6, %v2349_v10, %v2364_v12  ;;  %vm2521_vm9 = vcmp.lt.s32.totalorder %v2502_v13, %v2517_v15 }
 0x353   :  { %2379 = vst [vmem:[#allocation11] sm:$0xff] %v2376_v16  ;;  %2380 = vst [vmem:[#allocation13] sm:$0xff] %v2377_v17 }
 0x354   :  { %vm2522_vm15 = vmand %vm2520_vm8, %vm2521_vm9 }
 0x355   :  { %vm2523_vm10 = vmor %vm2519_vm7, %vm2522_vm15 }
 0x356   :  { %vm2528_vm12 = vmxor %vm2523_vm10, %vm3078_vm11 }
 0x357   :  { %v2529_v18 = vsel %vm2528_vm12, %v2501_v21, %v2510_v14  ;;  %v2530_v19 = vsel %vm2528_vm12, %v2502_v13, %v2517_v15 }
 0x358   :  { %v2538_v20 = vrot.slane %v2529_v18, %v3085_v46  ;;  %v2545_v22 = vrot.slane %v2530_v19, %v3085_v46 }
 0x35a   :  { %vm2547_vm14 = vcmp.gt.s32.totalorder %v2529_v18, %v2538_v20  ;;  %vm2548_vm0 = vcmp.eq.s32.totalorder %v2529_v18, %v2538_v20  ;;  %vm2549_vm1 = vcmp.lt.s32.totalorder %v2530_v19, %v2545_v22  ;;  %v2563_v25 = vld [vmem:[#allocation11] sm:$0xff]  ;;  %v2587_v28 = vld [vmem:[#allocation13] sm:$0xff] }
 0x35b   :  { %vm2550_vm3 = vmand %vm2548_vm0, %vm2549_vm1  ;;  %vm2564_vm11 = vcmp.lt.s32.totalorder %v2563_v25, 0  ;;  %v2565_v26 = vsub.s32 2147483647, %v2563_v25 }
 0x35c   :  { %vm2551_vm4 = vmor %vm2547_vm14, %vm2550_vm3 }
 0x35d   :  { %vm2556_vm2 = vmxor %vm2551_vm4, %vm3094_vm13  ;;  %v2566_v27 = vsel %vm2564_vm11, %v2565_v26, %v2563_v25 }
 0x35e   :  { %v2557_v23 = vsel %vm2556_vm2, %v2529_v18, %v2538_v20  ;;  %v2558_v24 = vsel %vm2556_vm2, %v2530_v19, %v2545_v22  ;;  %2567 = vst [vmem:[#allocation11] sm:$0xff] %v2566_v27  ;;  %2569 = vxpose.xlu0.b32.start.end [1/1] (short) (narrow) %v2566_v27, 8 }
 0x35f   :  { %2560 = vst [vmem:[#allocation12] sm:$0xff] %v2557_v23  ;;  %2561 = vst [vmem:[#allocation14] sm:$0xff] %v2558_v24 }
 0x362   :  { %2588 = vxpose.xlu0.b32.start.end [1/1] (short) (narrow) %v2587_v28, 8 }
 0x3de   :  { %v2570_v2 = vpop.trf.xlu0 }
 0x3df   :  { %2586 = vst [vmem:[#allocation7] sm:$0xff] %v2570_v2 }
 0x3e2   :  { %v2589_v29 = vpop.trf.xlu0 }
 0x3e3   :  { %2605 = vst [vmem:[#allocation9] sm:$0xff] %v2589_v29 }
 0x3e6   :  { %v2609_v30 = vld [vmem:[#allocation7] sm:$0x3] }
 0x3e7   :  { %2611 = vst [vmem:[#allocation8] sm:$0x3] %v2609_v30 }
 0x3ea   :  { %v2615_v31 = vld [vmem:[#allocation9] sm:$0x3] }
 0x3eb   :  { %2617 = vst [vmem:[#allocation10] sm:$0x3] %v2615_v31 }
 0x3ee   :  { %v2633_v32 = vld [vmem:[#allocation8] sm:$0x3] }
 0x3ef   :  { %2634 = vst [vmem:[%s3137_s1] sm:$0x3] %v2633_v32 }
 0x3f2   :  { %v2664_v33 = vld [vmem:[#allocation10] sm:$0x3] }
 0x3f3   :  { %2665 = vst [vmem:[%s3138_s2] sm:$0x3] %v2664_v33 }

// kernel: centernet_detect_forward.5
= control target key start
LH: loop header
LB: loop body
LE: loop exit
PB: predicated region body
PF: predicated region fallthrough
CT: control target
= control target key end

     0   :  { %s1032_s6 = smov 0   ;;  %s1452_s0 = inlined_call_operand.vmem [shape: bf16[4,10,18,128], index: 0, kind: input, shape index: {}]   ;;  %s1453_s1 = inlined_call_operand.vmem [shape: f32[4,8,16,128], index: 1, kind: output, shape index: {}]  }
   0x1 LB: > { %s820_s7 = sadd.s32 4294967295, %s1020_s6   ;;  %p824_p0 = scmp.ge.s32.totalorder %s1020_s6, 1  ;;  %s1020_s6 = sphi %s1032_s6, %s11_s6  }
   0x2   : > { %p87_p1 = scmp.lt.s32.totalorder %s1020_s6, 5 }
   0x4   : > { %p88_p2 = pnand %p824_p0, %p87_p1 }
   0x5   : > { %p107_p3 = scmp.lt.s32.totalorder (!%p88_p2), %s820_s7, 3  ;;  %v714_v42 = vlaneseq (!%p88_p2)  ;;  %vm387_vm0 = vcmask (!%p88_p2), 1046528   ;;  %vm478_vm1 = vcmask (!%p88_p2), 1045504   ;;  %vm617_vm3 = vcmask (!%p88_p2), 1040384  }
   0x6   : > { %91 = sbr.rel (%p88_p2) target bundleno = 163 (0xa3), region = 24 }
   0x7   : > { %v1061_v56 = vand.u32 (!%p88_p2), 127, %v714_v42 }
   0x9   : > { %vm716_vm2 = vcmp.lt.s32.totalorder (!%p88_p2), %v1061_v56, 8 }
   0xd   : > { %s1455_s7 = smov (!%p107_p3, %s820_s7), 3 }
   0xe   : > { %s885_s8 = smul.u32 120, %s1455_s7  ;;  %s860_s12 = sshll.u32 %s1455_s7, 7 }
   0xf   : > { %s1150_s15 = scalar_lea.vmem %s1453_s1, %s860_s12 }
  0x10   : > { %s1046_s11 = scalar_lea.vmem %s1452_s0, %s885_s8 }
  0x11   : > { %v862_v0 = vld [vmem:[%s1046_s11] sm:$0xff]   ;;  %v120_v1 = vld [vmem:[%s1046_s11 + $0xc] sm:$0xff]   ;;  %v881_v2 = vld [vmem:[%s1046_s11 + $0x18] sm:$0xff]  }
  0x12   : > { %v863_v3 = vunpack.c.l.bf16 %v862_v0  ;;  %v864_v4 = vunpack.c.h.bf16 %v862_v0  ;;  %v867_v5 = vunpack.c.l.bf16 %v881_v2  ;;  %v119_v6 = vld [vmem:[%s1046_s11 + $0x8] sm:$0x1]  ;;  %v122_v7 = vld [vmem:[%s1046_s11 + $0x14] sm:$0x1]  ;;  %v868_v8 = vunpack.c.h.bf16 %v881_v2  ;;  %v125_v11 = vld [vmem:[%s1046_s11 + $0x20] sm:$0x1] }
  0x13   : > { %v150_v9 = vunpack.c.l.bf16 %v120_v1  ;;  %v151_v10 = vunpack.c.h.bf16 %v120_v1  ;;  %v149_v14 = vunpack.c.l.bf16 %v119_v6  ;;  %v126_v15 = vld [vmem:[%s1046_s11 + $0x24] sm:$0xff]   ;;  %v152_v18 = vunpack.c.l.bf16 %v122_v7  ;;  %v128_v21 = vld [vmem:[%s1046_s11 + $0x2c] sm:$0x1]  ;;  %v882_v24 = vld [vmem:[%s1046_s11 + $0x30] sm:$0xff]  }
  0x14   : > { %v828_v12 = vmul.f32 -1.442695, %v863_v3  ;;  %v829_v13 = vmul.f32 -1.442695, %v864_v4  ;;  %v834_v19 = vmul.f32 -1.442695, %v867_v5  ;;  %v155_v20 = vunpack.c.l.bf16 %v125_v11 }
  0x15   : > { %v831_v16 = vmul.f32 -1.442695, %v150_v9  ;;  %v832_v17 = vmul.f32 -1.442695, %v151_v10  ;;  %v835_v22 = vmul.f32 -1.442695, %v868_v8  ;;  %v156_v23 = vunpack.c.l.bf16 %v126_v15 }
  0x16   : > { %894 = vpow2.f32 %v828_v12  ;;  %v830_v25 = vmul.f32 -1.442695, %v149_v14  ;;  %v157_v26 = vunpack.c.h.bf16 %v126_v15  ;;  %v833_v27 = vmul.f32 -1.442695, %v152_v18  ;;  %v131_v43 = vld [vmem:[%s1046_s11 + $0x38] sm:$0x1] }
  0x17   : > { %896 = vpow2.f32 %v829_v13  ;;  %v158_v28 = vunpack.c.l.bf16 %v128_v21  ;;  %v836_v29 = vmul.f32 -1.442695, %v155_v20  ;;  %v871_v30 = vunpack.c.l.bf16 %v882_v24  ;;  %v132_v46 = vld [vmem:[%s1046_s11 + $0x3c] sm:$0xff]   ;;  %v134_v50 = vld [vmem:[%s1046_s11 + $0x44] sm:$0x1]  ;;  %v883_v54 = vld [vmem:[%s1046_s11 + $0x48] sm:$0xff]  }
  0x18   : > { %898 = vpow2.f32 %v831_v16  ;;  %v837_v31 = vmul.f32 -1.442695, %v156_v23  ;;  %v838_v32 = vmul.f32 -1.442695, %v157_v26  ;;  %v872_v49 = vunpack.c.h.bf16 %v882_v24  ;;  %v137_v63 = vld [vmem:[%s1046_s11 + $0x50] sm:$0x1] }
  0x19   : > { %900 = vpow2.f32 %v832_v17  ;;  %v839_v33 = vmul.f32 -1.442695, %v158_v28  ;;  %v840_v34 = vmul.f32 -1.442695, %v871_v30  ;;  %v161_v53 = vunpack.c.l.bf16 %v131_v43  ;;  %v1065_v8 = vld [vmem:[%s1046_s11 + $0x54] sm:$0xff]  }
  0x1a   : > { %902 = vpow2.f32 %v834_v19  ;;  %v162_v58 = vunpack.c.l.bf16 %v132_v46  ;;  %v163_v61 = vunpack.c.h.bf16 %v132_v46  ;;  %v164_v62 = vunpack.c.l.bf16 %v134_v50 }
  0x1b   : > { %904 = vpow2.f32 %v835_v22  ;;  %v841_v2 = vmul.f32 -1.442695, %v872_v49  ;;  %v875_v3 = vunpack.c.l.bf16 %v883_v54  ;;  %v842_v6 = vmul.f32 -1.442695, %v161_v53 }
  0x1c   : > { %906 = vpow2.f32 %v830_v25  ;;  %v876_v7 = vunpack.c.h.bf16 %v883_v54  ;;  %v1067_v11 = vmul.f32 -1.442695, %v162_v58  ;;  %v167_v12 = vunpack.c.l.bf16 %v137_v63 }
  0x1d   : > { %908 = vpow2.f32 %v833_v27  ;;  %v1069_v15 = vmul.f32 -1.442695, %v163_v61  ;;  %v1071_v16 = vmul.f32 -1.442695, %v164_v62  ;;  %v1073_v19 = vmul.f32 -1.442695, %v875_v3 }
  0x1e   : > { %910 = vpow2.f32 %v836_v29  ;;  %v168_v20 = vunpack.c.l.bf16 %v1065_v8  ;;  %v1076_v24 = vmul.f32 -1.442695, %v876_v7  ;;  %v1080_v28 = vmul.f32 -1.442695, %v167_v12 }
  0x1f   : > { %912 = vpow2.f32 %v837_v31 }
  0x20   : > { %v895_v35 = vpop.eup %894  ;;  %914 = vpow2.f32 %v838_v32  ;;  %v169_v32 = vunpack.c.h.bf16 %v1065_v8 }
  0x21   : > { %v897_v36 = vpop.eup %896  ;;  %v267_v37 = vadd.f32 1.0, %v895_v35  ;;  %916 = vpow2.f32 %v839_v33 }
  0x22   : > { %v899_v38 = vpop.eup %898  ;;  %v268_v39 = vadd.f32 1.0, %v897_v36  ;;  %918 = vpow2.f32 %v840_v34 }
  0x23   : > { %v901_v40 = vpop.eup %900  ;;  %v270_v41 = vadd.f32 1.0, %v899_v38  ;;  %920 = vrcp.f32 %v267_v37 }
  0x24   : > { %v903_v44 = vpop.eup %902  ;;  %v271_v45 = vadd.f32 1.0, %v901_v40  ;;  %922 = vrcp.f32 %v268_v39 }
  0x25   : > { %v905_v47 = vpop.eup %904  ;;  %v273_v48 = vadd.f32 1.0, %v903_v44  ;;  %924 = vrcp.f32 %v270_v41 }
  0x26   : > { %v907_v51 = vpop.eup %906  ;;  %v274_v52 = vadd.f32 1.0, %v905_v47  ;;  %926 = vrcp.f32 %v271_v45 }
  0x27   : > { %v909_v55 = vpop.eup %908  ;;  %928 = vrcp.f32 %v273_v48  ;;  %v269_v57 = vadd.f32 1.0, %v907_v51 }
  0x28   : > { %v911_v59 = vpop.eup %910  ;;  %930 = vrcp.f32 %v274_v52  ;;  %v272_v60 = vadd.f32 1.0, %v909_v55 }
  0x29   : > { %v913_v0 = vpop.eup %912  ;;  %v275_v1 = vadd.f32 1.0, %v911_v59  ;;  %932 = vrcp.f32 %v269_v57 }
  0x2a   : > { %v915_v4 = vpop.eup %914  ;;  %934 = vrcp.f32 %v272_v60  ;;  %v276_v5 = vadd.f32 1.0, %v913_v0 }
  0x2b   : > { %v917_v9 = vpop.eup %916  ;;  %936 = vrcp.f32 %v275_v1  ;;  %v277_v10 = vadd.f32 1.0, %v915_v4 }
  0x2c   : > { %v919_v13 = vpop.eup %918  ;;  %938 = vrcp.f32 %v276_v5  ;;  %v278_v14 = vadd.f32 1.0, %v917_v9 }
  0x2d   : > { %v921_v17 = vpop.eup %920  ;;  %940 = vrcp.f32 %v277_v10  ;;  %v279_v18 = vadd.f32 1.0, %v919_v13 }
  0x2e   : > { %v923_v21 = vpop.eup %922  ;;  %v388_v22 = vrot.slane %v921_v17, 1  ;;  %v479_v23 = vrot.slane %v921_v17, 2  ;;  %942 = vrcp.f32 %v278_v14 }
  0x2f   : > { %v1078_v25 = vpop.eup %924  ;;  %v389_v26 = vrot.slane %v923_v21, 1  ;;  %v480_v27 = vrot.slane %v923_v21, 2  ;;  %944 = vpow2.f32 %v841_v2 }
  0x30   : > { %v1082_v29 = vpop.eup %926  ;;  %v393_v30 = vrot.slane %v1078_v25, 1  ;;  %v484_v31 = vrot.slane %v1078_v25, 2  ;;  %946 = vrcp.f32 %v279_v18 }
  0x31   : > { %v1087_v33 = vpop.eup %928  ;;  %v390_v34 = vsel %vm387_vm0, %v388_v22, %v389_v26  ;;  %v394_v35 = vrot.slane %v1082_v29, 1  ;;  %v481_v36 = vsel %vm478_vm1, %v479_v23, %v480_v27  ;;  %v485_v37 = vrot.slane %v1082_v29, 2 }
  0x32   : > { %v1093_v38 = vpop.eup %930  ;;  %v398_v39 = vrot.slane %v1087_v33, 1  ;;  %v458_v40 = vmax.f32 %v921_v17, %v390_v34  ;;  %v489_v41 = vrot.slane %v1087_v33, 2  ;;  %948 = vpow2.f32 %v842_v6 }
  0x33   : > { %v933_v42 = vpop.eup %932  ;;  %v395_v43 = vsel %vm387_vm0, %v393_v30, %v394_v35  ;;  %v399_v44 = vrot.slane %v1093_v38, 1  ;;  %v486_v45 = vsel %vm478_vm1, %v484_v31, %v485_v37  ;;  %v490_v46 = vrot.slane %v1093_v38, 2 }
  0x34   : > { %v1101_v47 = vpop.eup %934  ;;  %v460_v48 = vmax.f32 %v1078_v25, %v395_v43  ;;  %v549_v49 = vmax.f32 %v458_v40, %v481_v36  ;;  %v391_v50 = vrot.slane %v933_v42, 1  ;;  %v482_v51 = vrot.slane %v933_v42, 2 }
  0x35   : > { %v1104_v52 = vpop.eup %936  ;;  %v400_v53 = vsel %vm387_vm0, %v398_v39, %v399_v44  ;;  %v491_v54 = vsel %vm478_vm1, %v489_v41, %v490_v46  ;;  %v396_v55 = vrot.slane %v1101_v47, 1  ;;  %v487_v57 = vrot.slane %v1101_v47, 2 }
  0x36   : > { %v1111_v58 = vpop.eup %938  ;;  %v462_v59 = vmax.f32 %v1087_v33, %v400_v53  ;;  %v551_v60 = vmax.f32 %v460_v48, %v486_v45  ;;  %v392_v61 = vsel %vm387_vm0, %v389_v26, %v391_v50  ;;  %v401_v62 = vrot.slane %v1104_v52, 1  ;;  %v884_v50 = vld [vmem:[%s1046_s11 + $0x60] sm:$0xff]  }
  0x37   : > { %v1116_v63 = vpop.eup %940  ;;  %v397_v0 = vsel %vm387_vm0, %v394_v35, %v396_v55  ;;  %v459_v1 = vmax.f32 %v923_v21, %v392_v61  ;;  %v483_v2 = vsel %vm478_vm1, %v480_v27, %v482_v51  ;;  %v488_v3 = vsel %vm478_vm1, %v485_v37, %v487_v57 }
  0x38   : > { %v1121_v4 = vpop.eup %942  ;;  %v1123_v5 = vmax.f32 %v462_v59, %v491_v54  ;;  %v569_v6 = vmax.f32 %v549_v49, %v551_v60  ;;  %v402_v7 = vsel %vm387_vm0, %v399_v44, %v401_v62  ;;  %v461_v9 = vmax.f32 %v1082_v29, %v397_v0  ;;  %v140_v49 = vld [vmem:[%s1046_s11 + $0x5c] sm:$0x1] }
  0x39   : > { %v945_v10 = vpop.eup %944  ;;  %v463_v12 = vmax.f32 %v1093_v38, %v402_v7  ;;  %v492_v13 = vrot.slane %v1104_v52, 2  ;;  %v550_v14 = vmax.f32 %v459_v1, %v483_v2  ;;  %v403_v17 = vrot.slane %v1111_v58, 1 }
  0x3a   : > { %v1130_v18 = vpop.eup %946  ;;  %v585_v21 = vmax.f32 %v569_v6, %v1123_v5  ;;  %v552_v22 = vmax.f32 %v461_v9, %v488_v3  ;;  %v404_v23 = vrot.slane %v1116_v63, 1  ;;  %v494_v26 = vrot.slane %v1111_v58, 2  ;;  %v143_v6 = vld [vmem:[%s1046_s11 + $0x68] sm:$0x1] }
  0x3b   : > { %v493_v27 = vsel %vm478_vm1, %v490_v46, %v492_v13  ;;  %v495_v30 = vrot.slane %v1116_v63, 2  ;;  %v571_v31 = vmax.f32 %v551_v60, %v1123_v5  ;;  %v406_v34 = vrot.slane %v1121_v4, 1 }
  0x3c   : > { %v949_v35 = vpop.eup %948  ;;  %v618_v36 = vrot.slane %v585_v21, 7  ;;  %v1140_v37 = vmax.f32 %v463_v12, %v493_v27  ;;  %v570_v39 = vmax.f32 %v550_v14, %v552_v22  ;;  %v405_v40 = vsel %vm387_vm0, %v403_v17, %v404_v23 }
  0x3d   : > { %v464_v41 = vmax.f32 %v1111_v58, %v405_v40  ;;  %v496_v42 = vsel %vm478_vm1, %v494_v26, %v495_v30  ;;  %v407_v43 = vsel %vm387_vm0, %v404_v23, %v406_v34  ;;  %v497_v44 = vrot.slane %v1121_v4, 2 }
  0x3e   : > { %vm666_vm4 = vcmp.eq.f32.partialorder %v1078_v25, %v618_v36  ;;  %v586_v45 = vmax.f32 %v570_v39, %v1140_v37  ;;  %v465_v46 = vmax.f32 %v1116_v63, %v407_v43  ;;  %v572_v48 = vmax.f32 %v552_v22, %v1140_v37  ;;  %v144_v43 = vld [vmem:[%s1046_s11 + $0x6c] sm:$0xff]  }
  0x3f   : > { %v690_v51 = vsel %vm666_vm4, %v1078_v25, 0.0  ;;  %v1159_v53 = vmax.f32 %v464_v41, %v496_v42  ;;  %v498_v54 = vsel %vm478_vm1, %v495_v30, %v497_v44  ;;  %v280_v55 = vadd.f32 1.0, %v945_v10 }
  0x40   : > { %v717_v57 = vsel %vm716_vm2, %v690_v51, -1.0  ;;  %v619_v59 = vrot.slane %v586_v45, 7  ;;  %v1164_v60 = vmax.f32 %v465_v46, %v498_v54  ;;  %v849_v61 = vmul.f32 -1.442695, %v168_v20 }
  0x41   : > { %741 = vst [vmem:[%s1150_s15 - $0x1] sm:$0xfe] %v717_v57  ;;  %v587_v62 = vmax.f32 %v571_v31, %v1159_v53  ;;  %950 = vrcp.f32 %v280_v55  ;;  %v170_v25 = vunpack.c.l.bf16 %v140_v49  ;;  %v879_v0 = vunpack.c.l.bf16 %v884_v50 }
  0x42   : > { %v620_v1 = vsel %vm617_vm3, %v618_v36, %v619_v59  ;;  %vm668_vm5 = vcmp.eq.f32.partialorder %v1101_v47, %v619_v59  ;;  %v588_v2 = vmax.f32 %v572_v48, %v1164_v60  ;;  %v281_v3 = vadd.f32 1.0, %v949_v35 }
  0x43   : > { %vm667_vm6 = vcmp.eq.f32.partialorder %v1082_v29, %v620_v1  ;;  %v692_v20 = vsel %vm668_vm5, %v1101_v47, 0.0  ;;  %v621_v7 = vrot.slane %v587_v62, 7  ;;  %v880_v9 = vunpack.c.h.bf16 %v884_v50 }
  0x44   : > { %v691_v10 = vsel %vm667_vm6, %v1082_v29, 0.0  ;;  %v719_v12 = vsel %vm716_vm2, %v692_v20, -1.0  ;;  %v622_v13 = vrot.slane %v588_v2, 7  ;;  %952 = vrcp.f32 %v281_v3 }
  0x45   : > { %v718_v14 = vsel %vm716_vm2, %v691_v10, -1.0  ;;  %743 = vst [vmem:[%s1150_s15 + $0xf] sm:$0x1] %v719_v12  ;;  %vm669_vm7 = vcmp.eq.f32.partialorder %v1087_v33, %v621_v7  ;;  %954 = vpow2.f32 %v1067_v11  ;;  %v173_v17 = vunpack.c.l.bf16 %v143_v6 }
  0x46   : > { %742 = vst [vmem:[%s1150_s15 + $0x7] sm:$0xff] %v718_v14  ;;  %v693_v47 = vsel %vm669_vm7, %v1087_v33, 0.0  ;;  %v623_v29 = vsel %vm617_vm3, %v621_v7, %v622_v13  ;;  %vm671_vm8 = vcmp.eq.f32.partialorder %v1104_v52, %v622_v13  ;;  %956 = vpow2.f32 %v1069_v15 }
  0x47   : > { %v720_v21 = vsel %vm716_vm2, %v693_v47, -1.0  ;;  %vm670_vm9 = vcmp.eq.f32.partialorder %v1093_v38, %v623_v29  ;;  %v695_v22 = vsel %vm671_vm8, %v1104_v52, 0.0  ;;  %958 = vpow2.f32 %v1071_v16 }
  0x48   : > { %744 = vst [vmem:[%s1150_s15 + $0xf] sm:$0xfe] %v720_v21  ;;  %v694_v11 = vsel %vm670_vm9, %v1093_v38, 0.0  ;;  %v722_v33 = vsel %vm716_vm2, %v695_v22, -1.0  ;;  %960 = vpow2.f32 %v1073_v19  ;;  %v850_v15 = vmul.f32 -1.442695, %v169_v32 }
  0x49   : > { %v721_v23 = vsel %vm716_vm2, %v694_v11, -1.0  ;;  %746 = vst [vmem:[%s1150_s15 + $0x1f] sm:$0x1] %v722_v33  ;;  %962 = vpow2.f32 %v1076_v24  ;;  %v851_v52 = vmul.f32 -1.442695, %v170_v25  ;;  %v408_v16 = vrot.slane %v1130_v18, 1 }
  0x4a   : > { %745 = vst [vmem:[%s1150_s15 + $0x17] sm:$0xff] %v721_v23  ;;  %v499_v38 = vrot.slane %v1130_v18, 2  ;;  %964 = vpow2.f32 %v1080_v28  ;;  %v852_v26 = vmul.f32 -1.442695, %v879_v0  ;;  %v853_v8 = vmul.f32 -1.442695, %v880_v9 }
  0x4b   : > { %v1209_v27 = vpop.eup %950  ;;  %966 = vpow2.f32 %v849_v61  ;;  %v854_v24 = vmul.f32 -1.442695, %v173_v17  ;;  %v573_v28 = vmax.f32 %v1123_v5, %v1159_v53  ;;  %v574_v51 = vmax.f32 %v1140_v37, %v1164_v60  ;;  %v1239_v33 = vld [vmem:[%s1046_s11 + $0x74] sm:$0x1] }
  0x4c   : > { %v409_v19 = vrot.slane %v1209_v27, 1  ;;  %v500_v32 = vrot.slane %v1209_v27, 2  ;;  %968 = vpow2.f32 %v850_v15  ;;  %v174_v61 = vunpack.c.l.bf16 %v144_v43 }
  0x4d   : > { %970 = vpow2.f32 %v851_v52  ;;  %v175_v6 = vunpack.c.h.bf16 %v144_v43 }
  0x4e   : > { %v1213_v30 = vpop.eup %952  ;;  %v410_v31 = vsel %vm387_vm0, %v408_v16, %v409_v19  ;;  %v501_v34 = vsel %vm478_vm1, %v499_v38, %v500_v32  ;;  %972 = vpow2.f32 %v852_v26  ;;  %v855_v12 = vmul.f32 -1.442695, %v174_v61 }
  0x4f   : > { %v955_v35 = vpop.eup %954  ;;  %v466_v36 = vmax.f32 %v1130_v18, %v410_v31  ;;  %v411_v39 = vrot.slane %v1213_v30, 1  ;;  %v502_v40 = vrot.slane %v1213_v30, 2  ;;  %974 = vpow2.f32 %v853_v8 }
  0x50   : > { %v957_v41 = vpop.eup %956  ;;  %v282_v42 = vadd.f32 1.0, %v955_v35  ;;  %976 = vpow2.f32 %v854_v24  ;;  %v856_v11 = vmul.f32 -1.442695, %v175_v6 }
  0x51   : > { %v959_v44 = vpop.eup %958  ;;  %v1223_v45 = vmax.f32 %v466_v36, %v501_v34  ;;  %v412_v46 = vsel %vm387_vm0, %v409_v19, %v411_v39  ;;  %v503_v5 = vsel %vm478_vm1, %v500_v32, %v502_v40  ;;  %v283_v48 = vadd.f32 1.0, %v957_v41 }
  0x52   : > { %v961_v49 = vpop.eup %960  ;;  %v467_v50 = vmax.f32 %v1209_v27, %v412_v46  ;;  %978 = vrcp.f32 %v282_v42  ;;  %v284_v54 = vadd.f32 1.0, %v959_v44  ;;  %v176_v19 = vunpack.c.l.bf16 %v1239_v33 }
  0x53   : > { %v963_v55 = vpop.eup %962  ;;  %v589_v57 = vmax.f32 %v573_v28, %v1223_v45  ;;  %980 = vrcp.f32 %v283_v48  ;;  %v285_v59 = vadd.f32 1.0, %v961_v49  ;;  %v575_v35 = vmax.f32 %v1159_v53, %v1223_v45 }
  0x54   : > { %v965_v62 = vpop.eup %964  ;;  %v1231_v25 = vmax.f32 %v467_v50, %v503_v5  ;;  %982 = vrcp.f32 %v284_v54  ;;  %v286_v0 = vadd.f32 1.0, %v963_v55 }
  0x55   : > { %v967_v1 = vpop.eup %966  ;;  %v624_v2 = vrot.slane %v589_v57, 7  ;;  %984 = vrcp.f32 %v285_v59  ;;  %v287_v3 = vadd.f32 1.0, %v965_v62 }
  0x56   : > { %v969_v20 = vpop.eup %968  ;;  %v590_v37 = vmax.f32 %v574_v51, %v1231_v25  ;;  %986 = vrcp.f32 %v286_v0  ;;  %v288_v7 = vadd.f32 1.0, %v967_v1  ;;  %v576_v41 = vmax.f32 %v1164_v60, %v1231_v25 }
  0x57   : > { %v971_v9 = vpop.eup %970  ;;  %vm672_vm10 = vcmp.eq.f32.partialorder %v1111_v58, %v624_v2  ;;  %988 = vrcp.f32 %v287_v3  ;;  %v289_v10 = vadd.f32 1.0, %v969_v20 }
  0x58   : > { %v973_v13 = vpop.eup %972  ;;  %v696_v14 = vsel %vm672_vm10, %v1111_v58, 0.0  ;;  %v625_v17 = vrot.slane %v590_v37, 7  ;;  %990 = vrcp.f32 %v288_v7  ;;  %v290_v47 = vadd.f32 1.0, %v971_v9 }
  0x59   : > { %v975_v29 = vpop.eup %974  ;;  %v723_v21 = vsel %vm716_vm2, %v696_v14, -1.0  ;;  %992 = vrcp.f32 %v289_v10  ;;  %v291_v22 = vadd.f32 1.0, %v973_v13 }
  0x5a   : > { %v977_v15 = vpop.eup %976  ;;  %747 = vst [vmem:[%s1150_s15 + $0x1f] sm:$0xfe] %v723_v21  ;;  %v626_v23 = vsel %vm617_vm3, %v624_v2, %v625_v17  ;;  %vm674_vm11 = vcmp.eq.f32.partialorder %v1121_v4, %v625_v17  ;;  %994 = vrcp.f32 %v290_v47  ;;  %v292_v58 = vadd.f32 1.0, %v975_v29 }
  0x5b   : > { %vm673_vm12 = vcmp.eq.f32.partialorder %v1116_v63, %v626_v23  ;;  %v698_v52 = vsel %vm674_vm11, %v1121_v4, 0.0  ;;  %996 = vrcp.f32 %v291_v22  ;;  %v293_v16 = vadd.f32 1.0, %v977_v15 }
  0x5c   : > { %v1246_v38 = vpop.eup %978  ;;  %v697_v26 = vsel %vm673_vm12, %v1116_v63, 0.0  ;;  %v725_v8 = vsel %vm716_vm2, %v698_v52, -1.0  ;;  %998 = vrcp.f32 %v292_v58 }
  0x5d   : > { %v1252_v32 = vpop.eup %980  ;;  %v724_v24 = vsel %vm716_vm2, %v697_v26, -1.0  ;;  %749 = vst [vmem:[%s1150_s15 + $0x2f] sm:$0x1] %v725_v8  ;;  %v413_v4 = vrot.slane %v1246_v38, 1  ;;  %v504_v31 = vrot.slane %v1246_v38, 2  ;;  %1000 = vrcp.f32 %v293_v16 }
  0x5e   : > { %v1259_v34 = vpop.eup %982  ;;  %748 = vst [vmem:[%s1150_s15 + $0x27] sm:$0xff] %v724_v24  ;;  %v414_v63 = vrot.slane %v1252_v32, 1  ;;  %v505_v28 = vrot.slane %v1252_v32, 2  ;;  %1002 = vpow2.f32 %v855_v12 }
  0x5f   : > { %v1266_v36 = vpop.eup %984  ;;  %v416_v39 = vrot.slane %v1259_v34, 1  ;;  %v507_v40 = vrot.slane %v1259_v34, 2  ;;  %1004 = vpow2.f32 %v856_v11 }
  0x60   : > { %v1272_v42 = vpop.eup %986  ;;  %v415_v43 = vsel %vm387_vm0, %v413_v4, %v414_v63  ;;  %v506_v44 = vsel %vm478_vm1, %v504_v31, %v505_v28  ;;  %v418_v46 = vrot.slane %v1266_v36, 1  ;;  %v509_v53 = vrot.slane %v1266_v36, 2 }
  0x61   : > { %v1278_v5 = vpop.eup %988  ;;  %v468_v48 = vmax.f32 %v1246_v38, %v415_v43  ;;  %v417_v49 = vsel %vm387_vm0, %v414_v63, %v416_v39  ;;  %v508_v50 = vsel %vm478_vm1, %v505_v28, %v507_v40  ;;  %v419_v60 = vrot.slane %v1272_v42, 1 }
  0x62   : > { %v1284_v51 = vpop.eup %990  ;;  %v469_v54 = vmax.f32 %v1252_v32, %v417_v49  ;;  %v510_v55 = vrot.slane %v1272_v42, 2  ;;  %v421_v57 = vrot.slane %v1278_v5, 1  ;;  %v512_v59 = vrot.slane %v1278_v5, 2 }
  0x63   : > { %v1290_v61 = vpop.eup %992  ;;  %v559_v62 = vmax.f32 %v468_v48, %v506_v44  ;;  %v420_v0 = vsel %vm387_vm0, %v418_v46, %v419_v60  ;;  %v423_v1 = vrot.slane %v1284_v51, 1  ;;  %v514_v2 = vrot.slane %v1284_v51, 2 }
  0x64   : > { %v1295_v3 = vpop.eup %994  ;;  %v1297_v6 = vmax.f32 %v469_v54, %v508_v50  ;;  %v470_v20 = vmax.f32 %v1266_v36, %v420_v0  ;;  %v511_v37 = vsel %vm478_vm1, %v509_v53, %v510_v55  ;;  %v422_v7 = vsel %vm387_vm0, %v419_v60, %v421_v57 }
  0x65   : > { %v1302_v9 = vpop.eup %996  ;;  %v591_v10 = vmax.f32 %v575_v35, %v559_v62  ;;  %v577_v12 = vmax.f32 %v1223_v45, %v559_v62  ;;  %v471_v13 = vmax.f32 %v1272_v42, %v422_v7  ;;  %v513_v14 = vsel %vm478_vm1, %v510_v55, %v512_v59 }
  0x66   : > { %v1307_v17 = vpop.eup %998  ;;  %v592_v47 = vmax.f32 %v576_v41, %v1297_v6  ;;  %v1310_v29 = vmax.f32 %v470_v20, %v511_v37  ;;  %v578_v21 = vmax.f32 %v1231_v25, %v1297_v6  ;;  %v424_v22 = vrot.slane %v1290_v61, 1 }
  0x67   : > { %v1315_v11 = vpop.eup %1000  ;;  %v627_v15 = vrot.slane %v591_v10, 7  ;;  %v1317_v23 = vmax.f32 %v471_v13, %v513_v14  ;;  %v515_v45 = vrot.slane %v1290_v61, 2  ;;  %v426_v58 = vrot.slane %v1295_v3, 1 }
  0x68   : > { %v1321_v52 = vpop.eup %1002  ;;  %v628_v16 = vrot.slane %v592_v47, 7  ;;  %v593_v26 = vmax.f32 %v577_v12, %v1310_v29  ;;  %v425_v8 = vsel %vm387_vm0, %v423_v1, %v424_v22  ;;  %v579_v25 = vmax.f32 %v559_v62, %v1310_v29 }
  0x69   : > { %v1326_v24 = vpop.eup %1004  ;;  %vm675_vm13 = vcmp.eq.f32.partialorder %v1130_v18, %v627_v15  ;;  %v594_v4 = vmax.f32 %v578_v21, %v1317_v23  ;;  %v472_v31 = vmax.f32 %v1284_v51, %v425_v8  ;;  %v516_v63 = vsel %vm478_vm1, %v514_v2, %v515_v45 }
  0x6a   : > { %v699_v28 = vsel %vm675_vm13, %v1130_v18, 0.0  ;;  %v629_v35 = vsel %vm617_vm3, %v627_v15, %v628_v16  ;;  %vm677_vm14 = vcmp.eq.f32.partialorder %v1213_v30, %v628_v16  ;;  %v630_v39 = vrot.slane %v593_v26, 7 }
  0x6b   : > { %v726_v40 = vsel %vm716_vm2, %v699_v28, -1.0  ;;  %vm676_vm15 = vcmp.eq.f32.partialorder %v1209_v27, %v629_v35  ;;  %v701_v41 = vsel %vm677_vm14, %v1213_v30, 0.0  ;;  %v631_v43 = vrot.slane %v594_v4, 7 }
  0x6c   : > { %750 = vst [vmem:[%s1150_s15 + $0x2f] sm:$0xfe] %v726_v40  ;;  %v700_v44 = vsel %vm676_vm15, %v1209_v27, 0.0  ;;  %v728_v18 = vsel %vm716_vm2, %v701_v41, -1.0  ;;  %vm678_vm4 = vcmp.eq.f32.partialorder %v1246_v38, %v630_v39  ;;  %v1344_v46 = vmax.f32 %v472_v31, %v516_v63 }
  0x6d   : > { %v727_v53 = vsel %vm716_vm2, %v700_v44, -1.0  ;;  %752 = vst [vmem:[%s1150_s15 + $0x3f] sm:$0x1] %v728_v18  ;;  %v702_v48 = vsel %vm678_vm4, %v1246_v38, 0.0  ;;  %v632_v30 = vsel %vm617_vm3, %v630_v39, %v631_v43  ;;  %vm680_vm5 = vcmp.eq.f32.partialorder %v1259_v34, %v631_v43 }
  0x6e   : > { %751 = vst [vmem:[%s1150_s15 + $0x37] sm:$0xff] %v727_v53  ;;  %v729_v27 = vsel %vm716_vm2, %v702_v48, -1.0  ;;  %vm679_vm6 = vcmp.eq.f32.partialorder %v1252_v32, %v632_v30  ;;  %v704_v49 = vsel %vm680_vm5, %v1259_v34, 0.0  ;;  %v595_v50 = vmax.f32 %v579_v25, %v1344_v46 }
  0x6f   : > { %753 = vst [vmem:[%s1150_s15 + $0x3f] sm:$0xfe] %v729_v27  ;;  %v703_v60 = vsel %vm679_vm6, %v1252_v32, 0.0  ;;  %v731_v38 = vsel %vm716_vm2, %v704_v49, -1.0  ;;  %v427_v54 = vsel %vm387_vm0, %v424_v22, %v426_v58  ;;  %v517_v55 = vrot.slane %v1295_v3, 2 }
  0x70   : > { %v730_v57 = vsel %vm716_vm2, %v703_v60, -1.0  ;;  %755 = vst [vmem:[%s1150_s15 + $0x4f] sm:$0x1] %v731_v38  ;;  %v633_v59 = vrot.slane %v595_v50, 7  ;;  %v473_v62 = vmax.f32 %v1290_v61, %v427_v54  ;;  %v580_v34 = vmax.f32 %v1297_v6, %v1317_v23 }
  0x71   : > { %754 = vst [vmem:[%s1150_s15 + $0x47] sm:$0xff] %v730_v57  ;;  %v518_v32 = vsel %vm478_vm1, %v515_v45, %v517_v55  ;;  %v428_v0 = vrot.slane %v1302_v9, 1  ;;  %v429_v1 = vrot.slane %v1307_v17, 1  ;;  %v519_v2 = vrot.slane %v1302_v9, 2 }
  0x72   : > { %vm681_vm7 = vcmp.eq.f32.partialorder %v1266_v36, %v633_v59  ;;  %v1376_v20 = vmax.f32 %v473_v62, %v518_v32  ;;  %v520_v37 = vrot.slane %v1307_v17, 2  ;;  %v581_v7 = vmax.f32 %v1310_v29, %v1344_v46 }
  0x73   : > { %v705_v6 = vsel %vm681_vm7, %v1266_v36, 0.0  ;;  %v430_v10 = vsel %vm387_vm0, %v428_v0, %v429_v1  ;;  %v431_v12 = vrot.slane %v1315_v11, 1  ;;  %v522_v13 = vrot.slane %v1315_v11, 2 }
  0x74   : > { %v732_v14 = vsel %vm716_vm2, %v705_v6, -1.0  ;;  %v596_v47 = vmax.f32 %v580_v34, %v1376_v20  ;;  %v474_v21 = vmax.f32 %v1302_v9, %v430_v10  ;;  %v521_v22 = vsel %vm478_vm1, %v519_v2, %v520_v37 }
  0x75   : > { %756 = vst [vmem:[%s1150_s15 + $0x4f] sm:$0xfe] %v732_v14  ;;  %v432_v29 = vsel %vm387_vm0, %v429_v1, %v431_v12  ;;  %v523_v36 = vsel %vm478_vm1, %v520_v37, %v522_v13  ;;  %v582_v15 = vmax.f32 %v1317_v23, %v1376_v20  ;;  %v294_v45 = vadd.f32 1.0, %v1321_v52 }
  0x76   : > { %v634_v58 = vrot.slane %v596_v47, 7  ;;  %v565_v16 = vmax.f32 %v474_v21, %v521_v22  ;;  %v475_v26 = vmax.f32 %v1307_v17, %v432_v29  ;;  %v295_v8 = vadd.f32 1.0, %v1326_v24 }
  0x77   : > { %1006 = vrcp.f32 %v294_v45  ;;  %v857_v25 = vmul.f32 -1.442695, %v176_v19 }
  0x78   : > { %v635_v4 = vsel %vm617_vm3, %v633_v59, %v634_v58  ;;  %vm683_vm8 = vcmp.eq.f32.partialorder %v1278_v5, %v634_v58  ;;  %v597_v31 = vmax.f32 %v581_v7, %v565_v16  ;;  %v566_v23 = vmax.f32 %v475_v26, %v523_v36 }
  0x79   : > { %vm682_vm9 = vcmp.eq.f32.partialorder %v1272_v42, %v635_v4  ;;  %v707_v52 = vsel %vm683_vm8, %v1278_v5, 0.0  ;;  %1008 = vrcp.f32 %v295_v8  ;;  %v583_v38 = vmax.f32 %v1344_v46, %v565_v16 }
  0x7a   : > { %v706_v63 = vsel %vm682_vm9, %v1272_v42, 0.0  ;;  %v734_v24 = vsel %vm716_vm2, %v707_v52, -1.0  ;;  %v636_v33 = vrot.slane %v597_v31, 7  ;;  %v598_v28 = vmax.f32 %v582_v15, %v566_v23 }
  0x7b   : > { %v733_v19 = vsel %vm716_vm2, %v706_v63, -1.0  ;;  %758 = vst [vmem:[%s1150_s15 + $0x5f] sm:$0x1] %v734_v24  ;;  %1010 = vpow2.f32 %v857_v25  ;;  %v584_v37 = vmax.f32 %v1376_v20, %v566_v23 }
  0x7c   : > { %757 = vst [vmem:[%s1150_s15 + $0x57] sm:$0xff] %v733_v19  ;;  %vm684_vm10 = vcmp.eq.f32.partialorder %v1284_v51, %v636_v33  ;;  %v637_v5 = vrot.slane %v598_v28, 7 }
  0x7d   : > { %v708_v35 = vsel %vm684_vm10, %v1284_v51, 0.0 }
  0x7e   : > { %v735_v42 = vsel %vm716_vm2, %v708_v35, -1.0  ;;  %v638_v39 = vsel %vm617_vm3, %v636_v33, %v637_v5  ;;  %vm686_vm11 = vcmp.eq.f32.partialorder %v1295_v3, %v637_v5 }
  0x7f   : > { %759 = vst [vmem:[%s1150_s15 + $0x5f] sm:$0xfe] %v735_v42  ;;  %vm685_vm12 = vcmp.eq.f32.partialorder %v1290_v61, %v638_v39  ;;  %v710_v40 = vsel %vm686_vm11, %v1295_v3, 0.0 }
  0x80   : > { %v709_v41 = vsel %vm685_vm12, %v1290_v61, 0.0  ;;  %v737_v43 = vsel %vm716_vm2, %v710_v40, -1.0 }
  0x81   : > { %v1007_v44 = vpop.eup %1006  ;;  %v736_v51 = vsel %vm716_vm2, %v709_v41, -1.0  ;;  %761 = vst [vmem:[%s1150_s15 + $0x6f] sm:$0x1] %v737_v43 }
  0x82   : > { %760 = vst [vmem:[%s1150_s15 + $0x67] sm:$0xff] %v736_v51  ;;  %v433_v18 = vrot.slane %v1007_v44, 1  ;;  %v524_v53 = vrot.slane %v1007_v44, 2 }
  0x83   : > { %v1009_v48 = vpop.eup %1008 }
  0x84   : > { %v434_v30 = vrot.slane %v1009_v48, 1  ;;  %v525_v27 = vrot.slane %v1009_v48, 2 }
  0x85   : > { %v1011_v49 = vpop.eup %1010 }
  0x86   : > { %v435_v3 = vsel %vm387_vm0, %v433_v18, %v434_v30  ;;  %v526_v61 = vsel %vm478_vm1, %v524_v53, %v525_v27  ;;  %v296_v50 = vadd.f32 1.0, %v1011_v49 }
  0x87   : > { %v476_v60 = vmax.f32 %v1007_v44, %v435_v3 }
  0x88   : > { %1012 = vrcp.f32 %v296_v50 }
  0x89   : > { %v567_v54 = vmax.f32 %v476_v60, %v526_v61 }
  0x8b   : > { %v599_v55 = vmax.f32 %v583_v38, %v567_v54 }
  0x8d   : > { %v639_v57 = vrot.slane %v599_v55, 7 }
  0x8f   : > { %vm687_vm13 = vcmp.eq.f32.partialorder %v1302_v9, %v639_v57 }
  0x90   : > { %v711_v59 = vsel %vm687_vm13, %v1302_v9, 0.0 }
  0x91   : > { %v738_v62 = vsel %vm716_vm2, %v711_v59, -1.0 }
  0x92   : > { %v1013_v34 = vpop.eup %1012  ;;  %762 = vst [vmem:[%s1150_s15 + $0x6f] sm:$0xfe] %v738_v62 }
  0x93   : > { %v436_v32 = vrot.slane %v1013_v34, 1  ;;  %v527_v0 = vrot.slane %v1013_v34, 2 }
  0x95   : > { %v437_v1 = vsel %vm387_vm0, %v434_v30, %v436_v32  ;;  %v528_v46 = vsel %vm478_vm1, %v525_v27, %v527_v0 }
  0x96   : > { %v477_v2 = vmax.f32 %v1009_v48, %v437_v1 }
  0x98   : > { %v568_v7 = vmax.f32 %v477_v2, %v528_v46 }
  0x9a   : > { %v600_v6 = vmax.f32 %v584_v37, %v568_v7 }
  0x9c   : > { %v640_v10 = vrot.slane %v600_v6, 7 }
  0x9e   : > { %v641_v9 = vsel %vm617_vm3, %v639_v57, %v640_v10  ;;  %vm689_vm14 = vcmp.eq.f32.partialorder %v1315_v11, %v640_v10 }
  0x9f   : > { %vm688_vm15 = vcmp.eq.f32.partialorder %v1307_v17, %v641_v9  ;;  %v713_v12 = vsel %vm689_vm14, %v1315_v11, 0.0 }
  0xa0   : > { %v712_v13 = vsel %vm688_vm15, %v1307_v17, 0.0  ;;  %v740_v14 = vsel %vm716_vm2, %v713_v12, -1.0 }
  0xa1   : > { %v739_v47 = vsel %vm716_vm2, %v712_v13, -1.0  ;;  %764 = vst [vmem:[%s1150_s15 + $0x7f] sm:$0x1] %v740_v14 }
  0xa2   : > { %763 = vst [vmem:[%s1150_s15 + $0x77] sm:$0xff] %v739_v47 }
  0xa3 PF: > { %s11_s6 = sadd.s32 1, %s1020_s6  }
  0xa4   : > { %p8_p4 = scmp.ge.s32.totalorder %s11_s6, 6  }
  0xa6   :  { %10 = sbr.rel (!%p8_p4) target bundleno = 1 (0x1), region = 54 }

</bundles_post_ra>
